<compile_context>
chip_gen: v6e
topology: v6e:2x2x1
jax: 0.10.0
libtpu: 0.0.40
codegen_flags: <defaults>
</compile_context>

<pallas_src>
import functools
import math

import jax
import jax.numpy as jnp
from jax.experimental import pallas as pl
from jax.experimental.pallas import tpu as pltpu

BN_EPS = 1e-5        # nn.BatchNorm1d default eps
L2_EPS = 1e-12       # F.normalize default eps
VMEM_LIMIT = 48 << 20   # safe on v7x (64 MiB physical); footprint <= ~30 MB
TN_TARGET = 1920        # prod hidden dim 3840 -> N//tn == 2 (one half per TC on v7x)


def _pick_tn(n, target=TN_TARGET):
    """Largest multiple of 128 that divides n and is <= target (else n)."""
    if n % 128 != 0:
        return n
    best = 128
    d = 128
    while d <= min(n, target):
        if n % d == 0:
            best = d
        d += 128
    return best


def _n_dim_semantics():
    """CORE_PARALLEL on v7x (2 TensorCores/chip), PARALLEL elsewhere."""
    try:
        kind = jax.devices()[0].device_kind.lower()
    except Exception:
        kind = ""
    if "v7" in kind:
        return (pltpu.CORE_PARALLEL,)
    return (pltpu.PARALLEL,)


# ------------- fused (int8 Linear) -> BatchNorm1d(train) -> ReLU -------------

def _linear_bn_relu_kernel(x_ref, w_ref, scale_ref, b_ref, g_ref, beta_ref,
                           o_ref, *, inv_b):
    # int8 weight block is streamed from HBM; upcast to bf16 only in VMEM.
    acc = jnp.dot(x_ref[...], w_ref[...].astype(jnp.bfloat16),
                  preferred_element_type=jnp.float32)
    h = acc * scale_ref[...] + b_ref[...]          # dequant + Linear bias
    # BatchNorm1d training-mode forward (biased batch variance), per column.
    mean = jnp.sum(h, axis=0, keepdims=True) * inv_b
    hc = h - mean
    var = jnp.sum(hc * hc, axis=0, keepdims=True) * inv_b
    hn = hc * jax.lax.rsqrt(var + BN_EPS) * g_ref[...] + beta_ref[...]
    o_ref[...] = jnp.maximum(hn, 0.0).astype(o_ref.dtype)


def linear_bn_relu(x, w_tiled, scale, b, g, beta):
    B, K = x.shape
    n_tiles, k_w, tn = w_tiled.shape
    assert k_w == K
    N = n_tiles * tn
    kernel = functools.partial(_linear_bn_relu_kernel, inv_b=1.0 / B)
    return pl.pallas_call(
        kernel,
        out_shape=jax.ShapeDtypeStruct((B, N), jnp.bfloat16),
        grid_spec=pltpu.PrefetchScalarGridSpec(
            num_scalar_prefetch=0,
            grid=(n_tiles,),
            in_specs=[
                pl.BlockSpec((B, K), lambda n: (0, 0)),           # activations
                pl.BlockSpec((None, K, tn), lambda n: (n, 0, 0)),  # int8 slab
                pl.BlockSpec((1, tn), lambda n: (0, n)),           # dequant scale
                pl.BlockSpec((1, tn), lambda n: (0, n)),           # bias
                pl.BlockSpec((1, tn), lambda n: (0, n)),           # BN gamma
                pl.BlockSpec((1, tn), lambda n: (0, n)),           # BN beta
            ],
            out_specs=pl.BlockSpec((B, tn), lambda n: (0, n)),
        ),
        compiler_params=pltpu.CompilerParams(
            dimension_semantics=_n_dim_semantics(),
            vmem_limit_bytes=VMEM_LIMIT),
    )(x, w_tiled, scale, b, g, beta)


# ---------- final (int8 Linear) + L2-normalize(dim=1) + proxy matmul ---------

def _final_kernel(x_ref, w_ref, scale_ref, b_ref, p_ref, proj_ref, sim_ref):
    acc = jnp.dot(x_ref[...], w_ref[...].astype(jnp.bfloat16),
                  preferred_element_type=jnp.float32)
    y = acc * scale_ref[...] + b_ref[...]
    # F.normalize(y, dim=1): 1/max(||y||, eps) == rsqrt(max(sumsq, eps^2))
    sumsq = jnp.sum(y * y, axis=1, keepdims=True)
    y_n = y * jax.lax.rsqrt(jnp.maximum(sumsq, L2_EPS * L2_EPS))
    proj_ref[...] = y_n
    sim_ref[...] = jnp.dot(y_n.astype(p_ref.dtype), p_ref[...],
                           preferred_element_type=jnp.float32)


def final_linear_norm_sim(x, w_q, scale, b, p_norm_padded):
    B, _ = x.shape
    D = w_q.shape[1]
    Cpad = p_norm_padded.shape[1]
    # Single gridless invocation: int8 w4 + bf16 proxies fit VMEM comfortably.
    return pl.pallas_call(
        _final_kernel,
        out_shape=(jax.ShapeDtypeStruct((B, D), jnp.float32),
                   jax.ShapeDtypeStruct((B, Cpad), jnp.float32)),
        compiler_params=pltpu.CompilerParams(vmem_limit_bytes=VMEM_LIMIT),
    )(x, w_q, scale, b, p_norm_padded)


# ---------------------------- params / param prep ----------------------------

def init_params(key, feat_dim, num_old_classes, num_proxy_base):
    """f32 master weights with PyTorch-default init."""
    hidden = 5 * feat_dim
    n_proxy_cols = num_old_classes * num_proxy_base
    keys = jax.random.split(key, 9)

    def lin(kw, kb, fan_in, fan_out):
        # PyTorch Linear default: U(-1/sqrt(fan_in), +1/sqrt(fan_in))
        bound = 1.0 / math.sqrt(fan_in)
        w = jax.random.uniform(kw, (fan_in, fan_out), jnp.float32, -bound, bound)
        b = jax.random.uniform(kb, (1, fan_out), jnp.float32, -bound, bound)
        return w, b

    w1, b1 = lin(keys[0], keys[1], feat_dim, hidden)
    w2, b2 = lin(keys[2], keys[3], hidden, hidden)
    w3, b3 = lin(keys[4], keys[5], hidden, hidden)
    w4, b4 = lin(keys[6], keys[7], hidden, feat_dim)

    ones = jnp.ones((1, hidden), jnp.float32)   # BatchNorm1d weight
    zeros = jnp.zeros((1, hidden), jnp.float32)  # BatchNorm1d bias

    # Proxies_old_base: kaiming_uniform_(a=sqrt(5)) on (feat_dim, n_cols)
    # => U(-1/sqrt(n_cols), +1/sqrt(n_cols)) since fan_in = size(1) = n_cols.
    p_bound = 1.0 / math.sqrt(n_proxy_cols)
    proxies = jax.random.uniform(keys[8], (feat_dim, n_proxy_cols), jnp.float32,
                                 -p_bound, p_bound)

    return dict(proxies_old_base=proxies,
                w1=w1, b1=b1, g1=ones, be1=zeros,
                w2=w2, b2=b2, g2=ones, be2=zeros,
                w3=w3, b3=b3, g3=ones, be3=zeros,
                w4=w4, b4=b4)


def _quantize_int8_per_col(w):
    """Symmetric per-output-channel int8 quantization; returns (q, scale)."""
    amax = jnp.max(jnp.abs(w), axis=0, keepdims=True)
    scale = jnp.maximum(amax, 1e-30) / 127.0
    q = jnp.clip(jnp.round(w / scale), -127.0, 127.0).astype(jnp.int8)
    return q, scale.astype(jnp.float32)


def _pretile_cols(q):
    """(K, N) -> (N//tn, K, tn) block-contiguous slabs (one DMA burst each)."""
    K, N = q.shape
    tn = _pick_tn(N)
    return jnp.transpose(q.reshape(K, N // tn, tn), (1, 0, 2))


def prepare_params(params):
    """One-time parameter prep: quantize/pre-tile weights, normalize proxies.

    All parameter-only work lives here so the hot jitted forward never
    recomputes it (removes the extra XLA ops/dispatch gaps from the forward).
    """
    prep = {}
    for i in (1, 2, 3):
        q, s = _quantize_int8_per_col(params[f"w{i}"])
        prep[f"w{i}q"] = _pretile_cols(q)
        prep[f"s{i}"] = s
        prep[f"b{i}"] = params[f"b{i}"]
        prep[f"g{i}"] = params[f"g{i}"]
        prep[f"be{i}"] = params[f"be{i}"]
    q4, s4 = _quantize_int8_per_col(params["w4"])
    prep["w4q"] = q4
    prep["s4"] = s4
    prep["b4"] = params["b4"]

    # Proxy column L2-normalization + bf16 cast + lane padding (mult. of 128)
    # so the similarity output is lane-dense (no masked vst).
    p = params["proxies_old_base"]
    pnorm = jnp.sqrt(jnp.sum(p * p, axis=0, keepdims=True))
    p_n = (p / jnp.maximum(pnorm, L2_EPS)).astype(jnp.bfloat16)
    C = p.shape[1]
    Cpad = ((C + 127) // 128) * 128
    prep["proxies_norm_padded"] = jnp.pad(p_n, ((0, 0), (0, Cpad - C)))
    return prep


# --------------------------------- forward -----------------------------------

def forward_proxies(feats, prep, *, num_proxy_cols):
    # adapter_old = MLP(feat_dim, 5*feat_dim, feat_dim, num_hidden_layers=3)
    h = feats.astype(jnp.bfloat16)
    h = linear_bn_relu(h, prep["w1q"], prep["s1"], prep["b1"], prep["g1"], prep["be1"])
    h = linear_bn_relu(h, prep["w2q"], prep["s2"], prep["b2"], prep["g2"], prep["be2"])
    h = linear_bn_relu(h, prep["w3q"], prep["s3"], prep["b3"], prep["g3"], prep["be3"])
    proj, sim = final_linear_norm_sim(h, prep["w4q"], prep["s4"], prep["b4"],
                                      prep["proxies_norm_padded"])
    return {"similarity_old_base": sim[:, :num_proxy_cols],
            "feats_proj_old": proj}


def multi_proxy_forward(feats, feats_map, prep, *, num_proxy_cols):
    # Non-list path of MultiProxyModel.forward (encoder outputs provided).
    out = forward_proxies(feats, prep, num_proxy_cols=num_proxy_cols)
    out["feats"] = feats
    out["feats_map"] = feats_map
    return out


if __name__ == "__main__":
    # Small, module-consistent shapes (feat_dim would be 768 in production).
    B = 8
    FEAT_DIM = 128
    NUM_OLD_CLASSES = 4
    NUM_PROXY_BASE = 2
    HS = WS = 14  # head_region expects 196 = 14*14 spatial tokens (unused in fwd)

    key = jax.random.PRNGKey(0)
    k_feats, k_map, k_params = jax.random.split(key, 3)

    feats = jax.random.normal(k_feats, (B, FEAT_DIM), jnp.float32)
    feats_map = jax.random.normal(k_map, (B, FEAT_DIM, HS, WS), jnp.float32)

    params = init_params(k_params, FEAT_DIM, NUM_OLD_CLASSES, NUM_PROXY_BASE)
    prep = prepare_params(params)             # one-time parameter prep
    C = NUM_OLD_CLASSES * NUM_PROXY_BASE

    fwd = jax.jit(functools.partial(multi_proxy_forward, num_proxy_cols=C))
    out = fwd(feats, feats_map, prep)
    jax.block_until_ready(out)

    assert out["similarity_old_base"].shape == (B, C)
    assert out["feats_proj_old"].shape == (B, FEAT_DIM)
    assert out["feats"].shape == (B, FEAT_DIM)
    assert out["feats_map"].shape == (B, FEAT_DIM, HS, WS)
    assert bool(jnp.all(jnp.isfinite(out["similarity_old_base"])))
    assert bool(jnp.all(jnp.isfinite(out["feats_proj_old"])))
    # feats_proj_old rows are L2-normalized
    row_norms = jnp.sqrt(jnp.sum(out["feats_proj_old"].astype(jnp.float32) ** 2,
                                 axis=1))
    assert bool(jnp.all(jnp.abs(row_norms - 1.0) < 1e-3))
    # similarities are cosine-like (unit rows x unit columns, bf16 slack)
    assert bool(jnp.all(jnp.abs(out["similarity_old_base"]) <= 1.05))
    print("KERNEL_OK")
</pallas_src>

<mosaic_0001>
module attributes {stable_mosaic.version = 11 : i64} {
  func.func @_linear_bn_relu_kernel(%arg0: i32, %arg1: memref<8x640xbf16, #tpu.memory_space<vmem>>, %arg2: memref<1x640x640xi8, #tpu.memory_space<vmem>>, %arg3: memref<1x640xf32, #tpu.memory_space<vmem>>, %arg4: memref<1x640xf32, #tpu.memory_space<vmem>>, %arg5: memref<1x640xf32, #tpu.memory_space<vmem>>, %arg6: memref<1x640xf32, #tpu.memory_space<vmem>>, %arg7: memref<8x640xbf16, #tpu.memory_space<vmem>>) attributes {dimension_semantics = [#tpu.dimension_semantics<parallel>], iteration_bounds = array<i64: 1>, scalar_prefetch = 0 : i64, scratch_operands = 0 : i64, tpu.core_type = #tpu.core_type<tc>, window_params = [{pipeline_mode = #tpu.pipeline_mode<synchronous>, transform_indices = @transform_0, window_bounds = array<i64: 8, 640>}, {transform_indices = @transform_1, window_bounds = array<i64: 1, 640, 640>}, {transform_indices = @transform_2, window_bounds = array<i64: 1, 640>}, {transform_indices = @transform_3, window_bounds = array<i64: 1, 640>}, {transform_indices = @transform_4, window_bounds = array<i64: 1, 640>}, {transform_indices = @transform_5, window_bounds = array<i64: 1, 640>}, {transform_indices = @transform_6, window_bounds = array<i64: 8, 640>}]} {
    %c0 = arith.constant 0 : index
    %c0_0 = arith.constant 0 : index
    %0 = vector.load %arg1[%c0, %c0_0] : memref<8x640xbf16, #tpu.memory_space<vmem>>, vector<8x640xbf16>
    %c0_1 = arith.constant 0 : index
    %c0_2 = arith.constant 0 : index
    %c0_3 = arith.constant 0 : index
    %1 = vector.load %arg2[%c0_1, %c0_2, %c0_3] : memref<1x640x640xi8, #tpu.memory_space<vmem>>, vector<1x640x640xi8>
    %2 = vector.shape_cast %1 : vector<1x640x640xi8> to vector<640x640xi8>
    %3 = arith.sitofp %2 : vector<640x640xi8> to vector<640x640xbf16>
    %cst = arith.constant dense<0.000000e+00> : vector<8x640xf32>
    %4 = tpu.matmul %0, %3, %cst {dimension_numbers = #tpu.dot_dimension_numbers<[1], [0], [0], [1], [0, 0, 1, 1], [], []>} : vector<8x640xbf16>, vector<640x640xbf16>, vector<8x640xf32> -> vector<8x640xf32>
    %c0_4 = arith.constant 0 : index
    %c0_5 = arith.constant 0 : index
    %5 = vector.load %arg3[%c0_4, %c0_5] : memref<1x640xf32, #tpu.memory_space<vmem>>, vector<1x640xf32>
    %6 = vector.broadcast %5 : vector<1x640xf32> to vector<8x640xf32>
    %7 = arith.mulf %4, %6 : vector<8x640xf32>
    %c0_6 = arith.constant 0 : index
    %c0_7 = arith.constant 0 : index
    %8 = vector.load %arg4[%c0_6, %c0_7] : memref<1x640xf32, #tpu.memory_space<vmem>>, vector<1x640xf32>
    %9 = vector.broadcast %8 : vector<1x640xf32> to vector<8x640xf32>
    %10 = arith.addf %7, %9 : vector<8x640xf32>
    %cst_8 = arith.constant dense<0.000000e+00> : vector<640xf32>
    %11 = vector.multi_reduction <add>, %10, %cst_8 [0] : vector<8x640xf32> to vector<640xf32>
    %12 = vector.shape_cast %11 : vector<640xf32> to vector<1x640xf32>
    %cst_9 = arith.constant 1.250000e-01 : f32
    %13 = vector.broadcast %cst_9 : f32 to vector<1x640xf32>
    %14 = arith.mulf %12, %13 : vector<1x640xf32>
    %15 = vector.broadcast %14 : vector<1x640xf32> to vector<8x640xf32>
    %16 = arith.subf %10, %15 : vector<8x640xf32>
    %17 = arith.mulf %16, %16 : vector<8x640xf32>
    %cst_10 = arith.constant dense<0.000000e+00> : vector<640xf32>
    %18 = vector.multi_reduction <add>, %17, %cst_10 [0] : vector<8x640xf32> to vector<640xf32>
    %19 = vector.shape_cast %18 : vector<640xf32> to vector<1x640xf32>
    %cst_11 = arith.constant 1.250000e-01 : f32
    %20 = vector.broadcast %cst_11 : f32 to vector<1x640xf32>
    %21 = arith.mulf %19, %20 : vector<1x640xf32>
    %cst_12 = arith.constant 9.99999974E-6 : f32
    %22 = vector.broadcast %cst_12 : f32 to vector<1x640xf32>
    %23 = arith.addf %21, %22 : vector<1x640xf32>
    %24 = math.rsqrt %23 : vector<1x640xf32>
    %25 = vector.broadcast %24 : vector<1x640xf32> to vector<8x640xf32>
    %26 = arith.mulf %16, %25 : vector<8x640xf32>
    %c0_13 = arith.constant 0 : index
    %c0_14 = arith.constant 0 : index
    %27 = vector.load %arg5[%c0_13, %c0_14] : memref<1x640xf32, #tpu.memory_space<vmem>>, vector<1x640xf32>
    %28 = vector.broadcast %27 : vector<1x640xf32> to vector<8x640xf32>
    %29 = arith.mulf %26, %28 : vector<8x640xf32>
    %c0_15 = arith.constant 0 : index
    %c0_16 = arith.constant 0 : index
    %30 = vector.load %arg6[%c0_15, %c0_16] : memref<1x640xf32, #tpu.memory_space<vmem>>, vector<1x640xf32>
    %31 = vector.broadcast %30 : vector<1x640xf32> to vector<8x640xf32>
    %32 = arith.addf %29, %31 : vector<8x640xf32>
    %cst_17 = arith.constant 0.000000e+00 : f32
    %33 = vector.broadcast %cst_17 : f32 to vector<8x640xf32>
    %34 = arith.maximumf %32, %33 : vector<8x640xf32>
    %35 = arith.truncf %34 : vector<8x640xf32> to vector<8x640xbf16>
    %c0_18 = arith.constant 0 : index
    %c0_19 = arith.constant 0 : index
    %36 = vector.load %arg7[%c0_18, %c0_19] : memref<8x640xbf16, #tpu.memory_space<vmem>>, vector<8x640xbf16>
    tpu.vector_store %arg7[%c0_18, %c0_19], %35 {strides = array<i32>} : memref<8x640xbf16, #tpu.memory_space<vmem>>, vector<8x640xbf16>,
    return
  }
  func.func @transform_0(%arg0: i32) -> (i32, i32) {
    %c0_i32 = arith.constant 0 : i32
    %c0_i32_0 = arith.constant 0 : i32
    %c0_i32_1 = arith.constant 0 : i32
    return %c0_i32, %c0_i32_0 : i32, i32
  }
  func.func @transform_1(%arg0: i32) -> (i32, i32, i32) {
    %c0_i32 = arith.constant 0 : i32
    %c0_i32_0 = arith.constant 0 : i32
    %c0_i32_1 = arith.constant 0 : i32
    return %arg0, %c0_i32, %c0_i32_0 : i32, i32, i32
  }
  func.func @transform_2(%arg0: i32) -> (i32, i32) {
    %c0_i32 = arith.constant 0 : i32
    %c0_i32_0 = arith.constant 0 : i32
    return %c0_i32, %arg0 : i32, i32
  }
  func.func @transform_3(%arg0: i32) -> (i32, i32) {
    %c0_i32 = arith.constant 0 : i32
    %c0_i32_0 = arith.constant 0 : i32
    return %c0_i32, %arg0 : i32, i32
  }
  func.func @transform_4(%arg0: i32) -> (i32, i32) {
    %c0_i32 = arith.constant 0 : i32
    %c0_i32_0 = arith.constant 0 : i32
    return %c0_i32, %arg0 : i32, i32
  }
  func.func @transform_5(%arg0: i32) -> (i32, i32) {
    %c0_i32 = arith.constant 0 : i32
    %c0_i32_0 = arith.constant 0 : i32
    return %c0_i32, %arg0 : i32, i32
  }
  func.func @transform_6(%arg0: i32) -> (i32, i32) {
    %c0_i32 = arith.constant 0 : i32
    %c0_i32_0 = arith.constant 0 : i32
    return %c0_i32, %arg0 : i32, i32
  }
}

module attributes {stable_mosaic.version = 11 : i64} {
  func.func @_linear_bn_relu_kernel(%arg0: i32, %arg1: memref<8x640xbf16, #tpu.memory_space<vmem>>, %arg2: memref<1x640x640xi8, #tpu.memory_space<vmem>>, %arg3: memref<1x640xf32, #tpu.memory_space<vmem>>, %arg4: memref<1x640xf32, #tpu.memory_space<vmem>>, %arg5: memref<1x640xf32, #tpu.memory_space<vmem>>, %arg6: memref<1x640xf32, #tpu.memory_space<vmem>>, %arg7: memref<8x640xbf16, #tpu.memory_space<vmem>>) attributes {dimension_semantics = [#tpu.dimension_semantics<parallel>], iteration_bounds = array<i64: 1>, scalar_prefetch = 0 : i64, scratch_operands = 0 : i64, tpu.core_type = #tpu.core_type<tc>, window_params = [{pipeline_mode = #tpu.pipeline_mode<synchronous>, transform_indices = @transform_0, window_bounds = array<i64: 8, 640>}, {transform_indices = @transform_1, window_bounds = array<i64: 1, 640, 640>}, {transform_indices = @transform_2, window_bounds = array<i64: 1, 640>}, {transform_indices = @transform_3, window_bounds = array<i64: 1, 640>}, {transform_indices = @transform_4, window_bounds = array<i64: 1, 640>}, {transform_indices = @transform_5, window_bounds = array<i64: 1, 640>}, {transform_indices = @transform_6, window_bounds = array<i64: 8, 640>}]} {
    %c0 = arith.constant 0 : index
    %c0_0 = arith.constant 0 : index
    %0 = vector.load %arg1[%c0, %c0_0] : memref<8x640xbf16, #tpu.memory_space<vmem>>, vector<8x640xbf16>
    %c0_1 = arith.constant 0 : index
    %c0_2 = arith.constant 0 : index
    %c0_3 = arith.constant 0 : index
    %1 = vector.load %arg2[%c0_1, %c0_2, %c0_3] : memref<1x640x640xi8, #tpu.memory_space<vmem>>, vector<1x640x640xi8>
    %2 = vector.shape_cast %1 : vector<1x640x640xi8> to vector<640x640xi8>
    %3 = arith.sitofp %2 : vector<640x640xi8> to vector<640x640xbf16>
    %cst = arith.constant dense<0.000000e+00> : vector<8x640xf32>
    %4 = tpu.matmul %0, %3, %cst {dimension_numbers = #tpu.dot_dimension_numbers<[1], [0], [0], [1], [0, 0, 1, 1], [], []>} : vector<8x640xbf16>, vector<640x640xbf16>, vector<8x640xf32> -> vector<8x640xf32>
    %c0_4 = arith.constant 0 : index
    %c0_5 = arith.constant 0 : index
    %5 = vector.load %arg3[%c0_4, %c0_5] : memref<1x640xf32, #tpu.memory_space<vmem>>, vector<1x640xf32>
    %6 = vector.broadcast %5 : vector<1x640xf32> to vector<8x640xf32>
    %7 = arith.mulf %4, %6 : vector<8x640xf32>
    %c0_6 = arith.constant 0 : index
    %c0_7 = arith.constant 0 : index
    %8 = vector.load %arg4[%c0_6, %c0_7] : memref<1x640xf32, #tpu.memory_space<vmem>>, vector<1x640xf32>
    %9 = vector.broadcast %8 : vector<1x640xf32> to vector<8x640xf32>
    %10 = arith.addf %7, %9 : vector<8x640xf32>
    %cst_8 = arith.constant dense<0.000000e+00> : vector<640xf32>
    %11 = vector.multi_reduction <add>, %10, %cst_8 [0] : vector<8x640xf32> to vector<640xf32>
    %12 = vector.shape_cast %11 : vector<640xf32> to vector<1x640xf32>
    %cst_9 = arith.constant 1.250000e-01 : f32
    %13 = vector.broadcast %cst_9 : f32 to vector<1x640xf32>
    %14 = arith.mulf %12, %13 : vector<1x640xf32>
    %15 = vector.broadcast %14 : vector<1x640xf32> to vector<8x640xf32>
    %16 = arith.subf %10, %15 : vector<8x640xf32>
    %17 = arith.mulf %16, %16 : vector<8x640xf32>
    %cst_10 = arith.constant dense<0.000000e+00> : vector<640xf32>
    %18 = vector.multi_reduction <add>, %17, %cst_10 [0] : vector<8x640xf32> to vector<640xf32>
    %19 = vector.shape_cast %18 : vector<640xf32> to vector<1x640xf32>
    %cst_11 = arith.constant 1.250000e-01 : f32
    %20 = vector.broadcast %cst_11 : f32 to vector<1x640xf32>
    %21 = arith.mulf %19, %20 : vector<1x640xf32>
    %cst_12 = arith.constant 9.99999974E-6 : f32
    %22 = vector.broadcast %cst_12 : f32 to vector<1x640xf32>
    %23 = arith.addf %21, %22 : vector<1x640xf32>
    %24 = math.rsqrt %23 : vector<1x640xf32>
    %25 = vector.broadcast %24 : vector<1x640xf32> to vector<8x640xf32>
    %26 = arith.mulf %16, %25 : vector<8x640xf32>
    %c0_13 = arith.constant 0 : index
    %c0_14 = arith.constant 0 : index
    %27 = vector.load %arg5[%c0_13, %c0_14] : memref<1x640xf32, #tpu.memory_space<vmem>>, vector<1x640xf32>
    %28 = vector.broadcast %27 : vector<1x640xf32> to vector<8x640xf32>
    %29 = arith.mulf %26, %28 : vector<8x640xf32>
    %c0_15 = arith.constant 0 : index
    %c0_16 = arith.constant 0 : index
    %30 = vector.load %arg6[%c0_15, %c0_16] : memref<1x640xf32, #tpu.memory_space<vmem>>, vector<1x640xf32>
    %31 = vector.broadcast %30 : vector<1x640xf32> to vector<8x640xf32>
    %32 = arith.addf %29, %31 : vector<8x640xf32>
    %cst_17 = arith.constant 0.000000e+00 : f32
    %33 = vector.broadcast %cst_17 : f32 to vector<8x640xf32>
    %34 = arith.maximumf %32, %33 : vector<8x640xf32>
    %35 = arith.truncf %34 : vector<8x640xf32> to vector<8x640xbf16>
    %c0_18 = arith.constant 0 : index
    %c0_19 = arith.constant 0 : index
    %36 = vector.load %arg7[%c0_18, %c0_19] : memref<8x640xbf16, #tpu.memory_space<vmem>>, vector<8x640xbf16>
    tpu.vector_store %arg7[%c0_18, %c0_19], %35 {strides = array<i32>} : memref<8x640xbf16, #tpu.memory_space<vmem>>, vector<8x640xbf16>,
    return
  }
  func.func @transform_0(%arg0: i32) -> (i32, i32) {
    %c0_i32 = arith.constant 0 : i32
    %c0_i32_0 = arith.constant 0 : i32
    %c0_i32_1 = arith.constant 0 : i32
    return %c0_i32, %c0_i32_0 : i32, i32
  }
  func.func @transform_1(%arg0: i32) -> (i32, i32, i32) {
    %c0_i32 = arith.constant 0 : i32
    %c0_i32_0 = arith.constant 0 : i32
    %c0_i32_1 = arith.constant 0 : i32
    return %arg0, %c0_i32, %c0_i32_0 : i32, i32, i32
  }
  func.func @transform_2(%arg0: i32) -> (i32, i32) {
    %c0_i32 = arith.constant 0 : i32
    %c0_i32_0 = arith.constant 0 : i32
    return %c0_i32, %arg0 : i32, i32
  }
  func.func @transform_3(%arg0: i32) -> (i32, i32) {
    %c0_i32 = arith.constant 0 : i32
    %c0_i32_0 = arith.constant 0 : i32
    return %c0_i32, %arg0 : i32, i32
  }
  func.func @transform_4(%arg0: i32) -> (i32, i32) {
    %c0_i32 = arith.constant 0 : i32
    %c0_i32_0 = arith.constant 0 : i32
    return %c0_i32, %arg0 : i32, i32
  }
  func.func @transform_5(%arg0: i32) -> (i32, i32) {
    %c0_i32 = arith.constant 0 : i32
    %c0_i32_0 = arith.constant 0 : i32
    return %c0_i32, %arg0 : i32, i32
  }
  func.func @transform_6(%arg0: i32) -> (i32, i32) {
    %c0_i32 = arith.constant 0 : i32
    %c0_i32_0 = arith.constant 0 : i32
    return %c0_i32, %arg0 : i32, i32
  }
}

module attributes {stable_mosaic.version = 11 : i64} {
  func.func @_linear_bn_relu_kernel(%arg0: i32, %arg1: memref<8x128xbf16, #tpu.memory_space<vmem>>, %arg2: memref<1x128x640xi8, #tpu.memory_space<vmem>>, %arg3: memref<1x640xf32, #tpu.memory_space<vmem>>, %arg4: memref<1x640xf32, #tpu.memory_space<vmem>>, %arg5: memref<1x640xf32, #tpu.memory_space<vmem>>, %arg6: memref<1x640xf32, #tpu.memory_space<vmem>>, %arg7: memref<8x640xbf16, #tpu.memory_space<vmem>>) attributes {dimension_semantics = [#tpu.dimension_semantics<parallel>], iteration_bounds = array<i64: 1>, scalar_prefetch = 0 : i64, scratch_operands = 0 : i64, tpu.core_type = #tpu.core_type<tc>, window_params = [{pipeline_mode = #tpu.pipeline_mode<synchronous>, transform_indices = @transform_0, window_bounds = array<i64: 8, 128>}, {transform_indices = @transform_1, window_bounds = array<i64: 1, 128, 640>}, {transform_indices = @transform_2, window_bounds = array<i64: 1, 640>}, {transform_indices = @transform_3, window_bounds = array<i64: 1, 640>}, {transform_indices = @transform_4, window_bounds = array<i64: 1, 640>}, {transform_indices = @transform_5, window_bounds = array<i64: 1, 640>}, {transform_indices = @transform_6, window_bounds = array<i64: 8, 640>}]} {
    %c0 = arith.constant 0 : index
    %c0_0 = arith.constant 0 : index
    %0 = vector.load %arg1[%c0, %c0_0] : memref<8x128xbf16, #tpu.memory_space<vmem>>, vector<8x128xbf16>
    %c0_1 = arith.constant 0 : index
    %c0_2 = arith.constant 0 : index
    %c0_3 = arith.constant 0 : index
    %1 = vector.load %arg2[%c0_1, %c0_2, %c0_3] : memref<1x128x640xi8, #tpu.memory_space<vmem>>, vector<1x128x640xi8>
    %2 = vector.shape_cast %1 : vector<1x128x640xi8> to vector<128x640xi8>
    %3 = arith.sitofp %2 : vector<128x640xi8> to vector<128x640xbf16>
    %cst = arith.constant dense<0.000000e+00> : vector<8x640xf32>
    %4 = tpu.matmul %0, %3, %cst {dimension_numbers = #tpu.dot_dimension_numbers<[1], [0], [0], [1], [0, 0, 1, 1], [], []>} : vector<8x128xbf16>, vector<128x640xbf16>, vector<8x640xf32> -> vector<8x640xf32>
    %c0_4 = arith.constant 0 : index
    %c0_5 = arith.constant 0 : index
    %5 = vector.load %arg3[%c0_4, %c0_5] : memref<1x640xf32, #tpu.memory_space<vmem>>, vector<1x640xf32>
    %6 = vector.broadcast %5 : vector<1x640xf32> to vector<8x640xf32>
    %7 = arith.mulf %4, %6 : vector<8x640xf32>
    %c0_6 = arith.constant 0 : index
    %c0_7 = arith.constant 0 : index
    %8 = vector.load %arg4[%c0_6, %c0_7] : memref<1x640xf32, #tpu.memory_space<vmem>>, vector<1x640xf32>
    %9 = vector.broadcast %8 : vector<1x640xf32> to vector<8x640xf32>
    %10 = arith.addf %7, %9 : vector<8x640xf32>
    %cst_8 = arith.constant dense<0.000000e+00> : vector<640xf32>
    %11 = vector.multi_reduction <add>, %10, %cst_8 [0] : vector<8x640xf32> to vector<640xf32>
    %12 = vector.shape_cast %11 : vector<640xf32> to vector<1x640xf32>
    %cst_9 = arith.constant 1.250000e-01 : f32
    %13 = vector.broadcast %cst_9 : f32 to vector<1x640xf32>
    %14 = arith.mulf %12, %13 : vector<1x640xf32>
    %15 = vector.broadcast %14 : vector<1x640xf32> to vector<8x640xf32>
    %16 = arith.subf %10, %15 : vector<8x640xf32>
    %17 = arith.mulf %16, %16 : vector<8x640xf32>
    %cst_10 = arith.constant dense<0.000000e+00> : vector<640xf32>
    %18 = vector.multi_reduction <add>, %17, %cst_10 [0] : vector<8x640xf32> to vector<640xf32>
    %19 = vector.shape_cast %18 : vector<640xf32> to vector<1x640xf32>
    %cst_11 = arith.constant 1.250000e-01 : f32
    %20 = vector.broadcast %cst_11 : f32 to vector<1x640xf32>
    %21 = arith.mulf %19, %20 : vector<1x640xf32>
    %cst_12 = arith.constant 9.99999974E-6 : f32
    %22 = vector.broadcast %cst_12 : f32 to vector<1x640xf32>
    %23 = arith.addf %21, %22 : vector<1x640xf32>
    %24 = math.rsqrt %23 : vector<1x640xf32>
    %25 = vector.broadcast %24 : vector<1x640xf32> to vector<8x640xf32>
    %26 = arith.mulf %16, %25 : vector<8x640xf32>
    %c0_13 = arith.constant 0 : index
    %c0_14 = arith.constant 0 : index
    %27 = vector.load %arg5[%c0_13, %c0_14] : memref<1x640xf32, #tpu.memory_space<vmem>>, vector<1x640xf32>
    %28 = vector.broadcast %27 : vector<1x640xf32> to vector<8x640xf32>
    %29 = arith.mulf %26, %28 : vector<8x640xf32>
    %c0_15 = arith.constant 0 : index
    %c0_16 = arith.constant 0 : index
    %30 = vector.load %arg6[%c0_15, %c0_16] : memref<1x640xf32, #tpu.memory_space<vmem>>, vector<1x640xf32>
    %31 = vector.broadcast %30 : vector<1x640xf32> to vector<8x640xf32>
    %32 = arith.addf %29, %31 : vector<8x640xf32>
    %cst_17 = arith.constant 0.000000e+00 : f32
    %33 = vector.broadcast %cst_17 : f32 to vector<8x640xf32>
    %34 = arith.maximumf %32, %33 : vector<8x640xf32>
    %35 = arith.truncf %34 : vector<8x640xf32> to vector<8x640xbf16>
    %c0_18 = arith.constant 0 : index
    %c0_19 = arith.constant 0 : index
    %36 = vector.load %arg7[%c0_18, %c0_19] : memref<8x640xbf16, #tpu.memory_space<vmem>>, vector<8x640xbf16>
    tpu.vector_store %arg7[%c0_18, %c0_19], %35 {strides = array<i32>} : memref<8x640xbf16, #tpu.memory_space<vmem>>, vector<8x640xbf16>,
    return
  }
  func.func @transform_0(%arg0: i32) -> (i32, i32) {
    %c0_i32 = arith.constant 0 : i32
    %c0_i32_0 = arith.constant 0 : i32
    %c0_i32_1 = arith.constant 0 : i32
    return %c0_i32, %c0_i32_0 : i32, i32
  }
  func.func @transform_1(%arg0: i32) -> (i32, i32, i32) {
    %c0_i32 = arith.constant 0 : i32
    %c0_i32_0 = arith.constant 0 : i32
    %c0_i32_1 = arith.constant 0 : i32
    return %arg0, %c0_i32, %c0_i32_0 : i32, i32, i32
  }
  func.func @transform_2(%arg0: i32) -> (i32, i32) {
    %c0_i32 = arith.constant 0 : i32
    %c0_i32_0 = arith.constant 0 : i32
    return %c0_i32, %arg0 : i32, i32
  }
  func.func @transform_3(%arg0: i32) -> (i32, i32) {
    %c0_i32 = arith.constant 0 : i32
    %c0_i32_0 = arith.constant 0 : i32
    return %c0_i32, %arg0 : i32, i32
  }
  func.func @transform_4(%arg0: i32) -> (i32, i32) {
    %c0_i32 = arith.constant 0 : i32
    %c0_i32_0 = arith.constant 0 : i32
    return %c0_i32, %arg0 : i32, i32
  }
  func.func @transform_5(%arg0: i32) -> (i32, i32) {
    %c0_i32 = arith.constant 0 : i32
    %c0_i32_0 = arith.constant 0 : i32
    return %c0_i32, %arg0 : i32, i32
  }
  func.func @transform_6(%arg0: i32) -> (i32, i32) {
    %c0_i32 = arith.constant 0 : i32
    %c0_i32_0 = arith.constant 0 : i32
    return %c0_i32, %arg0 : i32, i32
  }
}

module attributes {stable_mosaic.version = 11 : i64} {
  func.func @_final_kernel(%arg0: memref<8x640xbf16, #tpu.memory_space<vmem>>, %arg1: memref<640x128xi8, #tpu.memory_space<vmem>>, %arg2: memref<1x128xf32, #tpu.memory_space<vmem>>, %arg3: memref<1x128xf32, #tpu.memory_space<vmem>>, %arg4: memref<128x128xbf16, #tpu.memory_space<vmem>>, %arg5: memref<8x128xf32, #tpu.memory_space<vmem>>, %arg6: memref<8x128xf32, #tpu.memory_space<vmem>>) attributes {dimension_semantics = [], scalar_prefetch = 0 : i64, scratch_operands = 0 : i64, tpu.core_type = #tpu.core_type<tc>} {
    %c0 = arith.constant 0 : index
    %c0_0 = arith.constant 0 : index
    %0 = vector.load %arg0[%c0, %c0_0] : memref<8x640xbf16, #tpu.memory_space<vmem>>, vector<8x640xbf16>
    %c0_1 = arith.constant 0 : index
    %c0_2 = arith.constant 0 : index
    %1 = vector.load %arg1[%c0_1, %c0_2] : memref<640x128xi8, #tpu.memory_space<vmem>>, vector<640x128xi8>
    %2 = arith.sitofp %1 : vector<640x128xi8> to vector<640x128xbf16>
    %cst = arith.constant dense<0.000000e+00> : vector<8x128xf32>
    %3 = tpu.matmul %0, %2, %cst {dimension_numbers = #tpu.dot_dimension_numbers<[1], [0], [0], [1], [0, 0, 1, 1], [], []>} : vector<8x640xbf16>, vector<640x128xbf16>, vector<8x128xf32> -> vector<8x128xf32>
    %c0_3 = arith.constant 0 : index
    %c0_4 = arith.constant 0 : index
    %4 = vector.load %arg2[%c0_3, %c0_4] : memref<1x128xf32, #tpu.memory_space<vmem>>, vector<1x128xf32>
    %5 = vector.broadcast %4 : vector<1x128xf32> to vector<8x128xf32>
    %6 = arith.mulf %3, %5 : vector<8x128xf32>
    %c0_5 = arith.constant 0 : index
    %c0_6 = arith.constant 0 : index
    %7 = vector.load %arg3[%c0_5, %c0_6] : memref<1x128xf32, #tpu.memory_space<vmem>>, vector<1x128xf32>
    %8 = vector.broadcast %7 : vector<1x128xf32> to vector<8x128xf32>
    %9 = arith.addf %6, %8 : vector<8x128xf32>
    %10 = arith.mulf %9, %9 : vector<8x128xf32>
    %cst_7 = arith.constant dense<0.000000e+00> : vector<8xf32>
    %11 = vector.multi_reduction <add>, %10, %cst_7 [1] : vector<8x128xf32> to vector<8xf32>
    %12 = vector.shape_cast %11 : vector<8xf32> to vector<8x1xf32>
    %cst_8 = arith.constant 1.000000e-24 : f32
    %13 = vector.broadcast %cst_8 : f32 to vector<8x1xf32>
    %14 = arith.maximumf %12, %13 : vector<8x1xf32>
    %15 = math.rsqrt %14 : vector<8x1xf32>
    %16 = vector.broadcast %15 : vector<8x1xf32> to vector<8x128xf32>
    %17 = arith.mulf %9, %16 : vector<8x128xf32>
    %c0_9 = arith.constant 0 : index
    %c0_10 = arith.constant 0 : index
    %18 = vector.load %arg5[%c0_9, %c0_10] : memref<8x128xf32, #tpu.memory_space<vmem>>, vector<8x128xf32>
    tpu.vector_store %arg5[%c0_9, %c0_10], %17 {strides = array<i32>} : memref<8x128xf32, #tpu.memory_space<vmem>>, vector<8x128xf32>,
    %19 = arith.truncf %17 : vector<8x128xf32> to vector<8x128xbf16>
    %c0_11 = arith.constant 0 : index
    %c0_12 = arith.constant 0 : index
    %20 = vector.load %arg4[%c0_11, %c0_12] : memref<128x128xbf16, #tpu.memory_space<vmem>>, vector<128x128xbf16>
    %cst_13 = arith.constant dense<0.000000e+00> : vector<8x128xf32>
    %21 = tpu.matmul %19, %20, %cst_13 {dimension_numbers = #tpu.dot_dimension_numbers<[1], [0], [0], [1], [0, 0, 1, 1], [], []>} : vector<8x128xbf16>, vector<128x128xbf16>, vector<8x128xf32> -> vector<8x128xf32>
    %c0_14 = arith.constant 0 : index
    %c0_15 = arith.constant 0 : index
    %22 = vector.load %arg6[%c0_14, %c0_15] : memref<8x128xf32, #tpu.memory_space<vmem>>, vector<8x128xf32>
    tpu.vector_store %arg6[%c0_14, %c0_15], %21 {strides = array<i32>} : memref<8x128xf32, #tpu.memory_space<vmem>>, vector<8x128xf32>,
    return
  }
}

</mosaic_0001>

<bundles_post_ra>
// kernel: multi_proxy_forward.4
= control target key start
LH: loop header
LB: loop body
LE: loop exit
PB: predicated region body
PF: predicated region fallthrough
CT: control target
= control target key end

     0   :  { %11 = vsyncpa [#allocation3], 0  ;;  %s551_s21 = smov [#allocation2]   ;;  %s690_s0 = inlined_call_operand.vmem [shape: bf16[8,128], index: 0, kind: input, shape index: {}]   ;;  %s691_s1 = inlined_call_operand.hbm [shape: s8[1,128,640], index: 1, kind: input, shape index: {}]   ;;  %s692_s2 = inlined_call_operand.vmem [shape: f32[1,640], index: 2, kind: input, shape index: {}]   ;;  %s693_s3 = inlined_call_operand.vmem [shape: f32[1,640], index: 3, kind: input, shape index: {}]   ;;  %s694_s4 = inlined_call_operand.vmem [shape: f32[1,640], index: 4, kind: input, shape index: {}]   ;;  %s695_s5 = inlined_call_operand.vmem [shape: f32[1,640], index: 5, kind: input, shape index: {}]   ;;  %s696_s6 = inlined_call_operand.vmem [shape: bf16[8,640], index: 6, kind: output, shape index: {}]  }
   0x1   :  { %s19_s22 = sshll.u32 %s551_s21, 4  ;;  %s20_s22 = int_to_ptr.vmem [resolvable:$true] %s19_s22 }
   0x2   :  { %s537_s23 = scalar_lea.vmem %s20_s22, 2560  ;;  %p542_p1 = scmp.lt.s32.totalorder %s20_s22, %s20_s22 }
   0x3   :  { %p538_p0 = scmp.ne.s32.totalorder %s20_s22, %s537_s23  ;;  %p543_p2 = scmp.lt.s32.totalorder %s537_s23, %s537_s23 }
   0x5   :  { %p544_p3 = por %p543_p2, %p542_p1 }
   0x7   :  { %p545_p4 = pnand %p544_p3, %p538_p0 }
   0x9   :  { %548 = shalt.err (!%p545_p4)
}
   0xa   :  { %s552_s24 = smov 640   ;;  %s553_s25 = smov 40  }
   0xb   :  { %25 = dma.hbm_to_vmem [thread:$0]  %s691_s1, 2560, %s20_s22, [#allocation3], %s552_s24, %s552_s24, %s553_s25  }
   0xc   :  { %549 = dma.done.wait [#allocation3], 2560  }
   0xd   :  { %550 = vsyncadd [#allocation3], 4294964736  ;;  %v554_v0 = vmov 0   ;;  %v55_v1 = vld [vmem:[#allocation2 + $0x80] sm:$0xff]  ;;  %v57_v2 = vld [vmem:[#allocation2 + $0x90] sm:$0xff]  ;;  %v555_v52 = vmov 0.0   ;;  %v223_v63 = vlaneseq }
   0xe   :  { %131 = vmatprep.mubr.bf16.mxu0 %v554_v0  ;;  %172 = vmatprep.mubr.bf16.mxu1 %v554_v0  ;;  %v54_v3 = vld [vmem:[#allocation2 + $0x78] sm:$0xff]  ;;  %v90_v4 = vunpack.c.l.s8.bf16 %v55_v1  ;;  %v95_v5 = vunpack.c.h.s8.bf16 %v55_v1  ;;  %v92_v6 = vunpack.c.l.s8.bf16 %v57_v2  ;;  %v97_v7 = vunpack.c.h.s8.bf16 %v57_v2  ;;  %v56_v8 = vld [vmem:[#allocation2 + $0x88] sm:$0xff]  ;;  %v49_v17 = vld [vmem:[#allocation2 + $0x50] sm:$0xff] }
   0xf   :  { %v94_v9 = vunpack.c.h.s8.bf16 %v54_v3  ;;  %v96_v10 = vunpack.c.h.s8.bf16 %v56_v8  ;;  %v50_v11 = vld [vmem:[#allocation2 + $0x58] sm:$0xff]  ;;  %v52_v12 = vld [vmem:[#allocation2 + $0x68] sm:$0xff]  ;;  %v89_v13 = vunpack.c.l.s8.bf16 %v54_v3  ;;  %v91_v14 = vunpack.c.l.s8.bf16 %v56_v8  ;;  %v51_v18 = vld [vmem:[#allocation2 + $0x60] sm:$0xff] }
  0x10   :  { %99 = vmatprep.subr.bf16.mxu0 %v95_v5  ;;  %140 = vmatprep.subr.bf16.mxu1 %v97_v7  ;;  %v85_v15 = vunpack.c.h.s8.bf16 %v50_v11  ;;  %v87_v16 = vunpack.c.h.s8.bf16 %v52_v12  ;;  %v84_v19 = vunpack.c.h.s8.bf16 %v49_v17  ;;  %v86_v20 = vunpack.c.h.s8.bf16 %v51_v18  ;;  %v45_v23 = vld [vmem:[#allocation2 + $0x30] sm:$0xff]  ;;  %v47_v24 = vld [vmem:[#allocation2 + $0x40] sm:$0xff]  ;;  %v44_v29 = vld [vmem:[#allocation2 + $0x28] sm:$0xff] }
  0x11   :  { %100 = vmatpush1.bf16.msra.mxu0 %v94_v9  ;;  %141 = vmatpush1.bf16.msra.mxu1 %v96_v10  ;;  %v80_v21 = vunpack.c.l.s8.bf16 %v50_v11  ;;  %v82_v22 = vunpack.c.l.s8.bf16 %v52_v12  ;;  %v79_v25 = vunpack.c.l.s8.bf16 %v49_v17  ;;  %v81_v26 = vunpack.c.l.s8.bf16 %v51_v18  ;;  %v46_v30 = vld [vmem:[#allocation2 + $0x38] sm:$0xff]  ;;  %v40_v35 = vld [vmem:[#allocation2 + $0x8] sm:$0xff]  ;;  %v39_v41 = vld [vmem:[#allocation2] sm:$0xff] }
  0x12   :  { %101 = vmatprep.subr.bf16.mxu0 %v90_v4  ;;  %142 = vmatprep.subr.bf16.mxu1 %v92_v6  ;;  %v75_v27 = vunpack.c.h.s8.bf16 %v45_v23  ;;  %v77_v28 = vunpack.c.h.s8.bf16 %v47_v24  ;;  %v74_v31 = vunpack.c.h.s8.bf16 %v44_v29  ;;  %v76_v32 = vunpack.c.h.s8.bf16 %v46_v30  ;;  %v42_v36 = vld [vmem:[#allocation2 + $0x18] sm:$0xff]  ;;  %v41_v42 = vld [vmem:[#allocation2 + $0x10] sm:$0xff]  ;;  %v38_v50 = vld [vmem:[%s690_s0] sm:$0xf] }
  0x13   :  { %v70_v33 = vunpack.c.l.s8.bf16 %v45_v23  ;;  %v72_v34 = vunpack.c.l.s8.bf16 %v47_v24  ;;  %v69_v37 = vunpack.c.l.s8.bf16 %v44_v29  ;;  %v71_v38 = vunpack.c.l.s8.bf16 %v46_v30  ;;  %v58_v49 = vld [vmem:[#allocation2 + $0x98] sm:$0xff]  ;;  %v53_v54 = vld [vmem:[#allocation2 + $0x70] sm:$0xff]  ;;  %v48_v57 = vld [vmem:[#allocation2 + $0x48] sm:$0xff] }
  0x14   :  { %v65_v39 = vunpack.c.h.s8.bf16 %v40_v35  ;;  %v67_v40 = vunpack.c.h.s8.bf16 %v42_v36  ;;  %v64_v43 = vunpack.c.h.s8.bf16 %v39_v41  ;;  %v66_v44 = vunpack.c.h.s8.bf16 %v41_v42  ;;  %v43_v60 = vld [vmem:[#allocation2 + $0x20] sm:$0xff] }
  0x15   :  { %102 = vmatpush1.bf16.msra.mxu0 %v89_v13  ;;  %143 = vmatpush1.bf16.msra.mxu1 %v91_v14  ;;  %v60_v45 = vunpack.c.l.s8.bf16 %v40_v35  ;;  %v62_v46 = vunpack.c.l.s8.bf16 %v42_v36  ;;  %v59_v47 = vunpack.c.l.s8.bf16 %v39_v41  ;;  %v61_v48 = vunpack.c.l.s8.bf16 %v41_v42  ;;  %v609_v3 = vld [vmem:[%s692_s2] sm:$0x1f] }
  0x16   :  { %103 = vmatprep.subr.bf16.mxu0 %v85_v15  ;;  %144 = vmatprep.subr.bf16.mxu1 %v87_v16  ;;  %v98_v51 = vunpack.c.h.s8.bf16 %v58_v49  ;;  %v93_v53 = vunpack.c.l.s8.bf16 %v58_v49  ;;  %vm556_vm0 = vmmov 0   ;;  %v88_v55 = vunpack.c.h.s8.bf16 %v53_v54  ;;  %v620_v6 = vld [vmem:[%s693_s3] sm:$0x1f] }
  0x17   :  { %v83_v56 = vunpack.c.l.s8.bf16 %v53_v54  ;;  %v78_v58 = vunpack.c.h.s8.bf16 %v48_v57  ;;  %v73_v59 = vunpack.c.l.s8.bf16 %v48_v57  ;;  %v68_v61 = vunpack.c.h.s8.bf16 %v43_v60 }
  0x18   :  { %v63_v62 = vunpack.c.l.s8.bf16 %v43_v60  ;;  %v598_v0 = vshrl.u32 %v223_v63, 7 }
  0x19   :  { %104 = vmatpush1.bf16.msra.mxu0 %v84_v19  ;;  %145 = vmatpush1.bf16.msra.mxu1 %v86_v20 }
  0x1a   :  { %105 = vmatprep.subr.bf16.mxu0 %v80_v21  ;;  %146 = vmatprep.subr.bf16.mxu1 %v82_v22  ;;  %v601_v1 = vsub.s32 0, %v598_v0  ;;  %v604_v2 = vsub.s32 2, %v598_v0  ;;  %v612_v4 = vsub.s32 1, %v598_v0  ;;  %v615_v5 = vsub.s32 3, %v598_v0 }
  0x1c   :  { %v226_v7 = vrot.slane %v609_v3, %v601_v1  ;;  %v234_v8 = vrot.slane %v609_v3, %v604_v2  ;;  %v258_v9 = vrot.slane %v620_v6, %v601_v1  ;;  %v266_v10 = vrot.slane %v620_v6, %v604_v2 }
  0x1d   :  { %106 = vmatpush1.bf16.msra.mxu0 %v79_v25  ;;  %147 = vmatpush1.bf16.msra.mxu1 %v81_v26  ;;  %v230_v11 = vrot.slane %v609_v3, %v612_v4  ;;  %v238_v12 = vrot.slane %v609_v3, %v615_v5  ;;  %v262_v17 = vrot.slane %v620_v6, %v612_v4 }
  0x1e   :  { %107 = vmatprep.subr.bf16.mxu0 %v75_v27  ;;  %148 = vmatprep.subr.bf16.mxu1 %v77_v28  ;;  %v270_v18 = vrot.slane %v620_v6, %v615_v5 }
  0x21   :  { %108 = vmatpush1.bf16.msra.mxu0 %v74_v31  ;;  %149 = vmatpush1.bf16.msra.mxu1 %v76_v32 }
  0x22   :  { %109 = vmatprep.subr.bf16.mxu0 %v70_v33  ;;  %150 = vmatprep.subr.bf16.mxu1 %v72_v34 }
  0x25   :  { %110 = vmatpush1.bf16.msra.mxu0 %v69_v37  ;;  %151 = vmatpush1.bf16.msra.mxu1 %v71_v38 }
  0x26   :  { %111 = vmatprep.subr.bf16.mxu0 %v65_v39  ;;  %152 = vmatprep.subr.bf16.mxu1 %v67_v40 }
  0x29   :  { %112 = vmatpush1.bf16.msra.mxu0 %v64_v43  ;;  %153 = vmatpush1.bf16.msra.mxu1 %v66_v44 }
  0x2a   :  { %113 = vmatprep.subr.bf16.mxu0 %v60_v45  ;;  %154 = vmatprep.subr.bf16.mxu1 %v62_v46 }
  0x2d   :  { %114 = vmatpush1.bf16.msra.mxu0 %v59_v47  ;;  %155 = vmatpush1.bf16.msra.mxu1 %v61_v48 }
  0x2e   :  { %493 = vmatprep.subr.bf16.mxu0 %v555_v52 }
  0x30   :  { %132 = vmatmul.mubr.bf16.vlgmr.msra.gmra.mxu0 %v38_v50  ;;  %173 = vmatmul.mubr.bf16.vlgmr.msra.gmra.mxu1 %v38_v50 }
  0x31   :  { %494 = vmatpush3.bf16.msra.mxu0 %v98_v51  ;;  %509 = vmatprep.mubr.msk.bf16.mxu0 %vm556_vm0, %v555_v52 }
  0x32   :  { %495 = vmatprep.subr.bf16.mxu0 %v555_v52 }
  0x35   :  { %496 = vmatpush3.bf16.msra.mxu0 %v93_v53 }
  0x36   :  { %497 = vmatprep.subr.bf16.mxu0 %v555_v52 }
  0x39   :  { %498 = vmatpush3.bf16.msra.mxu0 %v88_v55 }
  0x3a   :  { %499 = vmatprep.subr.bf16.mxu0 %v555_v52 }
  0x3d   :  { %500 = vmatpush3.bf16.msra.mxu0 %v83_v56 }
  0x3e   :  { %501 = vmatprep.subr.bf16.mxu0 %v555_v52 }
  0x41   :  { %502 = vmatpush3.bf16.msra.mxu0 %v78_v58 }
  0x42   :  { %503 = vmatprep.subr.bf16.mxu0 %v555_v52 }
  0x45   :  { %504 = vmatpush3.bf16.msra.mxu0 %v73_v59 }
  0x46   :  { %505 = vmatprep.subr.bf16.mxu0 %v555_v52 }
  0x49   :  { %506 = vmatpush3.bf16.msra.mxu0 %v68_v61 }
  0x4a   :  { %507 = vmatprep.subr.bf16.mxu0 %v555_v52 }
  0x4d   :  { %508 = vmatpush3.bf16.msra.mxu0 %v63_v62 }
  0x50   :  { %510 = vmatmul.mubr.bf16.vlgmr.msra.gmra.mxu0 %v38_v50 }
  0xf0   :  { %v133_v13 = vpop.f32.mrf.mxu0  ;;  %v174_v14 = vpop.f32.mrf.mxu1 }
  0xf1   :  { %v248_v15 = vmul.f32 %v226_v7, %v133_v13  ;;  %v250_v16 = vmul.f32 %v234_v8, %v174_v14 }
  0xf2   :  { %v135_v19 = vpop.f32.mrf.mxu0  ;;  %v176_v20 = vpop.f32.mrf.mxu1 }
  0xf3   :  { %v280_v21 = vadd.f32 %v258_v9, %v248_v15  ;;  %v282_v22 = vadd.f32 %v266_v10, %v250_v16  ;;  %v249_v23 = vmul.f32 %v230_v11, %v135_v19  ;;  %v251_v24 = vmul.f32 %v238_v12, %v176_v20 }
  0xf4   :  { %v137_v25 = vpop.f32.mrf.mxu0  ;;  %v178_v26 = vpop.f32.mrf.mxu1  ;;  %v655_v16 = vsub.s32 4, %v598_v0 }
  0xf5   :  { %v285_v27 = vrot.slane %v280_v21, 4  ;;  %v297_v28 = vrot.slane %v282_v22, 4  ;;  %v281_v29 = vadd.f32 %v262_v17, %v249_v23  ;;  %v283_v30 = vadd.f32 %v270_v18, %v251_v24 }
  0xf6   :  { %v138_v31 = vpop.f32.mrf.mxu0  ;;  %v179_v32 = vpop.f32.mrf.mxu1  ;;  %v242_v25 = vrot.slane %v609_v3, %v655_v16  ;;  %v274_v0 = vrot.slane %v620_v6, %v655_v16 }
  0xf7   :  { %v286_v33 = vadd.f32 %v285_v27, %v280_v21  ;;  %v298_v34 = vadd.f32 %v297_v28, %v282_v22  ;;  %v291_v35 = vrot.slane %v281_v29, 4  ;;  %v303_v36 = vrot.slane %v283_v30, 4 }
  0xf9   :  { %v287_v37 = vrot.slane %v286_v33, 2  ;;  %v299_v38 = vrot.slane %v298_v34, 2  ;;  %v292_v39 = vadd.f32 %v291_v35, %v281_v29  ;;  %v304_v40 = vadd.f32 %v303_v36, %v283_v30 }
  0xfb   :  { %v288_v41 = vadd.f32 %v287_v37, %v286_v33  ;;  %v300_v42 = vadd.f32 %v299_v38, %v298_v34  ;;  %v293_v43 = vrot.slane %v292_v39, 2  ;;  %v305_v44 = vrot.slane %v304_v40, 2 }
  0xfd   :  { %v289_v45 = vrot.slane %v288_v41, 1  ;;  %v301_v46 = vrot.slane %v300_v42, 1  ;;  %v294_v47 = vadd.f32 %v293_v43, %v292_v39  ;;  %v306_v48 = vadd.f32 %v305_v44, %v304_v40 }
  0xff   :  { %v290_v49 = vadd.f32 %v289_v45, %v288_v41  ;;  %v302_v50 = vadd.f32 %v301_v46, %v300_v42  ;;  %v295_v51 = vrot.slane %v294_v47, 1  ;;  %v307_v52 = vrot.slane %v306_v48, 1 }
 0x101   :  { %v315_v53 = vmul.f32 0.125, %v290_v49  ;;  %v317_v54 = vmul.f32 0.125, %v302_v50  ;;  %v296_v55 = vadd.f32 %v295_v51, %v294_v47  ;;  %v308_v56 = vadd.f32 %v307_v52, %v306_v48 }
 0x103   :  { %v638_v57 = vsub.f32 %v280_v21, %v315_v53  ;;  %v640_v58 = vsub.f32 %v282_v22, %v317_v54  ;;  %v316_v59 = vmul.f32 0.125, %v296_v55  ;;  %v318_v60 = vmul.f32 0.125, %v308_v56  ;;  %v380_v53 = vld [vmem:[%s694_s4] sm:$0x1f] }
 0x104   :  { %v412_v55 = vld [vmem:[%s695_s5] sm:$0x1f] }
 0x105   :  { %v325_v61 = vmul.f32 %v638_v57, %v638_v57  ;;  %v327_v62 = vmul.f32 %v640_v58, %v640_v58  ;;  %v646_v63 = vsub.f32 %v281_v29, %v316_v59  ;;  %v648_v7 = vsub.f32 %v283_v30, %v318_v60 }
 0x106   :  { %v385_v59 = vrot.slane %v380_v53, %v601_v1 }
 0x107   :  { %v330_v8 = vrot.slane %v325_v61, 4  ;;  %v342_v9 = vrot.slane %v327_v62, 4  ;;  %v326_v10 = vmul.f32 %v646_v63, %v646_v63  ;;  %v328_v11 = vmul.f32 %v648_v7, %v648_v7 }
 0x109   :  { %v331_v12 = vadd.f32 %v330_v8, %v325_v61  ;;  %v343_v13 = vadd.f32 %v342_v9, %v327_v62  ;;  %v336_v14 = vrot.slane %v326_v10, 4  ;;  %v348_v15 = vrot.slane %v328_v11, 4 }
 0x10a   :  { %v393_v61 = vrot.slane %v380_v53, %v604_v2 }
 0x10b   :  { %v332_v17 = vrot.slane %v331_v12, 2  ;;  %v344_v18 = vrot.slane %v343_v13, 2  ;;  %v337_v19 = vadd.f32 %v336_v14, %v326_v10  ;;  %v349_v20 = vadd.f32 %v348_v15, %v328_v11 }
 0x10c   :  { %v417_v10 = vrot.slane %v412_v55, %v601_v1  ;;  %v389_v11 = vrot.slane %v380_v53, %v612_v4  ;;  %v425_v14 = vrot.slane %v412_v55, %v604_v2  ;;  %v397_v15 = vrot.slane %v380_v53, %v615_v5 }
 0x10d   :  { %v333_v21 = vadd.f32 %v332_v17, %v331_v12  ;;  %v345_v22 = vadd.f32 %v344_v18, %v343_v13  ;;  %v338_v23 = vrot.slane %v337_v19, 2  ;;  %v350_v24 = vrot.slane %v349_v20, 2 }
 0x10e   :  { %v429_v1 = vrot.slane %v412_v55, %v615_v5 }
 0x10f   :  { %v334_v26 = vrot.slane %v333_v21, 1  ;;  %v346_v27 = vrot.slane %v345_v22, 1  ;;  %v339_v28 = vadd.f32 %v338_v23, %v337_v19  ;;  %v351_v29 = vadd.f32 %v350_v24, %v349_v20 }
 0x110   :  { %v215_v30 = vpop.f32.mrf.mxu0 }
 0x111   :  { %v335_v31 = vadd.f32 %v334_v26, %v333_v21  ;;  %v347_v32 = vadd.f32 %v346_v27, %v345_v22  ;;  %v340_v33 = vrot.slane %v339_v28, 1  ;;  %v352_v34 = vrot.slane %v351_v29, 1 }
 0x112   :  { %v252_v35 = vmul.f32 %v242_v25, %v215_v30  ;;  %v511_v36 = vpop.f32.mrf.mxu0  ;;  %v421_v21 = vrot.slane %v412_v55, %v612_v4 }
 0x113   :  { %v360_v37 = vmul.f32 0.125, %v335_v31  ;;  %v362_v38 = vmul.f32 0.125, %v347_v32  ;;  %v341_v39 = vadd.f32 %v340_v33, %v339_v28  ;;  %v353_v40 = vadd.f32 %v352_v34, %v351_v29 }
 0x114   :  { %v284_v41 = vadd.f32 %v274_v0, %v252_v35  ;;  %v218_v3 = vpop.f32.mrf.mxu0  ;;  %v401_v36 = vrot.slane %v380_v53, %v655_v16 }
 0x115   :  { %v365_v42 = vadd.f32 1e-05, %v360_v37  ;;  %v367_v43 = vadd.f32 1e-05, %v362_v38  ;;  %v361_v44 = vmul.f32 0.125, %v341_v39  ;;  %v363_v45 = vmul.f32 0.125, %v353_v40 }
 0x116   :  { %v309_v46 = vrot.slane %v284_v41, 4  ;;  %v512_v47 = vpop.f32.mrf.mxu0  ;;  %v433_v39 = vrot.slane %v412_v55, %v655_v16 }
 0x117   :  { %519 = vrsqrt.f32 %v365_v42  ;;  %v366_v6 = vadd.f32 1e-05, %v361_v44  ;;  %v368_v48 = vadd.f32 1e-05, %v363_v45 }
 0x118   :  { %521 = vrsqrt.f32 %v367_v43  ;;  %v310_v49 = vadd.f32 %v309_v46, %v284_v41 }
 0x119   :  { %523 = vrsqrt.f32 %v366_v6 }
 0x11a   :  { %525 = vrsqrt.f32 %v368_v48  ;;  %v311_v50 = vrot.slane %v310_v49, 2 }
 0x11c   :  { %v312_v51 = vadd.f32 %v311_v50, %v310_v49 }
 0x11e   :  { %v313_v52 = vrot.slane %v312_v51, 1 }
 0x120   :  { %v314_v54 = vadd.f32 %v313_v52, %v312_v51 }
 0x122   :  { %v319_v56 = vmul.f32 0.125, %v314_v54 }
 0x124   :  { %v520_v60 = vpop.eup %519  ;;  %v324_v62 = vsub.f32 %v284_v41, %v319_v56 }
 0x125   :  { %v522_v8 = vpop.eup %521  ;;  %v375_v9 = vmul.f32 %v520_v60, %v638_v57 }
 0x126   :  { %v524_v12 = vpop.eup %523  ;;  %v377_v13 = vmul.f32 %v522_v8, %v640_v58  ;;  %v329_v17 = vmul.f32 %v324_v62, %v324_v62 }
 0x127   :  { %v526_v18 = vpop.eup %525  ;;  %v407_v19 = vmul.f32 %v385_v59, %v375_v9  ;;  %v376_v20 = vmul.f32 %v524_v12, %v646_v63 }
 0x128   :  { %v409_v22 = vmul.f32 %v393_v61, %v377_v13  ;;  %v378_v57 = vmul.f32 %v526_v18, %v648_v7  ;;  %v354_v23 = vrot.slane %v329_v17, 4 }
 0x129   :  { %v439_v24 = vadd.f32 %v417_v10, %v407_v19  ;;  %v408_v25 = vmul.f32 %v389_v11, %v376_v20 }
 0x12a   :  { %v441_v58 = vadd.f32 %v425_v14, %v409_v22  ;;  %v410_v26 = vmul.f32 %v397_v15, %v378_v57  ;;  %v355_v2 = vadd.f32 %v354_v23, %v329_v17 }
 0x12b   :  { %v440_v27 = vadd.f32 %v421_v21, %v408_v25  ;;  %v444_v30 = vmax.f32 %v439_v24, 0.0 }
 0x12c   :  { %v442_v28 = vadd.f32 %v429_v1, %v410_v26  ;;  %v356_v29 = vrot.slane %v355_v2, 2  ;;  %v446_v31 = vmax.f32 %v441_v58, 0.0 }
 0x12d   :  { %v445_v0 = vmax.f32 %v440_v27, 0.0 }
 0x12e   :  { %v447_v63 = vmax.f32 %v442_v28, 0.0  ;;  %v357_v32 = vadd.f32 %v356_v29, %v355_v2 }
 0x12f   :  { %v481_v4 = vpack.c.bf16 %v445_v0, %v444_v30 }
 0x130   :  { %v482_v33 = vpack.c.bf16 %v447_v63, %v446_v31  ;;  %v358_v34 = vrot.slane %v357_v32, 1 }
 0x131   :  { %470 = vst [vmem:[%s696_s6] sm:$0xff] %v481_v4 }
 0x132   :  { %471 = vst [vmem:[%s696_s6 + $0x8] sm:$0xff] %v482_v33  ;;  %v359_v5 = vadd.f32 %v358_v34, %v357_v32 }
 0x134   :  { %v364_v7 = vmul.f32 0.125, %v359_v5 }
 0x136   :  { %v369_v35 = vadd.f32 1e-05, %v364_v7 }
 0x138   :  { %527 = vrsqrt.f32 %v369_v35 }
 0x145   :  { %v528_v37 = vpop.eup %527 }
 0x146   :  { %v379_v38 = vmul.f32 %v528_v37, %v324_v62 }
 0x148   :  { %v411_v40 = vmul.f32 %v401_v36, %v379_v38 }
 0x14a   :  { %v443_v41 = vadd.f32 %v433_v39, %v411_v40 }
 0x14c   :  { %v448_v3 = vmax.f32 %v443_v41, 0.0 }
 0x14e   :  { %v483_v42 = vpack.c.bf16 %v448_v3, %v448_v3 }
 0x150   :  { %472 = vst [vmem:[%s696_s6 + $0x10] sm:$0xf] %v483_v42 }
 0x151   :  { %477 = vsyncpa [#allocation3], 1 }

// kernel: multi_proxy_forward.6
= control target key start
LH: loop header
LB: loop body
LE: loop exit
PB: predicated region body
PF: predicated region fallthrough
CT: control target
= control target key end

     0   :  { %11 = vsyncpa [#allocation3], 0  ;;  %s1421_s0 = inlined_call_operand.vmem [shape: bf16[8,640], index: 0, kind: input, shape index: {}]   ;;  %s1422_s1 = inlined_call_operand.hbm [shape: s8[1,640,640], index: 1, kind: input, shape index: {}]   ;;  %s1423_s2 = inlined_call_operand.hbm [shape: f32[1,640], index: 2, kind: input, shape index: {}]   ;;  %s1424_s3 = inlined_call_operand.hbm [shape: f32[1,640], index: 3, kind: input, shape index: {}]   ;;  %s1425_s4 = inlined_call_operand.hbm [shape: f32[1,640], index: 4, kind: input, shape index: {}]   ;;  %s1426_s5 = inlined_call_operand.hbm [shape: f32[1,640], index: 5, kind: input, shape index: {}]   ;;  %s1427_s6 = inlined_call_operand.vmem [shape: bf16[8,640], index: 6, kind: output, shape index: {}]  }
   0x1   :  { %12 = vsyncpa [#allocation5], 0 }
   0x2   :  { %13 = vsyncpa [#allocation8], 0  ;;  %s1245_s21 = smov [#allocation4]   ;;  %s1246_s23 = smov [#allocation7]  }
   0x3   :  { %s34_s22 = sshll.u32 %s1245_s21, 4  ;;  %s54_s24 = sshll.u32 %s1246_s23, 4  ;;  %s35_s22 = int_to_ptr.vmem [resolvable:$true] %s34_s22  ;;  %s55_s24 = int_to_ptr.vmem [resolvable:$true] %s54_s24 }
   0x4   :  { %s1147_s25 = scalar_lea.vmem %s35_s22, 80  ;;  %s1151_s26 = scalar_lea.vmem %s35_s22, 96 }
   0x5   :  { %p1148_p0 = scmp.ne.s32.totalorder %s35_s22, %s1147_s25  ;;  %p1152_p1 = scmp.lt.s32.totalorder %s35_s22, %s35_s22 }
   0x6   :  { %p1153_p2 = scmp.lt.s32.totalorder %s1151_s26, %s1147_s25 }
   0x8   :  { %p1154_p3 = por %p1153_p2, %p1152_p1 }
   0xa   :  { %p1155_p4 = pnand %p1154_p3, %p1148_p0 }
   0xc   :  { %1158 = shalt.err (!%p1155_p4)
}
   0xd   :  { %37 = dma.hbm_to_vmem [thread:$0]  %s1423_s2, 80, %s35_s22, [#allocation5]  }
   0xe   :  { %s1167_s29 = scalar_lea.vmem %s55_s24, 80  ;;  %s1171_s30 = scalar_lea.vmem %s55_s24, 96 }
   0xf   :  { %p1168_p5 = scmp.ne.s32.totalorder %s55_s24, %s1167_s29  ;;  %p1172_p6 = scmp.lt.s32.totalorder %s55_s24, %s55_s24 }
  0x10   :  { %p1173_p7 = scmp.lt.s32.totalorder %s1171_s30, %s1167_s29 }
  0x12   :  { %p1174_p8 = por %p1173_p7, %p1172_p6 }
  0x14   :  { %p1175_p9 = pnand %p1174_p8, %p1168_p5 }
  0x16   :  { %1178 = shalt.err (!%p1175_p9)
}
  0x17   :  { %57 = dma.hbm_to_vmem [thread:$0]  %s1425_s4, 80, %s55_s24, [#allocation8]  }
  0x18   :  { %s1247_s9 = smov [#allocation2]  }
  0x19   :  { %s21_s10 = sshll.u32 %s1247_s9, 4  ;;  %s22_s10 = int_to_ptr.vmem [resolvable:$true] %s21_s10 }
  0x1a   :  { %s1187_s11 = scalar_lea.vmem %s22_s10, 12800  ;;  %p1192_p11 = scmp.lt.s32.totalorder %s22_s10, %s22_s10 }
  0x1b   :  { %p1188_p10 = scmp.ne.s32.totalorder %s22_s10, %s1187_s11  ;;  %p1193_p12 = scmp.lt.s32.totalorder %s1187_s11, %s1187_s11 }
  0x1d   :  { %p1194_p13 = por %p1193_p12, %p1192_p11 }
  0x1f   :  { %p1195_p0 = pnand %p1194_p13, %p1188_p10 }
  0x21   :  { %1198 = shalt.err (!%p1195_p0)
}
  0x22   :  { %s1248_s2 = smov 640   ;;  %s1249_s12 = smov 40  }
  0x23   :  { %27 = dma.hbm_to_vmem [thread:$0]  %s1422_s1, 12800, %s22_s10, [#allocation3], %s1248_s2, %s1248_s2, %s1249_s12  }
  0x24   :  { %s1250_s15 = smov [#allocation6]   ;;  %s1251_s4 = smov [#allocation9]  }
  0x25   :  { %s44_s16 = sshll.u32 %s1250_s15, 4  ;;  %s64_s17 = sshll.u32 %s1251_s4, 4  ;;  %s45_s16 = int_to_ptr.vmem [resolvable:$true] %s44_s16  ;;  %s65_s17 = int_to_ptr.vmem [resolvable:$true] %s64_s17 }
  0x26   :  { %s1207_s18 = scalar_lea.vmem %s45_s16, 80  ;;  %s1211_s19 = scalar_lea.vmem %s45_s16, 96 }
  0x27   :  { %p1208_p1 = scmp.ne.s32.totalorder %s45_s16, %s1207_s18  ;;  %p1212_p2 = scmp.lt.s32.totalorder %s45_s16, %s45_s16 }
  0x28   :  { %p1213_p3 = scmp.lt.s32.totalorder %s1211_s19, %s1207_s18 }
  0x2a   :  { %p1214_p4 = por %p1213_p3, %p1212_p2 }
  0x2c   :  { %p1215_p5 = pnand %p1214_p4, %p1208_p1 }
  0x2e   :  { %1218 = shalt.err (!%p1215_p5)
}
  0x2f   :  { %47 = dma.hbm_to_vmem [thread:$0]  %s1424_s3, 80, %s45_s16, [#allocation5]  }
  0x30   :  { %s1227_s22 = scalar_lea.vmem %s65_s17, 80  ;;  %s1231_s1 = scalar_lea.vmem %s65_s17, 96 }
  0x31   :  { %p1228_p6 = scmp.ne.s32.totalorder %s65_s17, %s1227_s22  ;;  %p1232_p7 = scmp.lt.s32.totalorder %s65_s17, %s65_s17 }
  0x32   :  { %p1233_p8 = scmp.lt.s32.totalorder %s1231_s1, %s1227_s22 }
  0x34   :  { %p1234_p9 = por %p1233_p8, %p1232_p7 }
  0x36   :  { %p1235_p10 = pnand %p1234_p9, %p1228_p6 }
  0x38   :  { %1238 = shalt.err (!%p1235_p10)
}
  0x39   :  { %67 = dma.hbm_to_vmem [thread:$0]  %s1426_s5, 80, %s65_s17, [#allocation8]  }
  0x3a   :  { %1239 = dma.done.wait [#allocation3], 12800  }
  0x3b   :  { %1240 = vsyncadd [#allocation3], 4294954496 }
  0x3c   :  { %1241 = dma.done.wait [#allocation5], 160  }
  0x3d   :  { %1242 = vsyncadd [#allocation5], 4294967136 }
  0x3e   :  { %1243 = dma.done.wait [#allocation8], 160  }
  0x3f   :  { %1244 = vsyncadd [#allocation8], 4294967136  ;;  %v103_v0 = vld [vmem:[#allocation2 + $0x80] sm:$0xff]  ;;  %v102_v2 = vld [vmem:[#allocation2 + $0x78] sm:$0xff]  ;;  %vm1254_vm0 = vmmov 0  }
  0x40   :  { %v143_v1 = vld [vmem:[#allocation2 + $0x1c0] sm:$0xff]  ;;  %v218_v3 = vunpack.c.l.s8.bf16 %v103_v0  ;;  %v223_v4 = vunpack.c.h.s8.bf16 %v103_v0  ;;  %v142_v7 = vld [vmem:[#allocation2 + $0x1b8] sm:$0xff]  ;;  %v222_v8 = vunpack.c.h.s8.bf16 %v102_v2  ;;  %v217_v12 = vunpack.c.l.s8.bf16 %v102_v2  ;;  %v97_v16 = vld [vmem:[#allocation2 + $0x50] sm:$0xff] }
  0x41   :  { %v298_v5 = vunpack.c.l.s8.bf16 %v143_v1  ;;  %v303_v6 = vunpack.c.h.s8.bf16 %v143_v1  ;;  %v302_v9 = vunpack.c.h.s8.bf16 %v142_v7  ;;  %v98_v10 = vld [vmem:[#allocation2 + $0x58] sm:$0xff]  ;;  %v297_v13 = vunpack.c.l.s8.bf16 %v142_v7  ;;  %v137_v17 = vld [vmem:[#allocation2 + $0x190] sm:$0xff]  ;;  %v92_v28 = vld [vmem:[#allocation2 + $0x28] sm:$0xff] }
  0x42   :  { %v138_v11 = vld [vmem:[#allocation2 + $0x198] sm:$0xff]  ;;  %405 = vmatprep.subr.bf16.mxu0 %v223_v4  ;;  %v213_v14 = vunpack.c.h.s8.bf16 %v98_v10  ;;  %v212_v18 = vunpack.c.h.s8.bf16 %v97_v16  ;;  %v292_v19 = vunpack.c.h.s8.bf16 %v137_v17  ;;  %v208_v20 = vunpack.c.l.s8.bf16 %v98_v10  ;;  %v93_v22 = vld [vmem:[#allocation2 + $0x30] sm:$0xff]  ;;  %v132_v29 = vld [vmem:[#allocation2 + $0x168] sm:$0xff] }
  0x43   :  { %446 = vmatprep.subr.bf16.mxu1 %v303_v6  ;;  %406 = vmatpush1.bf16.msra.mxu0 %v222_v8  ;;  %v293_v15 = vunpack.c.h.s8.bf16 %v138_v11  ;;  %v288_v21 = vunpack.c.l.s8.bf16 %v138_v11  ;;  %v133_v23 = vld [vmem:[#allocation2 + $0x170] sm:$0xff]  ;;  %v207_v24 = vunpack.c.l.s8.bf16 %v97_v16  ;;  %v287_v25 = vunpack.c.l.s8.bf16 %v137_v17  ;;  %v1308_v30 = vld [vmem:[%s1421_s0] sm:$0xff]  ;;  %v1313_v31 = vld [vmem:[%s1421_s0 + $0x8] sm:$0xff] }
  0x44   :  { %447 = vmatpush1.bf16.msra.mxu1 %v302_v9  ;;  %407 = vmatprep.subr.bf16.mxu0 %v218_v3  ;;  %v203_v26 = vunpack.c.h.s8.bf16 %v93_v22  ;;  %v283_v27 = vunpack.c.h.s8.bf16 %v133_v23  ;;  %v202_v32 = vunpack.c.h.s8.bf16 %v92_v28  ;;  %v282_v33 = vunpack.c.h.s8.bf16 %v132_v29  ;;  %v88_v38 = vld [vmem:[#allocation2 + $0x8] sm:$0xff]  ;;  %v87_v44 = vld [vmem:[#allocation2] sm:$0xff]  ;;  %v122_v56 = vld [vmem:[#allocation2 + $0x118] sm:$0xff] }
  0x45   :  { %448 = vmatprep.subr.bf16.mxu1 %v298_v5  ;;  %v198_v34 = vunpack.c.l.s8.bf16 %v93_v22  ;;  %v278_v35 = vunpack.c.l.s8.bf16 %v133_v23  ;;  %v1317_v36 = vcombine.high %v1308_v30, %v1308_v30  ;;  %v1321_v37 = vcombine.high %v1313_v31, %v1313_v31  ;;  %v128_v39 = vld [vmem:[#allocation2 + $0x148] sm:$0xff]  ;;  %v127_v45 = vld [vmem:[#allocation2 + $0x140] sm:$0xff]  ;;  %v162_v57 = vld [vmem:[#allocation2 + $0x258] sm:$0xff] }
  0x46   :  { %v197_v40 = vunpack.c.l.s8.bf16 %v92_v28  ;;  %v277_v41 = vunpack.c.l.s8.bf16 %v132_v29  ;;  %v193_v42 = vunpack.c.h.s8.bf16 %v88_v38  ;;  %v273_v43 = vunpack.c.h.s8.bf16 %v128_v39  ;;  %v123_v50 = vld [vmem:[#allocation2 + $0x120] sm:$0xff]  ;;  %v118_v62 = vld [vmem:[#allocation2 + $0xf8] sm:$0xff]  ;;  %v117_v4 = vld [vmem:[#allocation2 + $0xf0] sm:$0xff] }
  0x47   :  { %408 = vmatpush1.bf16.msra.mxu0 %v217_v12  ;;  %437 = vmatprep.mubr.bf16.mxu0 %v1317_v36  ;;  %v192_v46 = vunpack.c.h.s8.bf16 %v87_v44  ;;  %v272_v47 = vunpack.c.h.s8.bf16 %v127_v45  ;;  %v188_v48 = vunpack.c.l.s8.bf16 %v88_v38  ;;  %v268_v49 = vunpack.c.l.s8.bf16 %v128_v39  ;;  %v163_v51 = vld [vmem:[#allocation2 + $0x260] sm:$0xff]  ;;  %v158_v63 = vld [vmem:[#allocation2 + $0x238] sm:$0xff]  ;;  %v157_v5 = vld [vmem:[#allocation2 + $0x230] sm:$0xff] }
  0x48   :  { %449 = vmatpush1.bf16.msra.mxu1 %v297_v13  ;;  %409 = vmatprep.subr.bf16.mxu0 %v213_v14  ;;  %v187_v52 = vunpack.c.l.s8.bf16 %v87_v44  ;;  %v267_v53 = vunpack.c.l.s8.bf16 %v127_v45  ;;  %v263_v54 = vunpack.c.h.s8.bf16 %v123_v50  ;;  %v343_v55 = vunpack.c.h.s8.bf16 %v163_v51  ;;  %v113_v10 = vld [vmem:[#allocation2 + $0xd0] sm:$0xff]  ;;  %v112_v16 = vld [vmem:[#allocation2 + $0xc8] sm:$0xff]  ;;  %v107_v28 = vld [vmem:[#allocation2 + $0xa0] sm:$0xff] }
  0x49   :  { %450 = vmatprep.subr.bf16.mxu1 %v293_v15  ;;  %478 = vmatprep.mubr.bf16.mxu1 %v1321_v37  ;;  %v262_v58 = vunpack.c.h.s8.bf16 %v122_v56  ;;  %v342_v59 = vunpack.c.h.s8.bf16 %v162_v57  ;;  %v258_v60 = vunpack.c.l.s8.bf16 %v123_v50  ;;  %v338_v61 = vunpack.c.l.s8.bf16 %v163_v51  ;;  %v153_v11 = vld [vmem:[#allocation2 + $0x210] sm:$0xff]  ;;  %v152_v17 = vld [vmem:[#allocation2 + $0x208] sm:$0xff]  ;;  %v147_v29 = vld [vmem:[#allocation2 + $0x1e0] sm:$0xff] }
  0x4a   :  { %v257_v0 = vunpack.c.l.s8.bf16 %v122_v56  ;;  %v337_v1 = vunpack.c.l.s8.bf16 %v162_v57  ;;  %v253_v2 = vunpack.c.h.s8.bf16 %v118_v62  ;;  %v333_v3 = vunpack.c.h.s8.bf16 %v158_v63  ;;  %v108_v22 = vld [vmem:[#allocation2 + $0xa8] sm:$0xff]  ;;  %v183_v38 = vld [vmem:[#allocation2 + $0x300] sm:$0xff]  ;;  %v105_v39 = vld [vmem:[#allocation2 + $0x90] sm:$0xff] }
  0x4b   :  { %410 = vmatpush1.bf16.msra.mxu0 %v212_v18  ;;  %v252_v6 = vunpack.c.h.s8.bf16 %v117_v4  ;;  %v332_v7 = vunpack.c.h.s8.bf16 %v157_v5  ;;  %v248_v8 = vunpack.c.l.s8.bf16 %v118_v62  ;;  %v328_v9 = vunpack.c.l.s8.bf16 %v158_v63  ;;  %v148_v23 = vld [vmem:[#allocation2 + $0x1e8] sm:$0xff]  ;;  %v182_v44 = vld [vmem:[#allocation2 + $0x2f8] sm:$0xff]  ;;  %v177_v56 = vld [vmem:[#allocation2 + $0x2d0] sm:$0xff] }
  0x4c   :  { %451 = vmatpush1.bf16.msra.mxu1 %v292_v19  ;;  %411 = vmatprep.subr.bf16.mxu0 %v208_v20  ;;  %v247_v12 = vunpack.c.l.s8.bf16 %v117_v4  ;;  %v327_v13 = vunpack.c.l.s8.bf16 %v157_v5  ;;  %v243_v14 = vunpack.c.h.s8.bf16 %v113_v10  ;;  %v323_v15 = vunpack.c.h.s8.bf16 %v153_v11  ;;  %v104_v45 = vld [vmem:[#allocation2 + $0x88] sm:$0xff]  ;;  %v99_v57 = vld [vmem:[#allocation2 + $0x60] sm:$0xff]  ;;  %v173_v63 = vld [vmem:[#allocation2 + $0x2b0] sm:$0xff] }
  0x4d   :  { %452 = vmatprep.subr.bf16.mxu1 %v288_v21  ;;  %v242_v18 = vunpack.c.h.s8.bf16 %v112_v16  ;;  %v322_v19 = vunpack.c.h.s8.bf16 %v152_v17  ;;  %v238_v20 = vunpack.c.l.s8.bf16 %v113_v10  ;;  %v318_v21 = vunpack.c.l.s8.bf16 %v153_v11  ;;  %v172_v5 = vld [vmem:[#allocation2 + $0x2a8] sm:$0xff] }
  0x4e   :  { %v378_v50 = vunpack.c.l.s8.bf16 %v183_v38  ;;  %v220_v51 = vunpack.c.l.s8.bf16 %v105_v39  ;;  %v168_v11 = vld [vmem:[#allocation2 + $0x288] sm:$0xff] }
  0x4f   :  { %412 = vmatpush1.bf16.msra.mxu0 %v207_v24  ;;  %v237_v24 = vunpack.c.l.s8.bf16 %v112_v16 }
  0x50   :  { %453 = vmatpush1.bf16.msra.mxu1 %v287_v25  ;;  %413 = vmatprep.subr.bf16.mxu0 %v203_v26  ;;  %v317_v25 = vunpack.c.l.s8.bf16 %v152_v17  ;;  %v233_v26 = vunpack.c.h.s8.bf16 %v108_v22  ;;  %v167_v17 = vld [vmem:[#allocation2 + $0x280] sm:$0xff] }
  0x51   :  { %454 = vmatprep.subr.bf16.mxu1 %v283_v27  ;;  %v313_v27 = vunpack.c.h.s8.bf16 %v148_v23 }
  0x53   :  { %414 = vmatpush1.bf16.msra.mxu0 %v202_v32  ;;  %v232_v32 = vunpack.c.h.s8.bf16 %v107_v28 }
  0x54   :  { %455 = vmatpush1.bf16.msra.mxu1 %v282_v33  ;;  %415 = vmatprep.subr.bf16.mxu0 %v198_v34  ;;  %v312_v33 = vunpack.c.h.s8.bf16 %v147_v29  ;;  %v228_v34 = vunpack.c.l.s8.bf16 %v108_v22 }
  0x55   :  { %456 = vmatprep.subr.bf16.mxu1 %v278_v35  ;;  %v308_v35 = vunpack.c.l.s8.bf16 %v148_v23  ;;  %v125_v23 = vld [vmem:[#allocation2 + $0x130] sm:$0xff] }
  0x57   :  { %416 = vmatpush1.bf16.msra.mxu0 %v197_v40  ;;  %v227_v40 = vunpack.c.l.s8.bf16 %v107_v28 }
  0x58   :  { %457 = vmatpush1.bf16.msra.mxu1 %v277_v41  ;;  %417 = vmatprep.subr.bf16.mxu0 %v193_v42  ;;  %v307_v41 = vunpack.c.l.s8.bf16 %v147_v29  ;;  %v383_v42 = vunpack.c.h.s8.bf16 %v183_v38  ;;  %v124_v29 = vld [vmem:[#allocation2 + $0x128] sm:$0xff]  ;;  %v260_v38 = vunpack.c.l.s8.bf16 %v125_v23 }
  0x59   :  { %458 = vmatprep.subr.bf16.mxu1 %v273_v43  ;;  %v225_v43 = vunpack.c.h.s8.bf16 %v105_v39 }
  0x5b   :  { %418 = vmatpush1.bf16.msra.mxu0 %v192_v46  ;;  %v1327_v46 = vcombine.low %v1308_v30, %v1308_v30  ;;  %v377_v30 = vunpack.c.l.s8.bf16 %v182_v44 }
  0x5c   :  { %459 = vmatpush1.bf16.msra.mxu1 %v272_v47  ;;  %419 = vmatprep.subr.bf16.mxu0 %v188_v48  ;;  %v1331_v47 = vcombine.low %v1313_v31, %v1313_v31  ;;  %v382_v48 = vunpack.c.h.s8.bf16 %v182_v44 }
  0x5d   :  { %460 = vmatprep.subr.bf16.mxu1 %v268_v49  ;;  %v224_v49 = vunpack.c.h.s8.bf16 %v104_v45 }
  0x5f   :  { %420 = vmatpush1.bf16.msra.mxu0 %v187_v52  ;;  %v178_v52 = vld [vmem:[#allocation2 + $0x2d8] sm:$0xff] }
  0x60   :  { %461 = vmatpush1.bf16.msra.mxu1 %v267_v53  ;;  %421 = vmatprep.subr.bf16.mxu0 %v263_v54  ;;  %v100_v53 = vld [vmem:[#allocation2 + $0x68] sm:$0xff]  ;;  %v219_v54 = vunpack.c.l.s8.bf16 %v104_v45  ;;  %v373_v31 = vunpack.c.h.s8.bf16 %v178_v52 }
  0x61   :  { %462 = vmatprep.subr.bf16.mxu1 %v343_v55  ;;  %v215_v55 = vunpack.c.h.s8.bf16 %v100_v53  ;;  %v210_v62 = vunpack.c.l.s8.bf16 %v100_v53 }
  0x63   :  { %422 = vmatpush2.bf16.msra.mxu0 %v262_v58  ;;  %v1252_v58 = vmov 0  }
  0x64   :  { %463 = vmatpush2.bf16.msra.mxu1 %v342_v59  ;;  %423 = vmatprep.subr.bf16.mxu0 %v258_v60  ;;  %v372_v59 = vunpack.c.h.s8.bf16 %v177_v56  ;;  %v214_v60 = vunpack.c.h.s8.bf16 %v99_v57 }
  0x65   :  { %464 = vmatprep.subr.bf16.mxu1 %v338_v61  ;;  %v368_v61 = vunpack.c.l.s8.bf16 %v178_v52 }
  0x67   :  { %424 = vmatpush2.bf16.msra.mxu0 %v257_v0  ;;  %v95_v0 = vld [vmem:[#allocation2 + $0x40] sm:$0xff] }
  0x68   :  { %465 = vmatpush2.bf16.msra.mxu1 %v337_v1  ;;  %425 = vmatprep.subr.bf16.mxu0 %v253_v2  ;;  %v367_v1 = vunpack.c.l.s8.bf16 %v177_v56  ;;  %v209_v2 = vunpack.c.l.s8.bf16 %v99_v57  ;;  %v205_v4 = vunpack.c.h.s8.bf16 %v95_v0  ;;  %v200_v10 = vunpack.c.l.s8.bf16 %v95_v0 }
  0x69   :  { %466 = vmatprep.subr.bf16.mxu1 %v333_v3  ;;  %v363_v3 = vunpack.c.h.s8.bf16 %v173_v63 }
  0x6b   :  { %426 = vmatpush2.bf16.msra.mxu0 %v252_v6  ;;  %v94_v6 = vld [vmem:[#allocation2 + $0x38] sm:$0xff] }
  0x6c   :  { %467 = vmatpush2.bf16.msra.mxu1 %v332_v7  ;;  %427 = vmatprep.subr.bf16.mxu0 %v248_v8  ;;  %v362_v7 = vunpack.c.h.s8.bf16 %v172_v5  ;;  %v204_v8 = vunpack.c.h.s8.bf16 %v94_v6 }
  0x6d   :  { %468 = vmatprep.subr.bf16.mxu1 %v328_v9  ;;  %v358_v9 = vunpack.c.l.s8.bf16 %v173_v63 }
  0x6f   :  { %428 = vmatpush2.bf16.msra.mxu0 %v247_v12  ;;  %v90_v12 = vld [vmem:[#allocation2 + $0x18] sm:$0xff] }
  0x70   :  { %469 = vmatpush2.bf16.msra.mxu1 %v327_v13  ;;  %429 = vmatprep.subr.bf16.mxu0 %v243_v14  ;;  %v357_v13 = vunpack.c.l.s8.bf16 %v172_v5  ;;  %v199_v14 = vunpack.c.l.s8.bf16 %v94_v6  ;;  %v195_v16 = vunpack.c.h.s8.bf16 %v90_v12  ;;  %v190_v22 = vunpack.c.l.s8.bf16 %v90_v12 }
  0x71   :  { %470 = vmatprep.subr.bf16.mxu1 %v323_v15  ;;  %v353_v15 = vunpack.c.h.s8.bf16 %v168_v11 }
  0x73   :  { %430 = vmatpush2.bf16.msra.mxu0 %v242_v18  ;;  %v89_v18 = vld [vmem:[#allocation2 + $0x10] sm:$0xff] }
  0x74   :  { %471 = vmatpush2.bf16.msra.mxu1 %v322_v19  ;;  %431 = vmatprep.subr.bf16.mxu0 %v238_v20  ;;  %v352_v19 = vunpack.c.h.s8.bf16 %v167_v17  ;;  %v194_v20 = vunpack.c.h.s8.bf16 %v89_v18 }
  0x75   :  { %472 = vmatprep.subr.bf16.mxu1 %v318_v21  ;;  %v348_v21 = vunpack.c.l.s8.bf16 %v168_v11 }
  0x77   :  { %432 = vmatpush2.bf16.msra.mxu0 %v237_v24  ;;  %v145_v24 = vld [vmem:[#allocation2 + $0x1d0] sm:$0xff] }
  0x78   :  { %473 = vmatpush2.bf16.msra.mxu1 %v317_v25  ;;  %433 = vmatprep.subr.bf16.mxu0 %v233_v26  ;;  %v347_v25 = vunpack.c.l.s8.bf16 %v167_v17  ;;  %v189_v26 = vunpack.c.l.s8.bf16 %v89_v18  ;;  %v305_v28 = vunpack.c.h.s8.bf16 %v145_v24  ;;  %v300_v39 = vunpack.c.l.s8.bf16 %v145_v24 }
  0x79   :  { %474 = vmatprep.subr.bf16.mxu1 %v313_v27  ;;  %v265_v27 = vunpack.c.h.s8.bf16 %v125_v23 }
  0x7b   :  { %434 = vmatpush2.bf16.msra.mxu0 %v232_v32  ;;  %v144_v32 = vld [vmem:[#allocation2 + $0x1c8] sm:$0xff] }
  0x7c   :  { %475 = vmatpush2.bf16.msra.mxu1 %v312_v33  ;;  %435 = vmatprep.subr.bf16.mxu0 %v228_v34  ;;  %v1340_v33 = vld [vmem:[%s1421_s0 + $0x10] ss:$0 sps:$4 sm:$0xff]   ;;  %v264_v34 = vunpack.c.h.s8.bf16 %v124_v29 }
  0x7d   :  { %476 = vmatprep.subr.bf16.mxu1 %v308_v35  ;;  %v304_v35 = vunpack.c.h.s8.bf16 %v144_v32 }
  0x7f   :  { %436 = vmatpush2.bf16.msra.mxu0 %v227_v40  ;;  %v120_v40 = vld [vmem:[#allocation2 + $0x108] sm:$0xff] }
  0x80   :  { %477 = vmatpush2.bf16.msra.mxu1 %v307_v41  ;;  %487 = vmatprep.subr.bf16.mxu0 %v383_v42  ;;  %v140_v41 = vld [vmem:[#allocation2 + $0x1a8] sm:$0xff]  ;;  %v259_v42 = vunpack.c.l.s8.bf16 %v124_v29  ;;  %v255_v44 = vunpack.c.h.s8.bf16 %v120_v40  ;;  %v250_v52 = vunpack.c.l.s8.bf16 %v120_v40 }
  0x81   :  { %528 = vmatprep.subr.bf16.mxu1 %v225_v43  ;;  %v299_v43 = vunpack.c.l.s8.bf16 %v144_v32  ;;  %v295_v45 = vunpack.c.h.s8.bf16 %v140_v41  ;;  %v290_v53 = vunpack.c.l.s8.bf16 %v140_v41 }
  0x82   :  { %438 = vmatmul.mubr.bf16.vlgmr.msra.gmra.mxu0 %v1327_v46 }
  0x83   :  { %479 = vmatmul.mubr.bf16.vlgmr.msra.gmra.mxu1 %v1331_v47  ;;  %488 = vmatpush1.bf16.msra.mxu0 %v382_v48  ;;  %v119_v48 = vld [vmem:[#allocation2 + $0x100] sm:$0xff] }
  0x84   :  { %529 = vmatpush1.bf16.msra.mxu1 %v224_v49  ;;  %489 = vmatprep.subr.bf16.mxu0 %v378_v50  ;;  %v139_v49 = vld [vmem:[#allocation2 + $0x1a0] sm:$0xff]  ;;  %v254_v50 = vunpack.c.h.s8.bf16 %v119_v48 }
  0x85   :  { %530 = vmatprep.subr.bf16.mxu1 %v220_v51  ;;  %519 = vmatprep.mubr.bf16.mxu0 %v1252_v58  ;;  %v294_v51 = vunpack.c.h.s8.bf16 %v139_v49 }
  0x86   :  { %560 = vmatprep.mubr.bf16.mxu1 %v1317_v36 }
  0x87   :  { %490 = vmatpush1.bf16.msra.mxu0 %v377_v30  ;;  %v115_v30 = vld [vmem:[#allocation2 + $0xe0] sm:$0xff] }
  0x88   :  { %531 = vmatpush1.bf16.msra.mxu1 %v219_v54  ;;  %491 = vmatprep.subr.bf16.mxu0 %v373_v31  ;;  %v135_v54 = vld [vmem:[#allocation2 + $0x180] sm:$0xff]  ;;  %v249_v31 = vunpack.c.l.s8.bf16 %v119_v48  ;;  %v245_v56 = vunpack.c.h.s8.bf16 %v115_v30  ;;  %v240_v63 = vunpack.c.l.s8.bf16 %v115_v30 }
  0x89   :  { %532 = vmatprep.subr.bf16.mxu1 %v215_v55  ;;  %v289_v55 = vunpack.c.l.s8.bf16 %v139_v49  ;;  %v285_v57 = vunpack.c.h.s8.bf16 %v135_v54  ;;  %v280_v0 = vunpack.c.l.s8.bf16 %v135_v54  ;;  %v150_v54 = vld [vmem:[#allocation2 + $0x1f8] sm:$0xff] }
  0x8b   :  { %492 = vmatpush1.bf16.msra.mxu0 %v372_v59  ;;  %v114_v59 = vld [vmem:[#allocation2 + $0xd8] sm:$0xff] }
  0x8c   :  { %533 = vmatpush1.bf16.msra.mxu1 %v214_v60  ;;  %493 = vmatprep.subr.bf16.mxu0 %v368_v61  ;;  %v134_v60 = vld [vmem:[#allocation2 + $0x178] sm:$0xff]  ;;  %v244_v61 = vunpack.c.h.s8.bf16 %v114_v59 }
  0x8d   :  { %534 = vmatprep.subr.bf16.mxu1 %v210_v62  ;;  %v284_v62 = vunpack.c.h.s8.bf16 %v134_v60 }
  0x8f   :  { %494 = vmatpush1.bf16.msra.mxu0 %v367_v1  ;;  %v110_v1 = vld [vmem:[#allocation2 + $0xb8] sm:$0xff] }
  0x90   :  { %535 = vmatpush1.bf16.msra.mxu1 %v209_v2  ;;  %495 = vmatprep.subr.bf16.mxu0 %v363_v3  ;;  %v130_v2 = vld [vmem:[#allocation2 + $0x158] sm:$0xff]  ;;  %v239_v3 = vunpack.c.l.s8.bf16 %v114_v59  ;;  %v235_v5 = vunpack.c.h.s8.bf16 %v110_v1  ;;  %v230_v11 = vunpack.c.l.s8.bf16 %v110_v1 }
  0x91   :  { %536 = vmatprep.subr.bf16.mxu1 %v205_v4  ;;  %v279_v4 = vunpack.c.l.s8.bf16 %v134_v60  ;;  %v275_v6 = vunpack.c.h.s8.bf16 %v130_v2  ;;  %v270_v12 = vunpack.c.l.s8.bf16 %v130_v2  ;;  %v149_v60 = vld [vmem:[#allocation2 + $0x1f0] sm:$0xff]  ;;  %v126_v2 = vld [vmem:[#allocation2 + $0x138] sm:$0xff] }
  0x93   :  { %496 = vmatpush1.bf16.msra.mxu0 %v362_v7  ;;  %v109_v7 = vld [vmem:[#allocation2 + $0xb0] sm:$0xff] }
  0x94   :  { %537 = vmatpush1.bf16.msra.mxu1 %v204_v8  ;;  %497 = vmatprep.subr.bf16.mxu0 %v358_v9  ;;  %v129_v8 = vld [vmem:[#allocation2 + $0x150] sm:$0xff]  ;;  %v234_v9 = vunpack.c.h.s8.bf16 %v109_v7 }
  0x95   :  { %538 = vmatprep.subr.bf16.mxu1 %v200_v10  ;;  %v274_v10 = vunpack.c.h.s8.bf16 %v129_v8 }
  0x97   :  { %498 = vmatpush1.bf16.msra.mxu0 %v357_v13  ;;  %v165_v13 = vld [vmem:[#allocation2 + $0x270] sm:$0xff] }
  0x98   :  { %539 = vmatpush1.bf16.msra.mxu1 %v199_v14  ;;  %499 = vmatprep.subr.bf16.mxu0 %v353_v15  ;;  %v185_v14 = vld [vmem:[#allocation2 + $0x310] sm:$0xff]  ;;  %v229_v15 = vunpack.c.l.s8.bf16 %v109_v7  ;;  %v345_v17 = vunpack.c.h.s8.bf16 %v165_v13  ;;  %v340_v23 = vunpack.c.l.s8.bf16 %v165_v13 }
  0x99   :  { %540 = vmatprep.subr.bf16.mxu1 %v195_v16  ;;  %v269_v16 = vunpack.c.l.s8.bf16 %v129_v8  ;;  %v385_v18 = vunpack.c.h.s8.bf16 %v185_v14  ;;  %v380_v24 = vunpack.c.l.s8.bf16 %v185_v14  ;;  %v106_v8 = vld [vmem:[#allocation2 + $0x98] sm:$0xff]  ;;  %v121_v14 = vld [vmem:[#allocation2 + $0x110] sm:$0xff] }
  0x9b   :  { %500 = vmatpush1.bf16.msra.mxu0 %v352_v19  ;;  %v164_v19 = vld [vmem:[#allocation2 + $0x268] sm:$0xff] }
  0x9c   :  { %541 = vmatpush1.bf16.msra.mxu1 %v194_v20  ;;  %501 = vmatprep.subr.bf16.mxu0 %v348_v21  ;;  %v184_v20 = vld [vmem:[#allocation2 + $0x308] sm:$0xff]  ;;  %v344_v21 = vunpack.c.h.s8.bf16 %v164_v19 }
  0x9d   :  { %542 = vmatprep.subr.bf16.mxu1 %v190_v22  ;;  %v384_v22 = vunpack.c.h.s8.bf16 %v184_v20 }
  0x9f   :  { %502 = vmatpush1.bf16.msra.mxu0 %v347_v25  ;;  %v160_v25 = vld [vmem:[#allocation2 + $0x248] sm:$0xff] }
  0xa0   :  { %543 = vmatpush1.bf16.msra.mxu1 %v189_v26  ;;  %569 = vmatprep.subr.bf16.mxu0 %v305_v28  ;;  %v180_v26 = vld [vmem:[#allocation2 + $0x2e8] sm:$0xff]  ;;  %v379_v28 = vunpack.c.l.s8.bf16 %v184_v20  ;;  %v335_v29 = vunpack.c.h.s8.bf16 %v160_v25  ;;  %v330_v40 = vunpack.c.l.s8.bf16 %v160_v25  ;;  %v101_v20 = vld [vmem:[#allocation2 + $0x70] sm:$0xff] }
  0xa1   :  { %544 = vmatprep.subr.bf16.mxu1 %v265_v27  ;;  %v339_v27 = vunpack.c.l.s8.bf16 %v164_v19  ;;  %v375_v32 = vunpack.c.h.s8.bf16 %v180_v26  ;;  %v370_v41 = vunpack.c.l.s8.bf16 %v180_v26  ;;  %v116_v26 = vld [vmem:[#allocation2 + $0xe8] sm:$0xff] }
  0xa2   :  { %520 = vmatmul.mubr.bf16.vlgmr.msra.gmra.mxu0 %v1340_v33 }
  0xa3   :  { %570 = vmatpush1.bf16.msra.mxu0 %v304_v35  ;;  %601 = vmatprep.mubr.bf16.mxu0 %v1321_v37  ;;  %v179_v35 = vld [vmem:[#allocation2 + $0x2e0] sm:$0xff] }
  0xa4   :  { %545 = vmatpush2.bf16.msra.mxu1 %v264_v34  ;;  %571 = vmatprep.subr.bf16.mxu0 %v300_v39  ;;  %v159_v34 = vld [vmem:[#allocation2 + $0x240] sm:$0xff]  ;;  %v374_v39 = vunpack.c.h.s8.bf16 %v179_v35 }
  0xa5   :  { %546 = vmatprep.subr.bf16.mxu1 %v260_v38  ;;  %v334_v38 = vunpack.c.h.s8.bf16 %v159_v34 }
  0xa7   :  { %572 = vmatpush1.bf16.msra.mxu0 %v299_v43  ;;  %v175_v43 = vld [vmem:[#allocation2 + $0x2c0] sm:$0xff] }
  0xa8   :  { %547 = vmatpush2.bf16.msra.mxu1 %v259_v42  ;;  %573 = vmatprep.subr.bf16.mxu0 %v295_v45  ;;  %v155_v42 = vld [vmem:[#allocation2 + $0x220] sm:$0xff]  ;;  %v369_v45 = vunpack.c.l.s8.bf16 %v179_v35  ;;  %v365_v49 = vunpack.c.h.s8.bf16 %v175_v43  ;;  %v360_v30 = vunpack.c.l.s8.bf16 %v175_v43 }
  0xa9   :  { %548 = vmatprep.subr.bf16.mxu1 %v255_v44  ;;  %v329_v44 = vunpack.c.l.s8.bf16 %v159_v34  ;;  %v325_v48 = vunpack.c.h.s8.bf16 %v155_v42  ;;  %v96_v34 = vld [vmem:[#allocation2 + $0x48] sm:$0xff] }
  0xaa   :  { %v206_v35 = vunpack.c.h.s8.bf16 %v96_v34  ;;  %v201_v43 = vunpack.c.l.s8.bf16 %v96_v34 }
  0xab   :  { %574 = vmatpush1.bf16.msra.mxu0 %v294_v51 }
  0xac   :  { %549 = vmatpush2.bf16.msra.mxu1 %v254_v50  ;;  %575 = vmatprep.subr.bf16.mxu0 %v290_v53  ;;  %v154_v50 = vld [vmem:[#allocation2 + $0x218] sm:$0xff]  ;;  %v320_v53 = vunpack.c.l.s8.bf16 %v155_v42  ;;  %v151_v42 = vld [vmem:[#allocation2 + $0x200] sm:$0xff] }
  0xad   :  { %550 = vmatprep.subr.bf16.mxu1 %v250_v52  ;;  %v324_v51 = vunpack.c.h.s8.bf16 %v154_v50 }
  0xaf   :  { %576 = vmatpush1.bf16.msra.mxu0 %v289_v55  ;;  %v319_v55 = vunpack.c.l.s8.bf16 %v154_v50  ;;  %v131_v50 = vld [vmem:[#allocation2 + $0x160] sm:$0xff] }
  0xb0   :  { %551 = vmatpush2.bf16.msra.mxu1 %v249_v31  ;;  %577 = vmatprep.subr.bf16.mxu0 %v285_v57  ;;  %v170_v31 = vld [vmem:[#allocation2 + $0x298] sm:$0xff]  ;;  %v315_v57 = vunpack.c.h.s8.bf16 %v150_v54 }
  0xb1   :  { %552 = vmatprep.subr.bf16.mxu1 %v245_v56  ;;  %v355_v59 = vunpack.c.h.s8.bf16 %v170_v31  ;;  %v350_v1 = vunpack.c.l.s8.bf16 %v170_v31  ;;  %v186_v31 = vld [vmem:[#allocation2 + $0x318] sm:$0xff] }
  0xb3   :  { %578 = vmatpush1.bf16.msra.mxu0 %v284_v62  ;;  %v314_v62 = vunpack.c.h.s8.bf16 %v149_v60 }
  0xb4   :  { %553 = vmatpush2.bf16.msra.mxu1 %v244_v61  ;;  %579 = vmatprep.subr.bf16.mxu0 %v280_v0  ;;  %v169_v61 = vld [vmem:[#allocation2 + $0x290] sm:$0xff]  ;;  %v310_v0 = vunpack.c.l.s8.bf16 %v150_v54  ;;  %v271_v54 = vunpack.c.l.s8.bf16 %v131_v50 }
  0xb5   :  { %554 = vmatprep.subr.bf16.mxu1 %v240_v63  ;;  %v354_v63 = vunpack.c.h.s8.bf16 %v169_v61 }
  0xb7   :  { %580 = vmatpush1.bf16.msra.mxu0 %v279_v4  ;;  %v309_v4 = vunpack.c.l.s8.bf16 %v149_v60 }
  0xb8   :  { %555 = vmatpush2.bf16.msra.mxu1 %v239_v3  ;;  %581 = vmatprep.subr.bf16.mxu0 %v275_v6  ;;  %v166_v3 = vld [vmem:[#allocation2 + $0x278] sm:$0xff]  ;;  %v266_v6 = vunpack.c.h.s8.bf16 %v126_v2 }
  0xb9   :  { %556 = vmatprep.subr.bf16.mxu1 %v235_v5  ;;  %v349_v5 = vunpack.c.l.s8.bf16 %v169_v61  ;;  %v346_v7 = vunpack.c.h.s8.bf16 %v166_v3  ;;  %v341_v13 = vunpack.c.l.s8.bf16 %v166_v3 }
  0xbb   :  { %582 = vmatpush1.bf16.msra.mxu0 %v274_v10  ;;  %v226_v10 = vunpack.c.h.s8.bf16 %v106_v8 }
  0xbc   :  { %557 = vmatpush2.bf16.msra.mxu1 %v234_v9  ;;  %583 = vmatprep.subr.bf16.mxu0 %v270_v12  ;;  %v146_v9 = vld [vmem:[#allocation2 + $0x1d8] sm:$0xff]  ;;  %v261_v12 = vunpack.c.l.s8.bf16 %v126_v2 }
  0xbd   :  { %558 = vmatprep.subr.bf16.mxu1 %v230_v11  ;;  %v306_v11 = vunpack.c.h.s8.bf16 %v146_v9 }
  0xbf   :  { %584 = vmatpush1.bf16.msra.mxu0 %v269_v16  ;;  %v221_v16 = vunpack.c.l.s8.bf16 %v106_v8 }
  0xc0   :  { %559 = vmatpush2.bf16.msra.mxu1 %v229_v15  ;;  %585 = vmatprep.subr.bf16.mxu0 %v345_v17  ;;  %v161_v15 = vld [vmem:[#allocation2 + $0x250] sm:$0xff]  ;;  %v301_v17 = vunpack.c.l.s8.bf16 %v146_v9 }
  0xc1   :  { %610 = vmatprep.subr.bf16.mxu1 %v385_v18  ;;  %v256_v18 = vunpack.c.h.s8.bf16 %v121_v14  ;;  %v336_v19 = vunpack.c.h.s8.bf16 %v161_v15  ;;  %v331_v25 = vunpack.c.l.s8.bf16 %v161_v15 }
  0xc3   :  { %561 = vmatmul.mubr.bf16.vlgmr.msra.gmra.mxu1 %v1327_v46  ;;  %586 = vmatpush2.bf16.msra.mxu0 %v344_v21  ;;  %v141_v21 = vld [vmem:[#allocation2 + $0x1b0] sm:$0xff] }
  0xc4   :  { %611 = vmatpush1.bf16.msra.mxu1 %v384_v22  ;;  %587 = vmatprep.subr.bf16.mxu0 %v340_v23  ;;  %v216_v22 = vunpack.c.h.s8.bf16 %v101_v20  ;;  %v296_v23 = vunpack.c.h.s8.bf16 %v141_v21 }
  0xc5   :  { %612 = vmatprep.subr.bf16.mxu1 %v380_v24  ;;  %642 = vmatprep.mubr.bf16.mxu1 %v1252_v58  ;;  %v174_v58 = vld [vmem:[#allocation2 + $0x2b8] sm:$0xff]  ;;  %v251_v24 = vunpack.c.l.s8.bf16 %v121_v14 }
  0xc6   :  { %v364_v52 = vunpack.c.h.s8.bf16 %v174_v58  ;;  %v359_v56 = vunpack.c.l.s8.bf16 %v174_v58 }
  0xc7   :  { %588 = vmatpush2.bf16.msra.mxu0 %v339_v27  ;;  %v156_v27 = vld [vmem:[#allocation2 + $0x228] sm:$0xff] }
  0xc8   :  { %613 = vmatpush1.bf16.msra.mxu1 %v379_v28  ;;  %589 = vmatprep.subr.bf16.mxu0 %v335_v29  ;;  %v211_v28 = vunpack.c.l.s8.bf16 %v101_v20  ;;  %v291_v29 = vunpack.c.l.s8.bf16 %v141_v21 }
  0xc9   :  { %614 = vmatprep.subr.bf16.mxu1 %v375_v32  ;;  %v246_v32 = vunpack.c.h.s8.bf16 %v116_v26 }
  0xcb   :  { %590 = vmatpush2.bf16.msra.mxu0 %v334_v38 }
  0xcc   :  { %615 = vmatpush1.bf16.msra.mxu1 %v374_v39  ;;  %591 = vmatprep.subr.bf16.mxu0 %v330_v40  ;;  %v241_v39 = vunpack.c.l.s8.bf16 %v116_v26  ;;  %v321_v40 = vunpack.c.l.s8.bf16 %v156_v27 }
  0xcd   :  { %616 = vmatprep.subr.bf16.mxu1 %v370_v41  ;;  %v111_v41 = vld [vmem:[#allocation2 + $0xc0] sm:$0xff] }
  0xcf   :  { %592 = vmatpush2.bf16.msra.mxu0 %v329_v44 }
  0xd0   :  { %617 = vmatpush1.bf16.msra.mxu1 %v369_v45  ;;  %593 = vmatprep.subr.bf16.mxu0 %v325_v48  ;;  %v236_v45 = vunpack.c.h.s8.bf16 %v111_v41  ;;  %v316_v48 = vunpack.c.h.s8.bf16 %v151_v42 }
  0xd1   :  { %618 = vmatprep.subr.bf16.mxu1 %v365_v49  ;;  %v91_v49 = vld [vmem:[#allocation2 + $0x20] sm:$0xff] }
  0xd2   :  { %v196_v58 = vunpack.c.h.s8.bf16 %v91_v49 }
  0xd3   :  { %594 = vmatpush2.bf16.msra.mxu0 %v324_v51  ;;  %v276_v51 = vunpack.c.h.s8.bf16 %v131_v50 }
  0xd4   :  { %619 = vmatpush1.bf16.msra.mxu1 %v364_v52  ;;  %595 = vmatprep.subr.bf16.mxu0 %v320_v53  ;;  %v231_v52 = vunpack.c.l.s8.bf16 %v111_v41  ;;  %v311_v53 = vunpack.c.l.s8.bf16 %v151_v42 }
  0xd5   :  { %620 = vmatprep.subr.bf16.mxu1 %v360_v30  ;;  %v191_v30 = vunpack.c.l.s8.bf16 %v91_v49 }
  0xd7   :  { %596 = vmatpush2.bf16.msra.mxu0 %v319_v55  ;;  %v386_v55 = vunpack.c.h.s8.bf16 %v186_v31 }
  0xd8   :  { %621 = vmatpush1.bf16.msra.mxu1 %v359_v56  ;;  %597 = vmatprep.subr.bf16.mxu0 %v315_v57  ;;  %v1253_v56 = vmov 0.0   ;;  %v381_v57 = vunpack.c.l.s8.bf16 %v186_v31 }
  0xd9   :  { %622 = vmatprep.subr.bf16.mxu1 %v355_v59  ;;  %v181_v59 = vld [vmem:[#allocation2 + $0x2f0] sm:$0xff] }
  0xda   :  { %v376_v60 = vunpack.c.h.s8.bf16 %v181_v59  ;;  %v371_v61 = vunpack.c.l.s8.bf16 %v181_v59 }
  0xdb   :  { %598 = vmatpush2.bf16.msra.mxu0 %v314_v62  ;;  %v176_v62 = vld [vmem:[#allocation2 + $0x2c8] sm:$0xff] }
  0xdc   :  { %623 = vmatpush1.bf16.msra.mxu1 %v354_v63  ;;  %599 = vmatprep.subr.bf16.mxu0 %v310_v0  ;;  %v366_v63 = vunpack.c.h.s8.bf16 %v176_v62 }
  0xdd   :  { %624 = vmatprep.subr.bf16.mxu1 %v350_v1 }
  0xdf   :  { %600 = vmatpush2.bf16.msra.mxu0 %v309_v4 }
  0xe0   :  { %625 = vmatpush1.bf16.msra.mxu1 %v349_v5  ;;  %1041 = vmatprep.subr.bf16.mxu0 %v266_v6 }
  0xe1   :  { %1063 = vmatprep.subr.bf16.mxu1 %v346_v7 }
  0xe2   :  { %602 = vmatmul.mubr.bf16.vlgmr.msra.gmra.mxu0 %v1331_v47 }
  0xe3   :  { %643 = vmatmul.mubr.bf16.vlgmr.msra.gmra.mxu1 %v1340_v33  ;;  %1042 = vmatpush3.bf16.msra.mxu0 %v226_v10  ;;  %v773_v10 = vlaneseq }
  0xe4   :  { %1064 = vmatpush3.bf16.msra.mxu1 %v306_v11  ;;  %1043 = vmatprep.subr.bf16.mxu0 %v261_v12 }
  0xe5   :  { %1065 = vmatprep.subr.bf16.mxu1 %v341_v13  ;;  %683 = vmatprep.mubr.bf16.mxu0 %v1317_v36  ;;  %v326_v36 = vunpack.c.h.s8.bf16 %v156_v27  ;;  %v1353_v11 = vshrl.u32 %v773_v10, 7  ;;  %v1358_v13 = vld [vmem:[#allocation4] sm:$0x1f] }
  0xe6   :  { %723 = vmatprep.mubr.bf16.mxu1 %v1321_v37  ;;  %v136_v37 = vld [vmem:[#allocation2 + $0x188] sm:$0xff] }
  0xe7   :  { %1044 = vmatpush3.bf16.msra.mxu0 %v221_v16  ;;  %v286_v38 = vunpack.c.h.s8.bf16 %v136_v37  ;;  %v281_v44 = vunpack.c.l.s8.bf16 %v136_v37  ;;  %v1356_v12 = vsub.s32 0, %v1353_v11  ;;  %v1361_v14 = vsub.s32 1, %v1353_v11 }
  0xe8   :  { %1066 = vmatpush3.bf16.msra.mxu1 %v301_v17  ;;  %1045 = vmatprep.subr.bf16.mxu0 %v256_v18 }
  0xe9   :  { %1067 = vmatprep.subr.bf16.mxu1 %v336_v19  ;;  %v776_v16 = vrot.slane %v1358_v13, %v1356_v12  ;;  %v780_v21 = vrot.slane %v1358_v13, %v1361_v14 }
  0xeb   :  { %1046 = vmatpush3.bf16.msra.mxu0 %v216_v22 }
  0xec   :  { %1068 = vmatpush3.bf16.msra.mxu1 %v296_v23  ;;  %1047 = vmatprep.subr.bf16.mxu0 %v251_v24 }
  0xed   :  { %1069 = vmatprep.subr.bf16.mxu1 %v331_v25 }
  0xef   :  { %1048 = vmatpush3.bf16.msra.mxu0 %v211_v28 }
  0xf0   :  { %1070 = vmatpush3.bf16.msra.mxu1 %v291_v29  ;;  %1049 = vmatprep.subr.bf16.mxu0 %v246_v32 }
  0xf1   :  { %1071 = vmatprep.subr.bf16.mxu1 %v326_v36 }
  0xf3   :  { %1050 = vmatpush3.bf16.msra.mxu0 %v206_v35 }
  0xf4   :  { %1072 = vmatpush3.bf16.msra.mxu1 %v286_v38  ;;  %1051 = vmatprep.subr.bf16.mxu0 %v241_v39 }
  0xf5   :  { %1073 = vmatprep.subr.bf16.mxu1 %v321_v40 }
  0xf7   :  { %1052 = vmatpush3.bf16.msra.mxu0 %v201_v43 }
  0xf8   :  { %1074 = vmatpush3.bf16.msra.mxu1 %v281_v44  ;;  %1053 = vmatprep.subr.bf16.mxu0 %v236_v45 }
  0xf9   :  { %1075 = vmatprep.subr.bf16.mxu1 %v316_v48 }
  0xfb   :  { %1054 = vmatpush3.bf16.msra.mxu0 %v196_v58 }
  0xfc   :  { %1076 = vmatpush3.bf16.msra.mxu1 %v276_v51  ;;  %1055 = vmatprep.subr.bf16.mxu0 %v231_v52 }
  0xfd   :  { %1077 = vmatprep.subr.bf16.mxu1 %v311_v53 }
  0xff   :  { %1056 = vmatpush3.bf16.msra.mxu0 %v191_v30 }
 0x100   :  { %1078 = vmatpush3.bf16.msra.mxu1 %v271_v54  ;;  %1094 = vmatprep.subr.bf16.mxu0 %v1253_v56 }
 0x102   :  { %684 = vmatmul.mubr.bf16.vlgmr.msra.gmra.mxu0 %v1327_v46  ;;  %v361_v46 = vunpack.c.l.s8.bf16 %v176_v62 }
 0x103   :  { %724 = vmatmul.mubr.bf16.vlgmr.msra.gmra.mxu1 %v1331_v47  ;;  %1095 = vmatpush3.bf16.msra.mxu0 %v386_v55  ;;  %v171_v47 = vld [vmem:[#allocation2 + $0x2a0] sm:$0xff] }
 0x104   :  { %1110 = vmatprep.mubr.msk.bf16.mxu0 %vm1254_vm0, %v1253_v56  ;;  %1096 = vmatprep.subr.bf16.mxu0 %v1253_v56  ;;  %v356_v0 = vunpack.c.h.s8.bf16 %v171_v47  ;;  %v351_v1 = vunpack.c.l.s8.bf16 %v171_v47 }
 0x107   :  { %1097 = vmatpush3.bf16.msra.mxu0 %v381_v57 }
 0x108   :  { %1098 = vmatprep.subr.bf16.mxu0 %v1253_v56 }
 0x10b   :  { %1099 = vmatpush3.bf16.msra.mxu0 %v376_v60 }
 0x10c   :  { %1100 = vmatprep.subr.bf16.mxu0 %v1253_v56 }
 0x10f   :  { %1101 = vmatpush3.bf16.msra.mxu0 %v371_v61 }
 0x110   :  { %1102 = vmatprep.subr.bf16.mxu0 %v1253_v56 }
 0x113   :  { %1103 = vmatpush3.bf16.msra.mxu0 %v366_v63 }
 0x114   :  { %1104 = vmatprep.subr.bf16.mxu0 %v1253_v56 }
 0x117   :  { %1105 = vmatpush3.bf16.msra.mxu0 %v361_v46 }
 0x118   :  { %1106 = vmatprep.subr.bf16.mxu0 %v1253_v56 }
 0x11b   :  { %1107 = vmatpush3.bf16.msra.mxu0 %v356_v0 }
 0x11c   :  { %1108 = vmatprep.subr.bf16.mxu0 %v1253_v56 }
 0x11f   :  { %1109 = vmatpush3.bf16.msra.mxu0 %v351_v1 }
 0x122   :  { %1111 = vmatmul.mubr.bf16.vlgmr.msra.gmra.mxu0 %v1340_v33  ;;  %v1363_v33 = vld [vmem:[#allocation6] sm:$0x1f] }
 0x123   :  { %v808_v20 = vrot.slane %v1363_v33, %v1356_v12  ;;  %v812_v25 = vrot.slane %v1363_v33, %v1361_v14 }
 0x142   :  { %v439_v2 = vpop.f32.mrf.mxu0 }
 0x143   :  { %v480_v3 = vpop.f32.mrf.mxu1 }
 0x144   :  { %v441_v4 = vpop.f32.mrf.mxu0  ;;  %v481_v15 = vadd.f32 %v480_v3, %v439_v2 }
 0x145   :  { %v482_v5 = vpop.f32.mrf.mxu1 }
 0x146   :  { %v443_v6 = vpop.f32.mrf.mxu0  ;;  %v483_v18 = vadd.f32 %v482_v5, %v441_v4 }
 0x147   :  { %v484_v7 = vpop.f32.mrf.mxu1  ;;  %v1373_v6 = vld [vmem:[#allocation7] sm:$0x1f] }
 0x148   :  { %v444_v8 = vpop.f32.mrf.mxu0  ;;  %v1375_v7 = vld [vmem:[#allocation9] sm:$0x1f] }
 0x149   :  { %v485_v9 = vpop.f32.mrf.mxu1  ;;  %v935_v8 = vrot.slane %v1373_v6, %v1356_v12 }
 0x162   :  { %v521_v17 = vpop.f32.mrf.mxu0 }
 0x163   :  { %v522_v19 = vadd.f32 %v521_v17, %v481_v15  ;;  %v967_v15 = vrot.slane %v1375_v7, %v1356_v12 }
 0x164   :  { %v523_v22 = vpop.f32.mrf.mxu0 }
 0x165   :  { %v798_v23 = vmul.f32 %v776_v16, %v522_v19  ;;  %v524_v24 = vadd.f32 %v523_v22, %v483_v18  ;;  %v939_v16 = vrot.slane %v1373_v6, %v1361_v14 }
 0x166   :  { %v525_v26 = vpop.f32.mrf.mxu0 }
 0x167   :  { %v830_v27 = vadd.f32 %v808_v20, %v798_v23  ;;  %v799_v28 = vmul.f32 %v780_v21, %v524_v24  ;;  %v971_v20 = vrot.slane %v1375_v7, %v1361_v14  ;;  %v1386_v24 = vsub.s32 2, %v1353_v11 }
 0x168   :  { %v526_v29 = vpop.f32.mrf.mxu0 }
 0x169   :  { %v835_v32 = vrot.slane %v830_v27, 4  ;;  %v831_v36 = vadd.f32 %v812_v25, %v799_v28 }
 0x16b   :  { %v836_v34 = vadd.f32 %v835_v32, %v830_v27  ;;  %v841_v37 = vrot.slane %v831_v36, 4 }
 0x16d   :  { %v837_v35 = vrot.slane %v836_v34, 2  ;;  %v842_v38 = vadd.f32 %v841_v37, %v831_v36 }
 0x16f   :  { %v838_v39 = vadd.f32 %v837_v35, %v836_v34  ;;  %v843_v40 = vrot.slane %v842_v38, 2 }
 0x171   :  { %v839_v41 = vrot.slane %v838_v39, 1  ;;  %v844_v42 = vadd.f32 %v843_v40, %v842_v38  ;;  %v816_v38 = vrot.slane %v1363_v33, %v1386_v24 }
 0x173   :  { %v840_v43 = vadd.f32 %v839_v41, %v838_v39  ;;  %v845_v44 = vrot.slane %v844_v42, 1 }
 0x175   :  { %v865_v45 = vmul.f32 0.125, %v840_v43  ;;  %v846_v48 = vadd.f32 %v845_v44, %v844_v42 }
 0x177   :  { %v870_v49 = vsub.f32 %v830_v27, %v865_v45  ;;  %v866_v50 = vmul.f32 0.125, %v846_v48  ;;  %v1389_v27 = vsub.s32 3, %v1353_v11 }
 0x179   :  { %v875_v58 = vmul.f32 %v870_v49, %v870_v49  ;;  %v871_v51 = vsub.f32 %v831_v36, %v866_v50  ;;  %v784_v36 = vrot.slane %v1358_v13, %v1386_v24  ;;  %v788_v39 = vrot.slane %v1358_v13, %v1389_v27 }
 0x17a   :  { %v820_v44 = vrot.slane %v1363_v33, %v1389_v27 }
 0x17b   :  { %v880_v52 = vrot.slane %v875_v58, 4  ;;  %v876_v53 = vmul.f32 %v871_v51, %v871_v51 }
 0x17d   :  { %v881_v30 = vadd.f32 %v880_v52, %v875_v58  ;;  %v886_v54 = vrot.slane %v876_v53, 4 }
 0x17f   :  { %v882_v31 = vrot.slane %v881_v30, 2  ;;  %v887_v55 = vadd.f32 %v886_v54, %v876_v53 }
 0x181   :  { %v883_v56 = vadd.f32 %v882_v31, %v881_v30  ;;  %v888_v57 = vrot.slane %v887_v55, 2 }
 0x183   :  { %v562_v59 = vpop.f32.mrf.mxu1  ;;  %v884_v60 = vrot.slane %v883_v56, 1  ;;  %v889_v61 = vadd.f32 %v888_v57, %v887_v55 }
 0x185   :  { %v564_v62 = vpop.f32.mrf.mxu1  ;;  %v885_v63 = vadd.f32 %v884_v60, %v883_v56  ;;  %v890_v46 = vrot.slane %v889_v61, 1 }
 0x187   :  { %v566_v47 = vpop.f32.mrf.mxu1  ;;  %v910_v0 = vmul.f32 0.125, %v885_v63  ;;  %v891_v1 = vadd.f32 %v890_v46, %v889_v61 }
 0x189   :  { %v567_v2 = vpop.f32.mrf.mxu1  ;;  %v915_v3 = vadd.f32 1e-05, %v910_v0  ;;  %v911_v4 = vmul.f32 0.125, %v891_v1 }
 0x18b   :  { %1129 = vrsqrt.f32 %v915_v3  ;;  %v916_v5 = vadd.f32 1e-05, %v911_v4 }
 0x18d   :  { %1131 = vrsqrt.f32 %v916_v5 }
 0x198   :  { %v1130_v9 = vpop.eup %1129 }
 0x199   :  { %v925_v10 = vmul.f32 %v1130_v9, %v870_v49 }
 0x19a   :  { %v1132_v17 = vpop.eup %1131 }
 0x19b   :  { %v957_v18 = vmul.f32 %v935_v8, %v925_v10  ;;  %v926_v19 = vmul.f32 %v1132_v17, %v871_v51 }
 0x19d   :  { %v989_v21 = vadd.f32 %v967_v15, %v957_v18  ;;  %v958_v22 = vmul.f32 %v939_v16, %v926_v19 }
 0x19f   :  { %v990_v23 = vadd.f32 %v971_v20, %v958_v22  ;;  %v994_v25 = vmax.f32 %v989_v21, 0.0 }
 0x1a1   :  { %v995_v26 = vmax.f32 %v990_v23, 0.0 }
 0x1a2   :  { %v603_v12 = vpop.f32.mrf.mxu0 }
 0x1a3   :  { %v644_v28 = vpop.f32.mrf.mxu1  ;;  %v1038_v29 = vpack.c.bf16 %v995_v26, %v994_v25  ;;  %v604_v32 = vadd.f32 %v603_v12, %v562_v59 }
 0x1a4   :  { %v605_v34 = vpop.f32.mrf.mxu0 }
 0x1a5   :  { %v646_v14 = vpop.f32.mrf.mxu1  ;;  %1020 = vst [vmem:[%s1427_s6] sm:$0xff] %v1038_v29  ;;  %v606_v37 = vadd.f32 %v605_v34, %v564_v62  ;;  %v645_v35 = vadd.f32 %v644_v28, %v604_v32 }
 0x1a6   :  { %v607_v40 = vpop.f32.mrf.mxu0 }
 0x1a7   :  { %v648_v41 = vpop.f32.mrf.mxu1  ;;  %v800_v42 = vmul.f32 %v784_v36, %v645_v35  ;;  %v647_v43 = vadd.f32 %v646_v14, %v606_v37  ;;  %v943_v14 = vrot.slane %v1373_v6, %v1386_v24 }
 0x1a8   :  { %v608_v45 = vpop.f32.mrf.mxu0  ;;  %v979_v41 = vrot.slane %v1375_v7, %v1389_v27 }
 0x1a9   :  { %v649_v48 = vpop.f32.mrf.mxu1  ;;  %v832_v49 = vadd.f32 %v816_v38, %v800_v42  ;;  %v801_v50 = vmul.f32 %v788_v39, %v647_v43  ;;  %v975_v38 = vrot.slane %v1375_v7, %v1386_v24  ;;  %v947_v39 = vrot.slane %v1373_v6, %v1389_v27 }
 0x1aa   :  { %v791_v42 = vsub.s32 4, %v1353_v11 }
 0x1ab   :  { %v847_v58 = vrot.slane %v832_v49, 4  ;;  %v833_v51 = vadd.f32 %v820_v44, %v801_v50 }
 0x1ad   :  { %v848_v52 = vadd.f32 %v847_v58, %v832_v49  ;;  %v853_v53 = vrot.slane %v833_v51, 4 }
 0x1af   :  { %v849_v30 = vrot.slane %v848_v52, 2  ;;  %v854_v54 = vadd.f32 %v853_v53, %v833_v51 }
 0x1b1   :  { %v850_v31 = vadd.f32 %v849_v30, %v848_v52  ;;  %v855_v55 = vrot.slane %v854_v54, 2  ;;  %v792_v52 = vrot.slane %v1358_v13, %v791_v42 }
 0x1b3   :  { %v851_v56 = vrot.slane %v850_v31, 1  ;;  %v856_v57 = vadd.f32 %v855_v55, %v854_v54 }
 0x1b5   :  { %v852_v59 = vadd.f32 %v851_v56, %v850_v31  ;;  %v857_v60 = vrot.slane %v856_v57, 1  ;;  %v824_v31 = vrot.slane %v1363_v33, %v791_v42 }
 0x1b7   :  { %v867_v61 = vmul.f32 0.125, %v852_v59  ;;  %v858_v62 = vadd.f32 %v857_v60, %v856_v57 }
 0x1b9   :  { %v872_v63 = vsub.f32 %v832_v49, %v867_v61  ;;  %v868_v46 = vmul.f32 0.125, %v858_v62 }
 0x1bb   :  { %v877_v47 = vmul.f32 %v872_v63, %v872_v63  ;;  %v873_v0 = vsub.f32 %v833_v51, %v868_v46 }
 0x1bd   :  { %v892_v1 = vrot.slane %v877_v47, 4  ;;  %v878_v2 = vmul.f32 %v873_v0, %v873_v0 }
 0x1bf   :  { %v893_v3 = vadd.f32 %v892_v1, %v877_v47  ;;  %v898_v4 = vrot.slane %v878_v2, 4 }
 0x1c1   :  { %v894_v5 = vrot.slane %v893_v3, 2  ;;  %v899_v8 = vadd.f32 %v898_v4, %v878_v2 }
 0x1c2   :  { %v1057_v9 = vpop.f32.mrf.mxu0 }
 0x1c3   :  { %v1079_v10 = vpop.f32.mrf.mxu1  ;;  %v895_v15 = vadd.f32 %v894_v5, %v893_v3  ;;  %v900_v16 = vrot.slane %v899_v8, 2 }
 0x1c4   :  { %v1058_v17 = vpop.f32.mrf.mxu0 }
 0x1c5   :  { %v1080_v18 = vpop.f32.mrf.mxu1  ;;  %v896_v19 = vrot.slane %v895_v15, 1  ;;  %v901_v20 = vadd.f32 %v900_v16, %v899_v8  ;;  %v1059_v45 = vadd.f32 %v1058_v17, %v1057_v9 }
 0x1c6   :  { %v1060_v21 = vpop.f32.mrf.mxu0  ;;  %v1081_v48 = vadd.f32 %v1080_v18, %v1079_v10  ;;  %v983_v18 = vrot.slane %v1375_v7, %v791_v42 }
 0x1c7   :  { %v1082_v22 = vpop.f32.mrf.mxu1  ;;  %v897_v23 = vadd.f32 %v896_v19, %v895_v15  ;;  %v902_v25 = vrot.slane %v901_v20, 1  ;;  %v951_v15 = vrot.slane %v1373_v6, %v791_v42 }
 0x1c8   :  { %v1061_v26 = vpop.f32.mrf.mxu0  ;;  %v726_v51 = vadd.f32 %v1081_v48, %v1059_v45 }
 0x1c9   :  { %v1083_v12 = vpop.f32.mrf.mxu1  ;;  %v912_v28 = vmul.f32 0.125, %v897_v23  ;;  %v903_v29 = vadd.f32 %v902_v25, %v901_v20 }
 0x1cb   :  { %v917_v32 = vadd.f32 1e-05, %v912_v28  ;;  %v913_v36 = vmul.f32 0.125, %v903_v29 }
 0x1cd   :  { %1133 = vrsqrt.f32 %v917_v32  ;;  %v918_v34 = vadd.f32 1e-05, %v913_v36 }
 0x1cf   :  { %1135 = vrsqrt.f32 %v918_v34 }
 0x1da   :  { %v1134_v37 = vpop.eup %1133 }
 0x1db   :  { %v927_v35 = vmul.f32 %v1134_v37, %v872_v63 }
 0x1dc   :  { %v1136_v40 = vpop.eup %1135 }
 0x1dd   :  { %v959_v43 = vmul.f32 %v943_v14, %v927_v35  ;;  %v928_v44 = vmul.f32 %v1136_v40, %v873_v0 }
 0x1df   :  { %v991_v49 = vadd.f32 %v975_v38, %v959_v43  ;;  %v960_v50 = vmul.f32 %v947_v39, %v928_v44 }
 0x1e1   :  { %v992_v58 = vadd.f32 %v979_v41, %v960_v50  ;;  %v996_v53 = vmax.f32 %v991_v49, 0.0 }
 0x1e2   :  { %v765_v24 = vpop.f32.mrf.mxu0 }
 0x1e3   :  { %v997_v30 = vmax.f32 %v992_v58, 0.0  ;;  %v766_v54 = vadd.f32 %v765_v24, %v726_v51 }
 0x1e4   :  { %v1112_v55 = vpop.f32.mrf.mxu0 }
 0x1e5   :  { %v1039_v27 = vpack.c.bf16 %v997_v30, %v996_v53  ;;  %v802_v56 = vmul.f32 %v792_v52, %v766_v54 }
 0x1e6   :  { %v768_v11 = vpop.f32.mrf.mxu0 }
 0x1e7   :  { %1021 = vst [vmem:[%s1427_s6 + $0x8] sm:$0xff] %v1039_v27  ;;  %v834_v57 = vadd.f32 %v824_v31, %v802_v56 }
 0x1e8   :  { %v1113_v59 = vpop.f32.mrf.mxu0 }
 0x1e9   :  { %v859_v60 = vrot.slane %v834_v57, 4 }
 0x1eb   :  { %v860_v61 = vadd.f32 %v859_v60, %v834_v57 }
 0x1ed   :  { %v861_v62 = vrot.slane %v860_v61, 2 }
 0x1ef   :  { %v862_v13 = vadd.f32 %v861_v62, %v860_v61 }
 0x1f1   :  { %v863_v63 = vrot.slane %v862_v13, 1 }
 0x1f3   :  { %v864_v46 = vadd.f32 %v863_v63, %v862_v13 }
 0x1f5   :  { %v869_v47 = vmul.f32 0.125, %v864_v46 }
 0x1f7   :  { %v874_v0 = vsub.f32 %v834_v57, %v869_v47 }
 0x1f9   :  { %v879_v1 = vmul.f32 %v874_v0, %v874_v0 }
 0x1fb   :  { %v904_v33 = vrot.slane %v879_v1, 4 }
 0x1fd   :  { %v905_v2 = vadd.f32 %v904_v33, %v879_v1 }
 0x1ff   :  { %v906_v3 = vrot.slane %v905_v2, 2 }
 0x201   :  { %v907_v4 = vadd.f32 %v906_v3, %v905_v2 }
 0x203   :  { %v908_v5 = vrot.slane %v907_v4, 1 }
 0x205   :  { %v909_v8 = vadd.f32 %v908_v5, %v907_v4 }
 0x207   :  { %v914_v9 = vmul.f32 0.125, %v909_v8 }
 0x209   :  { %v919_v10 = vadd.f32 1e-05, %v914_v9 }
 0x20b   :  { %1137 = vrsqrt.f32 %v919_v10 }
 0x218   :  { %v1138_v16 = vpop.eup %1137 }
 0x219   :  { %v929_v17 = vmul.f32 %v1138_v16, %v874_v0 }
 0x21b   :  { %v961_v19 = vmul.f32 %v951_v15, %v929_v17 }
 0x21d   :  { %v993_v20 = vadd.f32 %v983_v18, %v961_v19 }
 0x21f   :  { %v998_v21 = vmax.f32 %v993_v20, 0.0 }
 0x221   :  { %v1040_v22 = vpack.c.bf16 %v998_v21, %v998_v21 }
 0x223   :  { %1022 = vst [vmem:[%s1427_s6 + $0x10] sm:$0xf] %v1040_v22 }
 0x224   :  { %1027 = vsyncpa [#allocation3], 1 }
 0x225   :  { %1028 = vsyncpa [#allocation5], 1 }
 0x226   :  { %1029 = vsyncpa [#allocation8], 1 }

// kernel: multi_proxy_forward.5
= control target key start
LH: loop header
LB: loop body
LE: loop exit
PB: predicated region body
PF: predicated region fallthrough
CT: control target
= control target key end

     0   :  { %11 = vsyncpa [#allocation3], 0  ;;  %s1388_s0 = inlined_call_operand.vmem [shape: bf16[8,640], index: 0, kind: input, shape index: {}]   ;;  %s1389_s1 = inlined_call_operand.hbm [shape: s8[1,640,640], index: 1, kind: input, shape index: {}]   ;;  %s1390_s2 = inlined_call_operand.vmem [shape: f32[1,640], index: 2, kind: input, shape index: {}]   ;;  %s1391_s3 = inlined_call_operand.hbm [shape: f32[1,640], index: 3, kind: input, shape index: {}]   ;;  %s1392_s4 = inlined_call_operand.hbm [shape: f32[1,640], index: 4, kind: input, shape index: {}]   ;;  %s1393_s5 = inlined_call_operand.hbm [shape: f32[1,640], index: 5, kind: input, shape index: {}]   ;;  %s1394_s6 = inlined_call_operand.vmem [shape: bf16[8,640], index: 6, kind: output, shape index: {}]  }
   0x1   :  { %12 = vsyncpa [#allocation5], 0 }
   0x2   :  { %13 = vsyncpa [#allocation8], 0  ;;  %s1213_s21 = smov [#allocation4]   ;;  %s1214_s23 = smov [#allocation2]  }
   0x3   :  { %s36_s22 = sshll.u32 %s1213_s21, 4  ;;  %s21_s24 = sshll.u32 %s1214_s23, 4  ;;  %s37_s22 = int_to_ptr.vmem [resolvable:$true] %s36_s22  ;;  %s22_s24 = int_to_ptr.vmem [resolvable:$true] %s21_s24 }
   0x4   :  { %s1135_s25 = scalar_lea.vmem %s37_s22, 80  ;;  %s1139_s26 = scalar_lea.vmem %s37_s22, 96 }
   0x5   :  { %p1136_p0 = scmp.ne.s32.totalorder %s37_s22, %s1135_s25  ;;  %p1140_p1 = scmp.lt.s32.totalorder %s37_s22, %s37_s22 }
   0x6   :  { %p1141_p2 = scmp.lt.s32.totalorder %s1139_s26, %s1135_s25 }
   0x8   :  { %p1142_p3 = por %p1141_p2, %p1140_p1 }
   0xa   :  { %p1143_p4 = pnand %p1142_p3, %p1136_p0 }
   0xc   :  { %1146 = shalt.err (!%p1143_p4)
}
   0xd   :  { %39 = dma.hbm_to_vmem [thread:$0]  %s1391_s3, 80, %s37_s22, [#allocation5]  }
   0xe   :  { %s1155_s29 = scalar_lea.vmem %s22_s24, 12800  ;;  %p1160_p6 = scmp.lt.s32.totalorder %s22_s24, %s22_s24 }
   0xf   :  { %p1156_p5 = scmp.ne.s32.totalorder %s22_s24, %s1155_s29  ;;  %p1161_p7 = scmp.lt.s32.totalorder %s1155_s29, %s1155_s29 }
  0x11   :  { %p1162_p8 = por %p1161_p7, %p1160_p6 }
  0x13   :  { %p1163_p9 = pnand %p1162_p8, %p1156_p5 }
  0x15   :  { %1166 = shalt.err (!%p1163_p9)
}
  0x16   :  { %s1215_s30 = smov 640   ;;  %s1216_s7 = smov 40  }
  0x17   :  { %27 = dma.hbm_to_vmem [thread:$0]  %s1389_s1, 12800, %s22_s24, [#allocation3], %s1215_s30, %s1215_s30, %s1216_s7  }
  0x18   :  { %s1217_s10 = smov [#allocation6]   ;;  %s1218_s12 = smov [#allocation7]  }
  0x19   :  { %s46_s11 = sshll.u32 %s1217_s10, 4  ;;  %s56_s13 = sshll.u32 %s1218_s12, 4  ;;  %s47_s11 = int_to_ptr.vmem [resolvable:$true] %s46_s11  ;;  %s57_s13 = int_to_ptr.vmem [resolvable:$true] %s56_s13 }
  0x1a   :  { %s1175_s3 = scalar_lea.vmem %s47_s11, 80  ;;  %s1179_s14 = scalar_lea.vmem %s47_s11, 96 }
  0x1b   :  { %p1176_p10 = scmp.ne.s32.totalorder %s47_s11, %s1175_s3  ;;  %p1180_p11 = scmp.lt.s32.totalorder %s47_s11, %s47_s11 }
  0x1c   :  { %p1181_p12 = scmp.lt.s32.totalorder %s1179_s14, %s1175_s3 }
  0x1e   :  { %p1182_p13 = por %p1181_p12, %p1180_p11 }
  0x20   :  { %p1183_p0 = pnand %p1182_p13, %p1176_p10 }
  0x22   :  { %1186 = shalt.err (!%p1183_p0)
}
  0x23   :  { %49 = dma.hbm_to_vmem [thread:$0]  %s1392_s4, 80, %s47_s11, [#allocation5]  }
  0x24   :  { %s1195_s17 = scalar_lea.vmem %s57_s13, 80  ;;  %s1199_s1 = scalar_lea.vmem %s57_s13, 96 }
  0x25   :  { %p1196_p1 = scmp.ne.s32.totalorder %s57_s13, %s1195_s17  ;;  %p1200_p2 = scmp.lt.s32.totalorder %s57_s13, %s57_s13 }
  0x26   :  { %p1201_p3 = scmp.lt.s32.totalorder %s1199_s1, %s1195_s17 }
  0x28   :  { %p1202_p4 = por %p1201_p3, %p1200_p2 }
  0x2a   :  { %p1203_p5 = pnand %p1202_p4, %p1196_p1 }
  0x2c   :  { %1206 = shalt.err (!%p1203_p5)
}
  0x2d   :  { %59 = dma.hbm_to_vmem [thread:$0]  %s1393_s5, 80, %s57_s13, [#allocation8]  }
  0x2e   :  { %1207 = dma.done.wait [#allocation3], 12800  }
  0x2f   :  { %1208 = vsyncadd [#allocation3], 4294954496 }
  0x30   :  { %1209 = dma.done.wait [#allocation5], 160  }
  0x31   :  { %1210 = vsyncadd [#allocation5], 4294967136 }
  0x32   :  { %1211 = dma.done.wait [#allocation8], 80  }
  0x33   :  { %1212 = vsyncadd [#allocation8], 4294967216  ;;  %v92_v0 = vld [vmem:[#allocation2 + $0x80] sm:$0xff]  ;;  %v91_v2 = vld [vmem:[#allocation2 + $0x78] sm:$0xff]  ;;  %vm1221_vm0 = vmmov 0  }
  0x34   :  { %v132_v1 = vld [vmem:[#allocation2 + $0x1c0] sm:$0xff]  ;;  %v207_v3 = vunpack.c.l.s8.bf16 %v92_v0  ;;  %v212_v4 = vunpack.c.h.s8.bf16 %v92_v0  ;;  %v131_v7 = vld [vmem:[#allocation2 + $0x1b8] sm:$0xff]  ;;  %v211_v8 = vunpack.c.h.s8.bf16 %v91_v2  ;;  %v206_v12 = vunpack.c.l.s8.bf16 %v91_v2  ;;  %v86_v16 = vld [vmem:[#allocation2 + $0x50] sm:$0xff] }
  0x35   :  { %v287_v5 = vunpack.c.l.s8.bf16 %v132_v1  ;;  %v292_v6 = vunpack.c.h.s8.bf16 %v132_v1  ;;  %v291_v9 = vunpack.c.h.s8.bf16 %v131_v7  ;;  %v87_v10 = vld [vmem:[#allocation2 + $0x58] sm:$0xff]  ;;  %v286_v13 = vunpack.c.l.s8.bf16 %v131_v7  ;;  %v126_v17 = vld [vmem:[#allocation2 + $0x190] sm:$0xff]  ;;  %v81_v28 = vld [vmem:[#allocation2 + $0x28] sm:$0xff] }
  0x36   :  { %v127_v11 = vld [vmem:[#allocation2 + $0x198] sm:$0xff]  ;;  %394 = vmatprep.subr.bf16.mxu0 %v212_v4  ;;  %v202_v14 = vunpack.c.h.s8.bf16 %v87_v10  ;;  %v201_v18 = vunpack.c.h.s8.bf16 %v86_v16  ;;  %v281_v19 = vunpack.c.h.s8.bf16 %v126_v17  ;;  %v197_v20 = vunpack.c.l.s8.bf16 %v87_v10  ;;  %v82_v22 = vld [vmem:[#allocation2 + $0x30] sm:$0xff]  ;;  %v121_v29 = vld [vmem:[#allocation2 + $0x168] sm:$0xff] }
  0x37   :  { %435 = vmatprep.subr.bf16.mxu1 %v292_v6  ;;  %395 = vmatpush1.bf16.msra.mxu0 %v211_v8  ;;  %v282_v15 = vunpack.c.h.s8.bf16 %v127_v11  ;;  %v277_v21 = vunpack.c.l.s8.bf16 %v127_v11  ;;  %v122_v23 = vld [vmem:[#allocation2 + $0x170] sm:$0xff]  ;;  %v196_v24 = vunpack.c.l.s8.bf16 %v86_v16  ;;  %v276_v25 = vunpack.c.l.s8.bf16 %v126_v17  ;;  %v1272_v30 = vld [vmem:[%s1388_s0] sm:$0xff]  ;;  %v1277_v31 = vld [vmem:[%s1388_s0 + $0x8] sm:$0xff] }
  0x38   :  { %436 = vmatpush1.bf16.msra.mxu1 %v291_v9  ;;  %396 = vmatprep.subr.bf16.mxu0 %v207_v3  ;;  %v192_v26 = vunpack.c.h.s8.bf16 %v82_v22  ;;  %v272_v27 = vunpack.c.h.s8.bf16 %v122_v23  ;;  %v191_v32 = vunpack.c.h.s8.bf16 %v81_v28  ;;  %v271_v33 = vunpack.c.h.s8.bf16 %v121_v29  ;;  %v77_v38 = vld [vmem:[#allocation2 + $0x8] sm:$0xff]  ;;  %v76_v44 = vld [vmem:[#allocation2] sm:$0xff]  ;;  %v111_v56 = vld [vmem:[#allocation2 + $0x118] sm:$0xff] }
  0x39   :  { %437 = vmatprep.subr.bf16.mxu1 %v287_v5  ;;  %v187_v34 = vunpack.c.l.s8.bf16 %v82_v22  ;;  %v267_v35 = vunpack.c.l.s8.bf16 %v122_v23  ;;  %v1281_v36 = vcombine.high %v1272_v30, %v1272_v30  ;;  %v1285_v37 = vcombine.high %v1277_v31, %v1277_v31  ;;  %v117_v39 = vld [vmem:[#allocation2 + $0x148] sm:$0xff]  ;;  %v116_v45 = vld [vmem:[#allocation2 + $0x140] sm:$0xff]  ;;  %v151_v57 = vld [vmem:[#allocation2 + $0x258] sm:$0xff] }
  0x3a   :  { %v186_v40 = vunpack.c.l.s8.bf16 %v81_v28  ;;  %v266_v41 = vunpack.c.l.s8.bf16 %v121_v29  ;;  %v182_v42 = vunpack.c.h.s8.bf16 %v77_v38  ;;  %v262_v43 = vunpack.c.h.s8.bf16 %v117_v39  ;;  %v112_v50 = vld [vmem:[#allocation2 + $0x120] sm:$0xff]  ;;  %v107_v62 = vld [vmem:[#allocation2 + $0xf8] sm:$0xff]  ;;  %v106_v4 = vld [vmem:[#allocation2 + $0xf0] sm:$0xff] }
  0x3b   :  { %397 = vmatpush1.bf16.msra.mxu0 %v206_v12  ;;  %426 = vmatprep.mubr.bf16.mxu0 %v1281_v36  ;;  %v181_v46 = vunpack.c.h.s8.bf16 %v76_v44  ;;  %v261_v47 = vunpack.c.h.s8.bf16 %v116_v45  ;;  %v177_v48 = vunpack.c.l.s8.bf16 %v77_v38  ;;  %v257_v49 = vunpack.c.l.s8.bf16 %v117_v39  ;;  %v152_v51 = vld [vmem:[#allocation2 + $0x260] sm:$0xff]  ;;  %v147_v63 = vld [vmem:[#allocation2 + $0x238] sm:$0xff]  ;;  %v146_v5 = vld [vmem:[#allocation2 + $0x230] sm:$0xff] }
  0x3c   :  { %438 = vmatpush1.bf16.msra.mxu1 %v286_v13  ;;  %398 = vmatprep.subr.bf16.mxu0 %v202_v14  ;;  %v176_v52 = vunpack.c.l.s8.bf16 %v76_v44  ;;  %v256_v53 = vunpack.c.l.s8.bf16 %v116_v45  ;;  %v252_v54 = vunpack.c.h.s8.bf16 %v112_v50  ;;  %v332_v55 = vunpack.c.h.s8.bf16 %v152_v51  ;;  %v102_v10 = vld [vmem:[#allocation2 + $0xd0] sm:$0xff]  ;;  %v101_v16 = vld [vmem:[#allocation2 + $0xc8] sm:$0xff]  ;;  %v96_v28 = vld [vmem:[#allocation2 + $0xa0] sm:$0xff] }
  0x3d   :  { %439 = vmatprep.subr.bf16.mxu1 %v282_v15  ;;  %467 = vmatprep.mubr.bf16.mxu1 %v1285_v37  ;;  %v251_v58 = vunpack.c.h.s8.bf16 %v111_v56  ;;  %v331_v59 = vunpack.c.h.s8.bf16 %v151_v57  ;;  %v247_v60 = vunpack.c.l.s8.bf16 %v112_v50  ;;  %v327_v61 = vunpack.c.l.s8.bf16 %v152_v51  ;;  %v142_v11 = vld [vmem:[#allocation2 + $0x210] sm:$0xff]  ;;  %v141_v17 = vld [vmem:[#allocation2 + $0x208] sm:$0xff]  ;;  %v136_v29 = vld [vmem:[#allocation2 + $0x1e0] sm:$0xff] }
  0x3e   :  { %v246_v0 = vunpack.c.l.s8.bf16 %v111_v56  ;;  %v326_v1 = vunpack.c.l.s8.bf16 %v151_v57  ;;  %v242_v2 = vunpack.c.h.s8.bf16 %v107_v62  ;;  %v322_v3 = vunpack.c.h.s8.bf16 %v147_v63  ;;  %v97_v22 = vld [vmem:[#allocation2 + $0xa8] sm:$0xff]  ;;  %v172_v38 = vld [vmem:[#allocation2 + $0x300] sm:$0xff]  ;;  %v94_v39 = vld [vmem:[#allocation2 + $0x90] sm:$0xff] }
  0x3f   :  { %399 = vmatpush1.bf16.msra.mxu0 %v201_v18  ;;  %v241_v6 = vunpack.c.h.s8.bf16 %v106_v4  ;;  %v321_v7 = vunpack.c.h.s8.bf16 %v146_v5  ;;  %v237_v8 = vunpack.c.l.s8.bf16 %v107_v62  ;;  %v317_v9 = vunpack.c.l.s8.bf16 %v147_v63  ;;  %v137_v23 = vld [vmem:[#allocation2 + $0x1e8] sm:$0xff]  ;;  %v171_v44 = vld [vmem:[#allocation2 + $0x2f8] sm:$0xff]  ;;  %v166_v56 = vld [vmem:[#allocation2 + $0x2d0] sm:$0xff] }
  0x40   :  { %440 = vmatpush1.bf16.msra.mxu1 %v281_v19  ;;  %400 = vmatprep.subr.bf16.mxu0 %v197_v20  ;;  %v236_v12 = vunpack.c.l.s8.bf16 %v106_v4  ;;  %v316_v13 = vunpack.c.l.s8.bf16 %v146_v5  ;;  %v232_v14 = vunpack.c.h.s8.bf16 %v102_v10  ;;  %v312_v15 = vunpack.c.h.s8.bf16 %v142_v11  ;;  %v93_v45 = vld [vmem:[#allocation2 + $0x88] sm:$0xff]  ;;  %v88_v57 = vld [vmem:[#allocation2 + $0x60] sm:$0xff]  ;;  %v162_v63 = vld [vmem:[#allocation2 + $0x2b0] sm:$0xff] }
  0x41   :  { %441 = vmatprep.subr.bf16.mxu1 %v277_v21  ;;  %v231_v18 = vunpack.c.h.s8.bf16 %v101_v16  ;;  %v311_v19 = vunpack.c.h.s8.bf16 %v141_v17  ;;  %v227_v20 = vunpack.c.l.s8.bf16 %v102_v10  ;;  %v307_v21 = vunpack.c.l.s8.bf16 %v142_v11  ;;  %v161_v5 = vld [vmem:[#allocation2 + $0x2a8] sm:$0xff] }
  0x42   :  { %v367_v50 = vunpack.c.l.s8.bf16 %v172_v38  ;;  %v209_v51 = vunpack.c.l.s8.bf16 %v94_v39  ;;  %v157_v11 = vld [vmem:[#allocation2 + $0x288] sm:$0xff] }
  0x43   :  { %401 = vmatpush1.bf16.msra.mxu0 %v196_v24  ;;  %v226_v24 = vunpack.c.l.s8.bf16 %v101_v16 }
  0x44   :  { %442 = vmatpush1.bf16.msra.mxu1 %v276_v25  ;;  %402 = vmatprep.subr.bf16.mxu0 %v192_v26  ;;  %v306_v25 = vunpack.c.l.s8.bf16 %v141_v17  ;;  %v222_v26 = vunpack.c.h.s8.bf16 %v97_v22  ;;  %v156_v17 = vld [vmem:[#allocation2 + $0x280] sm:$0xff] }
  0x45   :  { %443 = vmatprep.subr.bf16.mxu1 %v272_v27  ;;  %v302_v27 = vunpack.c.h.s8.bf16 %v137_v23 }
  0x47   :  { %403 = vmatpush1.bf16.msra.mxu0 %v191_v32  ;;  %v221_v32 = vunpack.c.h.s8.bf16 %v96_v28 }
  0x48   :  { %444 = vmatpush1.bf16.msra.mxu1 %v271_v33  ;;  %404 = vmatprep.subr.bf16.mxu0 %v187_v34  ;;  %v301_v33 = vunpack.c.h.s8.bf16 %v136_v29  ;;  %v217_v34 = vunpack.c.l.s8.bf16 %v97_v22 }
  0x49   :  { %445 = vmatprep.subr.bf16.mxu1 %v267_v35  ;;  %v297_v35 = vunpack.c.l.s8.bf16 %v137_v23  ;;  %v114_v23 = vld [vmem:[#allocation2 + $0x130] sm:$0xff] }
  0x4b   :  { %405 = vmatpush1.bf16.msra.mxu0 %v186_v40  ;;  %v216_v40 = vunpack.c.l.s8.bf16 %v96_v28 }
  0x4c   :  { %446 = vmatpush1.bf16.msra.mxu1 %v266_v41  ;;  %406 = vmatprep.subr.bf16.mxu0 %v182_v42  ;;  %v296_v41 = vunpack.c.l.s8.bf16 %v136_v29  ;;  %v372_v42 = vunpack.c.h.s8.bf16 %v172_v38  ;;  %v113_v29 = vld [vmem:[#allocation2 + $0x128] sm:$0xff]  ;;  %v249_v38 = vunpack.c.l.s8.bf16 %v114_v23 }
  0x4d   :  { %447 = vmatprep.subr.bf16.mxu1 %v262_v43  ;;  %v214_v43 = vunpack.c.h.s8.bf16 %v94_v39 }
  0x4f   :  { %407 = vmatpush1.bf16.msra.mxu0 %v181_v46  ;;  %v1291_v46 = vcombine.low %v1272_v30, %v1272_v30  ;;  %v366_v30 = vunpack.c.l.s8.bf16 %v171_v44 }
  0x50   :  { %448 = vmatpush1.bf16.msra.mxu1 %v261_v47  ;;  %408 = vmatprep.subr.bf16.mxu0 %v177_v48  ;;  %v1295_v47 = vcombine.low %v1277_v31, %v1277_v31  ;;  %v371_v48 = vunpack.c.h.s8.bf16 %v171_v44 }
  0x51   :  { %449 = vmatprep.subr.bf16.mxu1 %v257_v49  ;;  %v213_v49 = vunpack.c.h.s8.bf16 %v93_v45 }
  0x53   :  { %409 = vmatpush1.bf16.msra.mxu0 %v176_v52  ;;  %v167_v52 = vld [vmem:[#allocation2 + $0x2d8] sm:$0xff] }
  0x54   :  { %450 = vmatpush1.bf16.msra.mxu1 %v256_v53  ;;  %410 = vmatprep.subr.bf16.mxu0 %v252_v54  ;;  %v89_v53 = vld [vmem:[#allocation2 + $0x68] sm:$0xff]  ;;  %v208_v54 = vunpack.c.l.s8.bf16 %v93_v45  ;;  %v362_v31 = vunpack.c.h.s8.bf16 %v167_v52 }
  0x55   :  { %451 = vmatprep.subr.bf16.mxu1 %v332_v55  ;;  %v204_v55 = vunpack.c.h.s8.bf16 %v89_v53  ;;  %v199_v62 = vunpack.c.l.s8.bf16 %v89_v53 }
  0x57   :  { %411 = vmatpush2.bf16.msra.mxu0 %v251_v58  ;;  %v1219_v58 = vmov 0  }
  0x58   :  { %452 = vmatpush2.bf16.msra.mxu1 %v331_v59  ;;  %412 = vmatprep.subr.bf16.mxu0 %v247_v60  ;;  %v361_v59 = vunpack.c.h.s8.bf16 %v166_v56  ;;  %v203_v60 = vunpack.c.h.s8.bf16 %v88_v57 }
  0x59   :  { %453 = vmatprep.subr.bf16.mxu1 %v327_v61  ;;  %v357_v61 = vunpack.c.l.s8.bf16 %v167_v52 }
  0x5b   :  { %413 = vmatpush2.bf16.msra.mxu0 %v246_v0  ;;  %v84_v0 = vld [vmem:[#allocation2 + $0x40] sm:$0xff] }
  0x5c   :  { %454 = vmatpush2.bf16.msra.mxu1 %v326_v1  ;;  %414 = vmatprep.subr.bf16.mxu0 %v242_v2  ;;  %v356_v1 = vunpack.c.l.s8.bf16 %v166_v56  ;;  %v198_v2 = vunpack.c.l.s8.bf16 %v88_v57  ;;  %v194_v4 = vunpack.c.h.s8.bf16 %v84_v0  ;;  %v189_v10 = vunpack.c.l.s8.bf16 %v84_v0 }
  0x5d   :  { %455 = vmatprep.subr.bf16.mxu1 %v322_v3  ;;  %v352_v3 = vunpack.c.h.s8.bf16 %v162_v63 }
  0x5f   :  { %415 = vmatpush2.bf16.msra.mxu0 %v241_v6  ;;  %v83_v6 = vld [vmem:[#allocation2 + $0x38] sm:$0xff] }
  0x60   :  { %456 = vmatpush2.bf16.msra.mxu1 %v321_v7  ;;  %416 = vmatprep.subr.bf16.mxu0 %v237_v8  ;;  %v351_v7 = vunpack.c.h.s8.bf16 %v161_v5  ;;  %v193_v8 = vunpack.c.h.s8.bf16 %v83_v6 }
  0x61   :  { %457 = vmatprep.subr.bf16.mxu1 %v317_v9  ;;  %v347_v9 = vunpack.c.l.s8.bf16 %v162_v63 }
  0x63   :  { %417 = vmatpush2.bf16.msra.mxu0 %v236_v12  ;;  %v79_v12 = vld [vmem:[#allocation2 + $0x18] sm:$0xff] }
  0x64   :  { %458 = vmatpush2.bf16.msra.mxu1 %v316_v13  ;;  %418 = vmatprep.subr.bf16.mxu0 %v232_v14  ;;  %v346_v13 = vunpack.c.l.s8.bf16 %v161_v5  ;;  %v188_v14 = vunpack.c.l.s8.bf16 %v83_v6  ;;  %v184_v16 = vunpack.c.h.s8.bf16 %v79_v12  ;;  %v179_v22 = vunpack.c.l.s8.bf16 %v79_v12 }
  0x65   :  { %459 = vmatprep.subr.bf16.mxu1 %v312_v15  ;;  %v342_v15 = vunpack.c.h.s8.bf16 %v157_v11 }
  0x67   :  { %419 = vmatpush2.bf16.msra.mxu0 %v231_v18  ;;  %v78_v18 = vld [vmem:[#allocation2 + $0x10] sm:$0xff] }
  0x68   :  { %460 = vmatpush2.bf16.msra.mxu1 %v311_v19  ;;  %420 = vmatprep.subr.bf16.mxu0 %v227_v20  ;;  %v341_v19 = vunpack.c.h.s8.bf16 %v156_v17  ;;  %v183_v20 = vunpack.c.h.s8.bf16 %v78_v18 }
  0x69   :  { %461 = vmatprep.subr.bf16.mxu1 %v307_v21  ;;  %v337_v21 = vunpack.c.l.s8.bf16 %v157_v11 }
  0x6b   :  { %421 = vmatpush2.bf16.msra.mxu0 %v226_v24  ;;  %v134_v24 = vld [vmem:[#allocation2 + $0x1d0] sm:$0xff] }
  0x6c   :  { %462 = vmatpush2.bf16.msra.mxu1 %v306_v25  ;;  %422 = vmatprep.subr.bf16.mxu0 %v222_v26  ;;  %v336_v25 = vunpack.c.l.s8.bf16 %v156_v17  ;;  %v178_v26 = vunpack.c.l.s8.bf16 %v78_v18  ;;  %v294_v28 = vunpack.c.h.s8.bf16 %v134_v24  ;;  %v289_v39 = vunpack.c.l.s8.bf16 %v134_v24 }
  0x6d   :  { %463 = vmatprep.subr.bf16.mxu1 %v302_v27  ;;  %v254_v27 = vunpack.c.h.s8.bf16 %v114_v23 }
  0x6f   :  { %423 = vmatpush2.bf16.msra.mxu0 %v221_v32  ;;  %v133_v32 = vld [vmem:[#allocation2 + $0x1c8] sm:$0xff] }
  0x70   :  { %464 = vmatpush2.bf16.msra.mxu1 %v301_v33  ;;  %424 = vmatprep.subr.bf16.mxu0 %v217_v34  ;;  %v1304_v33 = vld [vmem:[%s1388_s0 + $0x10] ss:$0 sps:$4 sm:$0xff]   ;;  %v253_v34 = vunpack.c.h.s8.bf16 %v113_v29 }
  0x71   :  { %465 = vmatprep.subr.bf16.mxu1 %v297_v35  ;;  %v293_v35 = vunpack.c.h.s8.bf16 %v133_v32 }
  0x73   :  { %425 = vmatpush2.bf16.msra.mxu0 %v216_v40  ;;  %v109_v40 = vld [vmem:[#allocation2 + $0x108] sm:$0xff] }
  0x74   :  { %466 = vmatpush2.bf16.msra.mxu1 %v296_v41  ;;  %476 = vmatprep.subr.bf16.mxu0 %v372_v42  ;;  %v129_v41 = vld [vmem:[#allocation2 + $0x1a8] sm:$0xff]  ;;  %v248_v42 = vunpack.c.l.s8.bf16 %v113_v29  ;;  %v244_v44 = vunpack.c.h.s8.bf16 %v109_v40  ;;  %v239_v52 = vunpack.c.l.s8.bf16 %v109_v40 }
  0x75   :  { %517 = vmatprep.subr.bf16.mxu1 %v214_v43  ;;  %v288_v43 = vunpack.c.l.s8.bf16 %v133_v32  ;;  %v284_v45 = vunpack.c.h.s8.bf16 %v129_v41  ;;  %v279_v53 = vunpack.c.l.s8.bf16 %v129_v41 }
  0x76   :  { %427 = vmatmul.mubr.bf16.vlgmr.msra.gmra.mxu0 %v1291_v46 }
  0x77   :  { %468 = vmatmul.mubr.bf16.vlgmr.msra.gmra.mxu1 %v1295_v47  ;;  %477 = vmatpush1.bf16.msra.mxu0 %v371_v48  ;;  %v108_v48 = vld [vmem:[#allocation2 + $0x100] sm:$0xff] }
  0x78   :  { %518 = vmatpush1.bf16.msra.mxu1 %v213_v49  ;;  %478 = vmatprep.subr.bf16.mxu0 %v367_v50  ;;  %v128_v49 = vld [vmem:[#allocation2 + $0x1a0] sm:$0xff]  ;;  %v243_v50 = vunpack.c.h.s8.bf16 %v108_v48 }
  0x79   :  { %519 = vmatprep.subr.bf16.mxu1 %v209_v51  ;;  %508 = vmatprep.mubr.bf16.mxu0 %v1219_v58  ;;  %v283_v51 = vunpack.c.h.s8.bf16 %v128_v49 }
  0x7a   :  { %549 = vmatprep.mubr.bf16.mxu1 %v1281_v36 }
  0x7b   :  { %479 = vmatpush1.bf16.msra.mxu0 %v366_v30  ;;  %v104_v30 = vld [vmem:[#allocation2 + $0xe0] sm:$0xff] }
  0x7c   :  { %520 = vmatpush1.bf16.msra.mxu1 %v208_v54  ;;  %480 = vmatprep.subr.bf16.mxu0 %v362_v31  ;;  %v124_v54 = vld [vmem:[#allocation2 + $0x180] sm:$0xff]  ;;  %v238_v31 = vunpack.c.l.s8.bf16 %v108_v48  ;;  %v234_v56 = vunpack.c.h.s8.bf16 %v104_v30  ;;  %v229_v63 = vunpack.c.l.s8.bf16 %v104_v30 }
  0x7d   :  { %521 = vmatprep.subr.bf16.mxu1 %v204_v55  ;;  %v278_v55 = vunpack.c.l.s8.bf16 %v128_v49  ;;  %v274_v57 = vunpack.c.h.s8.bf16 %v124_v54  ;;  %v269_v0 = vunpack.c.l.s8.bf16 %v124_v54  ;;  %v139_v54 = vld [vmem:[#allocation2 + $0x1f8] sm:$0xff] }
  0x7f   :  { %481 = vmatpush1.bf16.msra.mxu0 %v361_v59  ;;  %v103_v59 = vld [vmem:[#allocation2 + $0xd8] sm:$0xff] }
  0x80   :  { %522 = vmatpush1.bf16.msra.mxu1 %v203_v60  ;;  %482 = vmatprep.subr.bf16.mxu0 %v357_v61  ;;  %v123_v60 = vld [vmem:[#allocation2 + $0x178] sm:$0xff]  ;;  %v233_v61 = vunpack.c.h.s8.bf16 %v103_v59 }
  0x81   :  { %523 = vmatprep.subr.bf16.mxu1 %v199_v62  ;;  %v273_v62 = vunpack.c.h.s8.bf16 %v123_v60 }
  0x83   :  { %483 = vmatpush1.bf16.msra.mxu0 %v356_v1  ;;  %v99_v1 = vld [vmem:[#allocation2 + $0xb8] sm:$0xff] }
  0x84   :  { %524 = vmatpush1.bf16.msra.mxu1 %v198_v2  ;;  %484 = vmatprep.subr.bf16.mxu0 %v352_v3  ;;  %v119_v2 = vld [vmem:[#allocation2 + $0x158] sm:$0xff]  ;;  %v228_v3 = vunpack.c.l.s8.bf16 %v103_v59  ;;  %v224_v5 = vunpack.c.h.s8.bf16 %v99_v1  ;;  %v219_v11 = vunpack.c.l.s8.bf16 %v99_v1 }
  0x85   :  { %525 = vmatprep.subr.bf16.mxu1 %v194_v4  ;;  %v268_v4 = vunpack.c.l.s8.bf16 %v123_v60  ;;  %v264_v6 = vunpack.c.h.s8.bf16 %v119_v2  ;;  %v259_v12 = vunpack.c.l.s8.bf16 %v119_v2  ;;  %v138_v60 = vld [vmem:[#allocation2 + $0x1f0] sm:$0xff]  ;;  %v115_v2 = vld [vmem:[#allocation2 + $0x138] sm:$0xff] }
  0x87   :  { %485 = vmatpush1.bf16.msra.mxu0 %v351_v7  ;;  %v98_v7 = vld [vmem:[#allocation2 + $0xb0] sm:$0xff] }
  0x88   :  { %526 = vmatpush1.bf16.msra.mxu1 %v193_v8  ;;  %486 = vmatprep.subr.bf16.mxu0 %v347_v9  ;;  %v118_v8 = vld [vmem:[#allocation2 + $0x150] sm:$0xff]  ;;  %v223_v9 = vunpack.c.h.s8.bf16 %v98_v7 }
  0x89   :  { %527 = vmatprep.subr.bf16.mxu1 %v189_v10  ;;  %v263_v10 = vunpack.c.h.s8.bf16 %v118_v8 }
  0x8b   :  { %487 = vmatpush1.bf16.msra.mxu0 %v346_v13  ;;  %v154_v13 = vld [vmem:[#allocation2 + $0x270] sm:$0xff] }
  0x8c   :  { %528 = vmatpush1.bf16.msra.mxu1 %v188_v14  ;;  %488 = vmatprep.subr.bf16.mxu0 %v342_v15  ;;  %v174_v14 = vld [vmem:[#allocation2 + $0x310] sm:$0xff]  ;;  %v218_v15 = vunpack.c.l.s8.bf16 %v98_v7  ;;  %v334_v17 = vunpack.c.h.s8.bf16 %v154_v13  ;;  %v329_v23 = vunpack.c.l.s8.bf16 %v154_v13 }
  0x8d   :  { %529 = vmatprep.subr.bf16.mxu1 %v184_v16  ;;  %v258_v16 = vunpack.c.l.s8.bf16 %v118_v8  ;;  %v374_v18 = vunpack.c.h.s8.bf16 %v174_v14  ;;  %v369_v24 = vunpack.c.l.s8.bf16 %v174_v14  ;;  %v95_v8 = vld [vmem:[#allocation2 + $0x98] sm:$0xff]  ;;  %v110_v14 = vld [vmem:[#allocation2 + $0x110] sm:$0xff] }
  0x8f   :  { %489 = vmatpush1.bf16.msra.mxu0 %v341_v19  ;;  %v153_v19 = vld [vmem:[#allocation2 + $0x268] sm:$0xff] }
  0x90   :  { %530 = vmatpush1.bf16.msra.mxu1 %v183_v20  ;;  %490 = vmatprep.subr.bf16.mxu0 %v337_v21  ;;  %v173_v20 = vld [vmem:[#allocation2 + $0x308] sm:$0xff]  ;;  %v333_v21 = vunpack.c.h.s8.bf16 %v153_v19 }
  0x91   :  { %531 = vmatprep.subr.bf16.mxu1 %v179_v22  ;;  %v373_v22 = vunpack.c.h.s8.bf16 %v173_v20 }
  0x93   :  { %491 = vmatpush1.bf16.msra.mxu0 %v336_v25  ;;  %v149_v25 = vld [vmem:[#allocation2 + $0x248] sm:$0xff] }
  0x94   :  { %532 = vmatpush1.bf16.msra.mxu1 %v178_v26  ;;  %558 = vmatprep.subr.bf16.mxu0 %v294_v28  ;;  %v169_v26 = vld [vmem:[#allocation2 + $0x2e8] sm:$0xff]  ;;  %v368_v28 = vunpack.c.l.s8.bf16 %v173_v20  ;;  %v324_v29 = vunpack.c.h.s8.bf16 %v149_v25  ;;  %v319_v40 = vunpack.c.l.s8.bf16 %v149_v25  ;;  %v90_v20 = vld [vmem:[#allocation2 + $0x70] sm:$0xff] }
  0x95   :  { %533 = vmatprep.subr.bf16.mxu1 %v254_v27  ;;  %v328_v27 = vunpack.c.l.s8.bf16 %v153_v19  ;;  %v364_v32 = vunpack.c.h.s8.bf16 %v169_v26  ;;  %v359_v41 = vunpack.c.l.s8.bf16 %v169_v26  ;;  %v105_v26 = vld [vmem:[#allocation2 + $0xe8] sm:$0xff] }
  0x96   :  { %509 = vmatmul.mubr.bf16.vlgmr.msra.gmra.mxu0 %v1304_v33 }
  0x97   :  { %559 = vmatpush1.bf16.msra.mxu0 %v293_v35  ;;  %590 = vmatprep.mubr.bf16.mxu0 %v1285_v37  ;;  %v168_v35 = vld [vmem:[#allocation2 + $0x2e0] sm:$0xff] }
  0x98   :  { %534 = vmatpush2.bf16.msra.mxu1 %v253_v34  ;;  %560 = vmatprep.subr.bf16.mxu0 %v289_v39  ;;  %v148_v34 = vld [vmem:[#allocation2 + $0x240] sm:$0xff]  ;;  %v363_v39 = vunpack.c.h.s8.bf16 %v168_v35 }
  0x99   :  { %535 = vmatprep.subr.bf16.mxu1 %v249_v38  ;;  %v323_v38 = vunpack.c.h.s8.bf16 %v148_v34 }
  0x9b   :  { %561 = vmatpush1.bf16.msra.mxu0 %v288_v43  ;;  %v164_v43 = vld [vmem:[#allocation2 + $0x2c0] sm:$0xff] }
  0x9c   :  { %536 = vmatpush2.bf16.msra.mxu1 %v248_v42  ;;  %562 = vmatprep.subr.bf16.mxu0 %v284_v45  ;;  %v144_v42 = vld [vmem:[#allocation2 + $0x220] sm:$0xff]  ;;  %v358_v45 = vunpack.c.l.s8.bf16 %v168_v35  ;;  %v354_v49 = vunpack.c.h.s8.bf16 %v164_v43  ;;  %v349_v30 = vunpack.c.l.s8.bf16 %v164_v43 }
  0x9d   :  { %537 = vmatprep.subr.bf16.mxu1 %v244_v44  ;;  %v318_v44 = vunpack.c.l.s8.bf16 %v148_v34  ;;  %v314_v48 = vunpack.c.h.s8.bf16 %v144_v42  ;;  %v85_v34 = vld [vmem:[#allocation2 + $0x48] sm:$0xff] }
  0x9e   :  { %v195_v35 = vunpack.c.h.s8.bf16 %v85_v34  ;;  %v190_v43 = vunpack.c.l.s8.bf16 %v85_v34 }
  0x9f   :  { %563 = vmatpush1.bf16.msra.mxu0 %v283_v51 }
  0xa0   :  { %538 = vmatpush2.bf16.msra.mxu1 %v243_v50  ;;  %564 = vmatprep.subr.bf16.mxu0 %v279_v53  ;;  %v143_v50 = vld [vmem:[#allocation2 + $0x218] sm:$0xff]  ;;  %v309_v53 = vunpack.c.l.s8.bf16 %v144_v42  ;;  %v140_v42 = vld [vmem:[#allocation2 + $0x200] sm:$0xff] }
  0xa1   :  { %539 = vmatprep.subr.bf16.mxu1 %v239_v52  ;;  %v313_v51 = vunpack.c.h.s8.bf16 %v143_v50 }
  0xa3   :  { %565 = vmatpush1.bf16.msra.mxu0 %v278_v55  ;;  %v308_v55 = vunpack.c.l.s8.bf16 %v143_v50  ;;  %v120_v50 = vld [vmem:[#allocation2 + $0x160] sm:$0xff] }
  0xa4   :  { %540 = vmatpush2.bf16.msra.mxu1 %v238_v31  ;;  %566 = vmatprep.subr.bf16.mxu0 %v274_v57  ;;  %v159_v31 = vld [vmem:[#allocation2 + $0x298] sm:$0xff]  ;;  %v304_v57 = vunpack.c.h.s8.bf16 %v139_v54 }
  0xa5   :  { %541 = vmatprep.subr.bf16.mxu1 %v234_v56  ;;  %v344_v59 = vunpack.c.h.s8.bf16 %v159_v31  ;;  %v339_v1 = vunpack.c.l.s8.bf16 %v159_v31  ;;  %v175_v31 = vld [vmem:[#allocation2 + $0x318] sm:$0xff] }
  0xa7   :  { %567 = vmatpush1.bf16.msra.mxu0 %v273_v62  ;;  %v303_v62 = vunpack.c.h.s8.bf16 %v138_v60 }
  0xa8   :  { %542 = vmatpush2.bf16.msra.mxu1 %v233_v61  ;;  %568 = vmatprep.subr.bf16.mxu0 %v269_v0  ;;  %v158_v61 = vld [vmem:[#allocation2 + $0x290] sm:$0xff]  ;;  %v299_v0 = vunpack.c.l.s8.bf16 %v139_v54  ;;  %v260_v54 = vunpack.c.l.s8.bf16 %v120_v50 }
  0xa9   :  { %543 = vmatprep.subr.bf16.mxu1 %v229_v63  ;;  %v343_v63 = vunpack.c.h.s8.bf16 %v158_v61 }
  0xab   :  { %569 = vmatpush1.bf16.msra.mxu0 %v268_v4  ;;  %v298_v4 = vunpack.c.l.s8.bf16 %v138_v60 }
  0xac   :  { %544 = vmatpush2.bf16.msra.mxu1 %v228_v3  ;;  %570 = vmatprep.subr.bf16.mxu0 %v264_v6  ;;  %v155_v3 = vld [vmem:[#allocation2 + $0x278] sm:$0xff]  ;;  %v255_v6 = vunpack.c.h.s8.bf16 %v115_v2 }
  0xad   :  { %545 = vmatprep.subr.bf16.mxu1 %v224_v5  ;;  %v338_v5 = vunpack.c.l.s8.bf16 %v158_v61  ;;  %v335_v7 = vunpack.c.h.s8.bf16 %v155_v3  ;;  %v330_v13 = vunpack.c.l.s8.bf16 %v155_v3 }
  0xaf   :  { %571 = vmatpush1.bf16.msra.mxu0 %v263_v10  ;;  %v215_v10 = vunpack.c.h.s8.bf16 %v95_v8 }
  0xb0   :  { %546 = vmatpush2.bf16.msra.mxu1 %v223_v9  ;;  %572 = vmatprep.subr.bf16.mxu0 %v259_v12  ;;  %v135_v9 = vld [vmem:[#allocation2 + $0x1d8] sm:$0xff]  ;;  %v250_v12 = vunpack.c.l.s8.bf16 %v115_v2 }
  0xb1   :  { %547 = vmatprep.subr.bf16.mxu1 %v219_v11  ;;  %v295_v11 = vunpack.c.h.s8.bf16 %v135_v9 }
  0xb3   :  { %573 = vmatpush1.bf16.msra.mxu0 %v258_v16  ;;  %v210_v16 = vunpack.c.l.s8.bf16 %v95_v8 }
  0xb4   :  { %548 = vmatpush2.bf16.msra.mxu1 %v218_v15  ;;  %574 = vmatprep.subr.bf16.mxu0 %v334_v17  ;;  %v150_v15 = vld [vmem:[#allocation2 + $0x250] sm:$0xff]  ;;  %v290_v17 = vunpack.c.l.s8.bf16 %v135_v9 }
  0xb5   :  { %599 = vmatprep.subr.bf16.mxu1 %v374_v18  ;;  %v245_v18 = vunpack.c.h.s8.bf16 %v110_v14  ;;  %v325_v19 = vunpack.c.h.s8.bf16 %v150_v15  ;;  %v320_v25 = vunpack.c.l.s8.bf16 %v150_v15 }
  0xb7   :  { %550 = vmatmul.mubr.bf16.vlgmr.msra.gmra.mxu1 %v1291_v46  ;;  %575 = vmatpush2.bf16.msra.mxu0 %v333_v21  ;;  %v130_v21 = vld [vmem:[#allocation2 + $0x1b0] sm:$0xff] }
  0xb8   :  { %600 = vmatpush1.bf16.msra.mxu1 %v373_v22  ;;  %576 = vmatprep.subr.bf16.mxu0 %v329_v23  ;;  %v205_v22 = vunpack.c.h.s8.bf16 %v90_v20  ;;  %v285_v23 = vunpack.c.h.s8.bf16 %v130_v21 }
  0xb9   :  { %601 = vmatprep.subr.bf16.mxu1 %v369_v24  ;;  %631 = vmatprep.mubr.bf16.mxu1 %v1219_v58  ;;  %v163_v58 = vld [vmem:[#allocation2 + $0x2b8] sm:$0xff]  ;;  %v240_v24 = vunpack.c.l.s8.bf16 %v110_v14  ;;  %v1330_v14 = vld [vmem:[#allocation4] sm:$0x1f] }
  0xba   :  { %v353_v52 = vunpack.c.h.s8.bf16 %v163_v58  ;;  %v348_v56 = vunpack.c.l.s8.bf16 %v163_v58 }
  0xbb   :  { %577 = vmatpush2.bf16.msra.mxu0 %v328_v27  ;;  %v145_v27 = vld [vmem:[#allocation2 + $0x228] sm:$0xff] }
  0xbc   :  { %602 = vmatpush1.bf16.msra.mxu1 %v368_v28  ;;  %578 = vmatprep.subr.bf16.mxu0 %v324_v29  ;;  %v200_v28 = vunpack.c.l.s8.bf16 %v90_v20  ;;  %v280_v29 = vunpack.c.l.s8.bf16 %v130_v21 }
  0xbd   :  { %603 = vmatprep.subr.bf16.mxu1 %v364_v32  ;;  %v235_v32 = vunpack.c.h.s8.bf16 %v105_v26 }
  0xbf   :  { %579 = vmatpush2.bf16.msra.mxu0 %v323_v38 }
  0xc0   :  { %604 = vmatpush1.bf16.msra.mxu1 %v363_v39  ;;  %580 = vmatprep.subr.bf16.mxu0 %v319_v40  ;;  %v230_v39 = vunpack.c.l.s8.bf16 %v105_v26  ;;  %v310_v40 = vunpack.c.l.s8.bf16 %v145_v27 }
  0xc1   :  { %605 = vmatprep.subr.bf16.mxu1 %v359_v41  ;;  %v100_v41 = vld [vmem:[#allocation2 + $0xc0] sm:$0xff] }
  0xc3   :  { %581 = vmatpush2.bf16.msra.mxu0 %v318_v44 }
  0xc4   :  { %606 = vmatpush1.bf16.msra.mxu1 %v358_v45  ;;  %582 = vmatprep.subr.bf16.mxu0 %v314_v48  ;;  %v225_v45 = vunpack.c.h.s8.bf16 %v100_v41  ;;  %v305_v48 = vunpack.c.h.s8.bf16 %v140_v42 }
  0xc5   :  { %607 = vmatprep.subr.bf16.mxu1 %v354_v49  ;;  %v80_v49 = vld [vmem:[#allocation2 + $0x20] sm:$0xff] }
  0xc6   :  { %v185_v58 = vunpack.c.h.s8.bf16 %v80_v49 }
  0xc7   :  { %583 = vmatpush2.bf16.msra.mxu0 %v313_v51  ;;  %v265_v51 = vunpack.c.h.s8.bf16 %v120_v50 }
  0xc8   :  { %608 = vmatpush1.bf16.msra.mxu1 %v353_v52  ;;  %584 = vmatprep.subr.bf16.mxu0 %v309_v53  ;;  %v220_v52 = vunpack.c.l.s8.bf16 %v100_v41  ;;  %v300_v53 = vunpack.c.l.s8.bf16 %v140_v42 }
  0xc9   :  { %609 = vmatprep.subr.bf16.mxu1 %v349_v30  ;;  %v180_v30 = vunpack.c.l.s8.bf16 %v80_v49 }
  0xcb   :  { %585 = vmatpush2.bf16.msra.mxu0 %v308_v55  ;;  %v375_v55 = vunpack.c.h.s8.bf16 %v175_v31 }
  0xcc   :  { %610 = vmatpush1.bf16.msra.mxu1 %v348_v56  ;;  %586 = vmatprep.subr.bf16.mxu0 %v304_v57  ;;  %v1220_v56 = vmov 0.0   ;;  %v370_v57 = vunpack.c.l.s8.bf16 %v175_v31 }
  0xcd   :  { %611 = vmatprep.subr.bf16.mxu1 %v344_v59  ;;  %v170_v59 = vld [vmem:[#allocation2 + $0x2f0] sm:$0xff] }
  0xce   :  { %v365_v60 = vunpack.c.h.s8.bf16 %v170_v59  ;;  %v360_v61 = vunpack.c.l.s8.bf16 %v170_v59 }
  0xcf   :  { %587 = vmatpush2.bf16.msra.mxu0 %v303_v62  ;;  %v165_v62 = vld [vmem:[#allocation2 + $0x2c8] sm:$0xff] }
  0xd0   :  { %612 = vmatpush1.bf16.msra.mxu1 %v343_v63  ;;  %588 = vmatprep.subr.bf16.mxu0 %v299_v0  ;;  %v355_v63 = vunpack.c.h.s8.bf16 %v165_v62 }
  0xd1   :  { %613 = vmatprep.subr.bf16.mxu1 %v339_v1 }
  0xd3   :  { %589 = vmatpush2.bf16.msra.mxu0 %v298_v4 }
  0xd4   :  { %614 = vmatpush1.bf16.msra.mxu1 %v338_v5  ;;  %1030 = vmatprep.subr.bf16.mxu0 %v255_v6 }
  0xd5   :  { %1052 = vmatprep.subr.bf16.mxu1 %v335_v7 }
  0xd6   :  { %591 = vmatmul.mubr.bf16.vlgmr.msra.gmra.mxu0 %v1295_v47 }
  0xd7   :  { %632 = vmatmul.mubr.bf16.vlgmr.msra.gmra.mxu1 %v1304_v33  ;;  %1031 = vmatpush3.bf16.msra.mxu0 %v215_v10  ;;  %v762_v10 = vlaneseq }
  0xd8   :  { %1053 = vmatpush3.bf16.msra.mxu1 %v295_v11  ;;  %1032 = vmatprep.subr.bf16.mxu0 %v250_v12 }
  0xd9   :  { %1054 = vmatprep.subr.bf16.mxu1 %v330_v13  ;;  %672 = vmatprep.mubr.bf16.mxu0 %v1281_v36  ;;  %v315_v36 = vunpack.c.h.s8.bf16 %v145_v27  ;;  %v1317_v11 = vshrl.u32 %v762_v10, 7  ;;  %v1325_v13 = vld [vmem:[%s1390_s2] sm:$0x1f] }
  0xda   :  { %712 = vmatprep.mubr.bf16.mxu1 %v1285_v37  ;;  %v125_v37 = vld [vmem:[#allocation2 + $0x188] sm:$0xff] }
  0xdb   :  { %1033 = vmatpush3.bf16.msra.mxu0 %v210_v16  ;;  %v275_v38 = vunpack.c.h.s8.bf16 %v125_v37  ;;  %v270_v44 = vunpack.c.l.s8.bf16 %v125_v37  ;;  %v1320_v12 = vsub.s32 0, %v1317_v11 }
  0xdc   :  { %1055 = vmatpush3.bf16.msra.mxu1 %v290_v17  ;;  %1034 = vmatprep.subr.bf16.mxu0 %v245_v18 }
  0xdd   :  { %1056 = vmatprep.subr.bf16.mxu1 %v325_v19  ;;  %v765_v16 = vrot.slane %v1325_v13, %v1320_v12  ;;  %v797_v20 = vrot.slane %v1330_v14, %v1320_v12 }
  0xdf   :  { %1035 = vmatpush3.bf16.msra.mxu0 %v205_v22 }
  0xe0   :  { %1057 = vmatpush3.bf16.msra.mxu1 %v285_v23  ;;  %1036 = vmatprep.subr.bf16.mxu0 %v240_v24 }
  0xe1   :  { %1058 = vmatprep.subr.bf16.mxu1 %v320_v25 }
  0xe3   :  { %1037 = vmatpush3.bf16.msra.mxu0 %v200_v28 }
  0xe4   :  { %1059 = vmatpush3.bf16.msra.mxu1 %v280_v29  ;;  %1038 = vmatprep.subr.bf16.mxu0 %v235_v32 }
  0xe5   :  { %1060 = vmatprep.subr.bf16.mxu1 %v315_v36 }
  0xe7   :  { %1039 = vmatpush3.bf16.msra.mxu0 %v195_v35 }
  0xe8   :  { %1061 = vmatpush3.bf16.msra.mxu1 %v275_v38  ;;  %1040 = vmatprep.subr.bf16.mxu0 %v230_v39 }
  0xe9   :  { %1062 = vmatprep.subr.bf16.mxu1 %v310_v40 }
  0xeb   :  { %1041 = vmatpush3.bf16.msra.mxu0 %v190_v43 }
  0xec   :  { %1063 = vmatpush3.bf16.msra.mxu1 %v270_v44  ;;  %1042 = vmatprep.subr.bf16.mxu0 %v225_v45 }
  0xed   :  { %1064 = vmatprep.subr.bf16.mxu1 %v305_v48 }
  0xef   :  { %1043 = vmatpush3.bf16.msra.mxu0 %v185_v58 }
  0xf0   :  { %1065 = vmatpush3.bf16.msra.mxu1 %v265_v51  ;;  %1044 = vmatprep.subr.bf16.mxu0 %v220_v52 }
  0xf1   :  { %1066 = vmatprep.subr.bf16.mxu1 %v300_v53 }
  0xf3   :  { %1045 = vmatpush3.bf16.msra.mxu0 %v180_v30 }
  0xf4   :  { %1067 = vmatpush3.bf16.msra.mxu1 %v260_v54  ;;  %1083 = vmatprep.subr.bf16.mxu0 %v1220_v56 }
  0xf6   :  { %673 = vmatmul.mubr.bf16.vlgmr.msra.gmra.mxu0 %v1291_v46  ;;  %v350_v46 = vunpack.c.l.s8.bf16 %v165_v62 }
  0xf7   :  { %713 = vmatmul.mubr.bf16.vlgmr.msra.gmra.mxu1 %v1295_v47  ;;  %1084 = vmatpush3.bf16.msra.mxu0 %v375_v55  ;;  %v160_v47 = vld [vmem:[#allocation2 + $0x2a0] sm:$0xff] }
  0xf8   :  { %1099 = vmatprep.mubr.msk.bf16.mxu0 %vm1221_vm0, %v1220_v56  ;;  %1085 = vmatprep.subr.bf16.mxu0 %v1220_v56  ;;  %v345_v0 = vunpack.c.h.s8.bf16 %v160_v47  ;;  %v340_v1 = vunpack.c.l.s8.bf16 %v160_v47 }
  0xfb   :  { %1086 = vmatpush3.bf16.msra.mxu0 %v370_v57 }
  0xfc   :  { %1087 = vmatprep.subr.bf16.mxu0 %v1220_v56 }
  0xff   :  { %1088 = vmatpush3.bf16.msra.mxu0 %v365_v60 }
 0x100   :  { %1089 = vmatprep.subr.bf16.mxu0 %v1220_v56 }
 0x103   :  { %1090 = vmatpush3.bf16.msra.mxu0 %v360_v61 }
 0x104   :  { %1091 = vmatprep.subr.bf16.mxu0 %v1220_v56 }
 0x107   :  { %1092 = vmatpush3.bf16.msra.mxu0 %v355_v63 }
 0x108   :  { %1093 = vmatprep.subr.bf16.mxu0 %v1220_v56 }
 0x10b   :  { %1094 = vmatpush3.bf16.msra.mxu0 %v350_v46 }
 0x10c   :  { %1095 = vmatprep.subr.bf16.mxu0 %v1220_v56 }
 0x10f   :  { %1096 = vmatpush3.bf16.msra.mxu0 %v345_v0 }
 0x110   :  { %1097 = vmatprep.subr.bf16.mxu0 %v1220_v56 }
 0x113   :  { %1098 = vmatpush3.bf16.msra.mxu0 %v340_v1 }
 0x116   :  { %1100 = vmatmul.mubr.bf16.vlgmr.msra.gmra.mxu0 %v1304_v33  ;;  %v1328_v33 = vsub.s32 1, %v1317_v11 }
 0x118   :  { %v769_v21 = vrot.slane %v1325_v13, %v1328_v33  ;;  %v801_v25 = vrot.slane %v1330_v14, %v1328_v33 }
 0x136   :  { %v428_v2 = vpop.f32.mrf.mxu0 }
 0x137   :  { %v469_v3 = vpop.f32.mrf.mxu1 }
 0x138   :  { %v430_v4 = vpop.f32.mrf.mxu0  ;;  %v470_v15 = vadd.f32 %v469_v3, %v428_v2 }
 0x139   :  { %v471_v5 = vpop.f32.mrf.mxu1 }
 0x13a   :  { %v432_v6 = vpop.f32.mrf.mxu0  ;;  %v472_v18 = vadd.f32 %v471_v5, %v430_v4 }
 0x13b   :  { %v473_v7 = vpop.f32.mrf.mxu1  ;;  %v1340_v6 = vld [vmem:[#allocation6] sm:$0x1f] }
 0x13c   :  { %v433_v8 = vpop.f32.mrf.mxu0  ;;  %v1342_v7 = vld [vmem:[#allocation7] sm:$0x1f] }
 0x13d   :  { %v474_v9 = vpop.f32.mrf.mxu1  ;;  %v924_v8 = vrot.slane %v1340_v6, %v1320_v12 }
 0x156   :  { %v510_v17 = vpop.f32.mrf.mxu0 }
 0x157   :  { %v511_v19 = vadd.f32 %v510_v17, %v470_v15  ;;  %v956_v15 = vrot.slane %v1342_v7, %v1320_v12 }
 0x158   :  { %v512_v22 = vpop.f32.mrf.mxu0 }
 0x159   :  { %v787_v23 = vmul.f32 %v765_v16, %v511_v19  ;;  %v513_v24 = vadd.f32 %v512_v22, %v472_v18  ;;  %v928_v16 = vrot.slane %v1340_v6, %v1328_v33 }
 0x15a   :  { %v514_v26 = vpop.f32.mrf.mxu0 }
 0x15b   :  { %v819_v27 = vadd.f32 %v797_v20, %v787_v23  ;;  %v788_v28 = vmul.f32 %v769_v21, %v513_v24  ;;  %v960_v20 = vrot.slane %v1342_v7, %v1328_v33  ;;  %v1353_v24 = vsub.s32 2, %v1317_v11 }
 0x15c   :  { %v515_v29 = vpop.f32.mrf.mxu0 }
 0x15d   :  { %v824_v32 = vrot.slane %v819_v27, 4  ;;  %v820_v36 = vadd.f32 %v801_v25, %v788_v28 }
 0x15f   :  { %v825_v34 = vadd.f32 %v824_v32, %v819_v27  ;;  %v830_v37 = vrot.slane %v820_v36, 4 }
 0x161   :  { %v826_v35 = vrot.slane %v825_v34, 2  ;;  %v831_v38 = vadd.f32 %v830_v37, %v820_v36 }
 0x163   :  { %v827_v39 = vadd.f32 %v826_v35, %v825_v34  ;;  %v832_v40 = vrot.slane %v831_v38, 2 }
 0x165   :  { %v828_v41 = vrot.slane %v827_v39, 1  ;;  %v833_v42 = vadd.f32 %v832_v40, %v831_v38  ;;  %v805_v38 = vrot.slane %v1330_v14, %v1353_v24 }
 0x167   :  { %v829_v43 = vadd.f32 %v828_v41, %v827_v39  ;;  %v834_v44 = vrot.slane %v833_v42, 1 }
 0x169   :  { %v854_v45 = vmul.f32 0.125, %v829_v43  ;;  %v835_v48 = vadd.f32 %v834_v44, %v833_v42 }
 0x16b   :  { %v859_v49 = vsub.f32 %v819_v27, %v854_v45  ;;  %v855_v50 = vmul.f32 0.125, %v835_v48  ;;  %v1356_v27 = vsub.s32 3, %v1317_v11 }
 0x16d   :  { %v864_v58 = vmul.f32 %v859_v49, %v859_v49  ;;  %v860_v51 = vsub.f32 %v820_v36, %v855_v50  ;;  %v773_v36 = vrot.slane %v1325_v13, %v1353_v24  ;;  %v777_v39 = vrot.slane %v1325_v13, %v1356_v27 }
 0x16e   :  { %v809_v44 = vrot.slane %v1330_v14, %v1356_v27 }
 0x16f   :  { %v869_v52 = vrot.slane %v864_v58, 4  ;;  %v865_v53 = vmul.f32 %v860_v51, %v860_v51 }
 0x171   :  { %v870_v30 = vadd.f32 %v869_v52, %v864_v58  ;;  %v875_v54 = vrot.slane %v865_v53, 4 }
 0x173   :  { %v871_v31 = vrot.slane %v870_v30, 2  ;;  %v876_v55 = vadd.f32 %v875_v54, %v865_v53 }
 0x175   :  { %v872_v56 = vadd.f32 %v871_v31, %v870_v30  ;;  %v877_v57 = vrot.slane %v876_v55, 2 }
 0x177   :  { %v551_v59 = vpop.f32.mrf.mxu1  ;;  %v873_v60 = vrot.slane %v872_v56, 1  ;;  %v878_v61 = vadd.f32 %v877_v57, %v876_v55 }
 0x179   :  { %v553_v62 = vpop.f32.mrf.mxu1  ;;  %v874_v63 = vadd.f32 %v873_v60, %v872_v56  ;;  %v879_v46 = vrot.slane %v878_v61, 1 }
 0x17b   :  { %v555_v47 = vpop.f32.mrf.mxu1  ;;  %v899_v0 = vmul.f32 0.125, %v874_v63  ;;  %v880_v1 = vadd.f32 %v879_v46, %v878_v61 }
 0x17d   :  { %v556_v2 = vpop.f32.mrf.mxu1  ;;  %v904_v3 = vadd.f32 1e-05, %v899_v0  ;;  %v900_v4 = vmul.f32 0.125, %v880_v1 }
 0x17f   :  { %1117 = vrsqrt.f32 %v904_v3  ;;  %v905_v5 = vadd.f32 1e-05, %v900_v4 }
 0x181   :  { %1119 = vrsqrt.f32 %v905_v5 }
 0x18c   :  { %v1118_v9 = vpop.eup %1117 }
 0x18d   :  { %v914_v10 = vmul.f32 %v1118_v9, %v859_v49 }
 0x18e   :  { %v1120_v17 = vpop.eup %1119 }
 0x18f   :  { %v946_v18 = vmul.f32 %v924_v8, %v914_v10  ;;  %v915_v19 = vmul.f32 %v1120_v17, %v860_v51 }
 0x191   :  { %v978_v21 = vadd.f32 %v956_v15, %v946_v18  ;;  %v947_v22 = vmul.f32 %v928_v16, %v915_v19 }
 0x193   :  { %v979_v23 = vadd.f32 %v960_v20, %v947_v22  ;;  %v983_v25 = vmax.f32 %v978_v21, 0.0 }
 0x195   :  { %v984_v26 = vmax.f32 %v979_v23, 0.0 }
 0x196   :  { %v592_v12 = vpop.f32.mrf.mxu0 }
 0x197   :  { %v633_v28 = vpop.f32.mrf.mxu1  ;;  %v1027_v29 = vpack.c.bf16 %v984_v26, %v983_v25  ;;  %v593_v32 = vadd.f32 %v592_v12, %v551_v59 }
 0x198   :  { %v594_v34 = vpop.f32.mrf.mxu0 }
 0x199   :  { %v635_v33 = vpop.f32.mrf.mxu1  ;;  %1009 = vst [vmem:[%s1394_s6] sm:$0xff] %v1027_v29  ;;  %v595_v37 = vadd.f32 %v594_v34, %v553_v62  ;;  %v634_v35 = vadd.f32 %v633_v28, %v593_v32 }
 0x19a   :  { %v596_v40 = vpop.f32.mrf.mxu0 }
 0x19b   :  { %v637_v41 = vpop.f32.mrf.mxu1  ;;  %v789_v42 = vmul.f32 %v773_v36, %v634_v35  ;;  %v636_v43 = vadd.f32 %v635_v33, %v595_v37  ;;  %v932_v33 = vrot.slane %v1340_v6, %v1353_v24 }
 0x19c   :  { %v597_v45 = vpop.f32.mrf.mxu0  ;;  %v968_v41 = vrot.slane %v1342_v7, %v1356_v27 }
 0x19d   :  { %v638_v48 = vpop.f32.mrf.mxu1  ;;  %v821_v49 = vadd.f32 %v805_v38, %v789_v42  ;;  %v790_v50 = vmul.f32 %v777_v39, %v636_v43  ;;  %v964_v38 = vrot.slane %v1342_v7, %v1353_v24  ;;  %v936_v39 = vrot.slane %v1340_v6, %v1356_v27 }
 0x19e   :  { %v780_v42 = vsub.s32 4, %v1317_v11 }
 0x19f   :  { %v836_v58 = vrot.slane %v821_v49, 4  ;;  %v822_v51 = vadd.f32 %v809_v44, %v790_v50 }
 0x1a1   :  { %v837_v52 = vadd.f32 %v836_v58, %v821_v49  ;;  %v842_v53 = vrot.slane %v822_v51, 4 }
 0x1a3   :  { %v838_v30 = vrot.slane %v837_v52, 2  ;;  %v843_v54 = vadd.f32 %v842_v53, %v822_v51 }
 0x1a5   :  { %v839_v31 = vadd.f32 %v838_v30, %v837_v52  ;;  %v844_v55 = vrot.slane %v843_v54, 2  ;;  %v781_v52 = vrot.slane %v1325_v13, %v780_v42 }
 0x1a7   :  { %v840_v56 = vrot.slane %v839_v31, 1  ;;  %v845_v57 = vadd.f32 %v844_v55, %v843_v54 }
 0x1a9   :  { %v841_v59 = vadd.f32 %v840_v56, %v839_v31  ;;  %v846_v60 = vrot.slane %v845_v57, 1  ;;  %v813_v31 = vrot.slane %v1330_v14, %v780_v42 }
 0x1ab   :  { %v856_v61 = vmul.f32 0.125, %v841_v59  ;;  %v847_v62 = vadd.f32 %v846_v60, %v845_v57 }
 0x1ad   :  { %v861_v63 = vsub.f32 %v821_v49, %v856_v61  ;;  %v857_v46 = vmul.f32 0.125, %v847_v62 }
 0x1af   :  { %v866_v47 = vmul.f32 %v861_v63, %v861_v63  ;;  %v862_v0 = vsub.f32 %v822_v51, %v857_v46 }
 0x1b1   :  { %v881_v1 = vrot.slane %v866_v47, 4  ;;  %v867_v2 = vmul.f32 %v862_v0, %v862_v0 }
 0x1b3   :  { %v882_v3 = vadd.f32 %v881_v1, %v866_v47  ;;  %v887_v4 = vrot.slane %v867_v2, 4 }
 0x1b5   :  { %v883_v5 = vrot.slane %v882_v3, 2  ;;  %v888_v8 = vadd.f32 %v887_v4, %v867_v2 }
 0x1b6   :  { %v1046_v9 = vpop.f32.mrf.mxu0 }
 0x1b7   :  { %v1068_v10 = vpop.f32.mrf.mxu1  ;;  %v884_v15 = vadd.f32 %v883_v5, %v882_v3  ;;  %v889_v16 = vrot.slane %v888_v8, 2 }
 0x1b8   :  { %v1047_v17 = vpop.f32.mrf.mxu0 }
 0x1b9   :  { %v1069_v18 = vpop.f32.mrf.mxu1  ;;  %v885_v19 = vrot.slane %v884_v15, 1  ;;  %v890_v20 = vadd.f32 %v889_v16, %v888_v8  ;;  %v1048_v45 = vadd.f32 %v1047_v17, %v1046_v9 }
 0x1ba   :  { %v1049_v21 = vpop.f32.mrf.mxu0  ;;  %v1070_v48 = vadd.f32 %v1069_v18, %v1068_v10  ;;  %v972_v18 = vrot.slane %v1342_v7, %v780_v42 }
 0x1bb   :  { %v1071_v22 = vpop.f32.mrf.mxu1  ;;  %v886_v23 = vadd.f32 %v885_v19, %v884_v15  ;;  %v891_v25 = vrot.slane %v890_v20, 1  ;;  %v940_v15 = vrot.slane %v1340_v6, %v780_v42 }
 0x1bc   :  { %v1050_v26 = vpop.f32.mrf.mxu0  ;;  %v715_v51 = vadd.f32 %v1070_v48, %v1048_v45 }
 0x1bd   :  { %v1072_v12 = vpop.f32.mrf.mxu1  ;;  %v901_v28 = vmul.f32 0.125, %v886_v23  ;;  %v892_v29 = vadd.f32 %v891_v25, %v890_v20 }
 0x1bf   :  { %v906_v32 = vadd.f32 1e-05, %v901_v28  ;;  %v902_v36 = vmul.f32 0.125, %v892_v29 }
 0x1c1   :  { %1121 = vrsqrt.f32 %v906_v32  ;;  %v907_v34 = vadd.f32 1e-05, %v902_v36 }
 0x1c3   :  { %1123 = vrsqrt.f32 %v907_v34 }
 0x1ce   :  { %v1122_v37 = vpop.eup %1121 }
 0x1cf   :  { %v916_v35 = vmul.f32 %v1122_v37, %v861_v63 }
 0x1d0   :  { %v1124_v40 = vpop.eup %1123 }
 0x1d1   :  { %v948_v43 = vmul.f32 %v932_v33, %v916_v35  ;;  %v917_v44 = vmul.f32 %v1124_v40, %v862_v0 }
 0x1d3   :  { %v980_v49 = vadd.f32 %v964_v38, %v948_v43  ;;  %v949_v50 = vmul.f32 %v936_v39, %v917_v44 }
 0x1d5   :  { %v981_v58 = vadd.f32 %v968_v41, %v949_v50  ;;  %v985_v53 = vmax.f32 %v980_v49, 0.0 }
 0x1d6   :  { %v754_v24 = vpop.f32.mrf.mxu0 }
 0x1d7   :  { %v986_v30 = vmax.f32 %v981_v58, 0.0  ;;  %v755_v54 = vadd.f32 %v754_v24, %v715_v51 }
 0x1d8   :  { %v1101_v55 = vpop.f32.mrf.mxu0 }
 0x1d9   :  { %v1028_v27 = vpack.c.bf16 %v986_v30, %v985_v53  ;;  %v791_v56 = vmul.f32 %v781_v52, %v755_v54 }
 0x1da   :  { %v757_v11 = vpop.f32.mrf.mxu0 }
 0x1db   :  { %1010 = vst [vmem:[%s1394_s6 + $0x8] sm:$0xff] %v1028_v27  ;;  %v823_v57 = vadd.f32 %v813_v31, %v791_v56 }
 0x1dc   :  { %v1102_v59 = vpop.f32.mrf.mxu0 }
 0x1dd   :  { %v848_v60 = vrot.slane %v823_v57, 4 }
 0x1df   :  { %v849_v61 = vadd.f32 %v848_v60, %v823_v57 }
 0x1e1   :  { %v850_v62 = vrot.slane %v849_v61, 2 }
 0x1e3   :  { %v851_v13 = vadd.f32 %v850_v62, %v849_v61 }
 0x1e5   :  { %v852_v63 = vrot.slane %v851_v13, 1 }
 0x1e7   :  { %v853_v46 = vadd.f32 %v852_v63, %v851_v13 }
 0x1e9   :  { %v858_v47 = vmul.f32 0.125, %v853_v46 }
 0x1eb   :  { %v863_v0 = vsub.f32 %v823_v57, %v858_v47 }
 0x1ed   :  { %v868_v1 = vmul.f32 %v863_v0, %v863_v0 }
 0x1ef   :  { %v893_v14 = vrot.slane %v868_v1, 4 }
 0x1f1   :  { %v894_v2 = vadd.f32 %v893_v14, %v868_v1 }
 0x1f3   :  { %v895_v3 = vrot.slane %v894_v2, 2 }
 0x1f5   :  { %v896_v4 = vadd.f32 %v895_v3, %v894_v2 }
 0x1f7   :  { %v897_v5 = vrot.slane %v896_v4, 1 }
 0x1f9   :  { %v898_v8 = vadd.f32 %v897_v5, %v896_v4 }
 0x1fb   :  { %v903_v9 = vmul.f32 0.125, %v898_v8 }
 0x1fd   :  { %v908_v10 = vadd.f32 1e-05, %v903_v9 }
 0x1ff   :  { %1125 = vrsqrt.f32 %v908_v10 }
 0x20c   :  { %v1126_v16 = vpop.eup %1125 }
 0x20d   :  { %v918_v17 = vmul.f32 %v1126_v16, %v863_v0 }
 0x20f   :  { %v950_v19 = vmul.f32 %v940_v15, %v918_v17 }
 0x211   :  { %v982_v20 = vadd.f32 %v972_v18, %v950_v19 }
 0x213   :  { %v987_v21 = vmax.f32 %v982_v20, 0.0 }
 0x215   :  { %v1029_v22 = vpack.c.bf16 %v987_v21, %v987_v21 }
 0x217   :  { %1011 = vst [vmem:[%s1394_s6 + $0x10] sm:$0xf] %v1029_v22 }
 0x218   :  { %1016 = vsyncpa [#allocation3], 1 }
 0x219   :  { %1017 = vsyncpa [#allocation5], 1 }
 0x21a   :  { %1018 = vsyncpa [#allocation8], 1 }

// kernel: multi_proxy_forward.7
= control target key start
LH: loop header
LB: loop body
LE: loop exit
PB: predicated region body
PF: predicated region fallthrough
CT: control target
= control target key end

     0   :  { %12 = vsyncpa [#allocation3], 0  ;;  %s737_s0 = inlined_call_operand.vmem [shape: bf16[8,640], index: 0, kind: input, shape index: {}]   ;;  %s738_s1 = inlined_call_operand.vmem [shape: s8[640,128], index: 1, kind: input, shape index: {}]   ;;  %s739_s2 = inlined_call_operand.vmem [shape: f32[1,128], index: 2, kind: input, shape index: {}]   ;;  %s740_s3 = inlined_call_operand.vmem [shape: f32[1,128], index: 3, kind: input, shape index: {}]   ;;  %s741_s4 = inlined_call_operand.vmem [shape: bf16[128,128], index: 4, kind: input, shape index: {}]   ;;  %s742_s5 = inlined_call_operand.hbm [shape: f32[8,128], index: 5, kind: output, shape index: {0}]   ;;  %s743_s6 = inlined_call_operand.hbm [shape: f32[8,128], index: 6, kind: output, shape index: {1}]  }
   0x1   :  { %v35_v0 = vld [vmem:[%s738_s1 + $0x38] sm:$0xff]  ;;  %v34_v10 = vld [vmem:[%s738_s1 + $0x30] sm:$0xff]  ;;  %v629_v18 = vld [vmem:[%s737_s0] sm:$0xff] }
   0x2   :  { %v43_v1 = vld [vmem:[%s738_s1 + $0x78] sm:$0xff]  ;;  %v62_v3 = vunpack.c.l.s8.bf16 %v35_v0  ;;  %v63_v4 = vunpack.c.h.s8.bf16 %v35_v0  ;;  %v42_v11 = vld [vmem:[%s738_s1 + $0x70] sm:$0xff]  ;;  %v61_v14 = vunpack.c.h.s8.bf16 %v34_v10  ;;  %v634_v19 = vld [vmem:[%s737_s0 + $0x8] sm:$0xff]  ;;  %v60_v24 = vunpack.c.l.s8.bf16 %v34_v10 }
   0x3   :  { %v31_v2 = vld [vmem:[%s738_s1 + $0x18] sm:$0xff]  ;;  %v78_v5 = vunpack.c.l.s8.bf16 %v43_v1  ;;  %v79_v6 = vunpack.c.h.s8.bf16 %v43_v1  ;;  %v77_v15 = vunpack.c.h.s8.bf16 %v42_v11  ;;  %v30_v16 = vld [vmem:[%s738_s1 + $0x10] sm:$0xff]  ;;  %v33_v22 = vld [vmem:[%s738_s1 + $0x28] sm:$0xff]  ;;  %v76_v25 = vunpack.c.l.s8.bf16 %v42_v11 }
   0x4   :  { %v39_v7 = vld [vmem:[%s738_s1 + $0x58] sm:$0xff]  ;;  %v55_v8 = vunpack.c.h.s8.bf16 %v31_v2  ;;  %398 = vmatprep.subr.bf16.mxu0 %v63_v4  ;;  %v54_v12 = vunpack.c.l.s8.bf16 %v31_v2  ;;  %v38_v17 = vld [vmem:[%s738_s1 + $0x50] sm:$0xff]  ;;  %v53_v20 = vunpack.c.h.s8.bf16 %v30_v16  ;;  %v41_v23 = vld [vmem:[%s738_s1 + $0x68] sm:$0xff]  ;;  %v384_v26 = vcombine.high %v629_v18, %v629_v18 }
   0x5   :  { %v71_v9 = vunpack.c.h.s8.bf16 %v39_v7  ;;  %420 = vmatprep.subr.bf16.mxu1 %v79_v6  ;;  %v70_v13 = vunpack.c.l.s8.bf16 %v39_v7  ;;  %v69_v21 = vunpack.c.h.s8.bf16 %v38_v17  ;;  %v386_v27 = vcombine.high %v634_v19, %v634_v19  ;;  %v29_v28 = vld [vmem:[%s738_s1 + $0x8] sm:$0xff] }
   0x6   :  { %399 = vmatpush3.bf16.msra.mxu0 %v55_v8  ;;  %138 = vmatprep.mubr.bf16.mxu0 %v384_v26  ;;  %v52_v29 = vunpack.c.l.s8.bf16 %v30_v16  ;;  %v68_v30 = vunpack.c.l.s8.bf16 %v38_v17  ;;  %v59_v31 = vunpack.c.h.s8.bf16 %v33_v22  ;;  %v75_v32 = vunpack.c.h.s8.bf16 %v41_v23  ;;  %v37_v33 = vld [vmem:[%s738_s1 + $0x48] sm:$0xff] }
   0x7   :  { %421 = vmatpush3.bf16.msra.mxu1 %v71_v9  ;;  %400 = vmatprep.subr.bf16.mxu0 %v62_v3 }
   0x8   :  { %422 = vmatprep.subr.bf16.mxu1 %v78_v5 }
   0xa   :  { %401 = vmatpush3.bf16.msra.mxu0 %v54_v12 }
   0xb   :  { %423 = vmatpush3.bf16.msra.mxu1 %v70_v13  ;;  %402 = vmatprep.subr.bf16.mxu0 %v61_v14 }
   0xc   :  { %424 = vmatprep.subr.bf16.mxu1 %v77_v15 }
   0xe   :  { %403 = vmatpush3.bf16.msra.mxu0 %v53_v20 }
   0xf   :  { %425 = vmatpush3.bf16.msra.mxu1 %v69_v21  ;;  %404 = vmatprep.subr.bf16.mxu0 %v60_v24 }
  0x10   :  { %426 = vmatprep.subr.bf16.mxu1 %v76_v25 }
  0x11   :  { %13 = vsyncpa [#allocation5], 0  ;;  %178 = vmatprep.mubr.bf16.mxu1 %v386_v27  ;;  %v51_v34 = vunpack.c.h.s8.bf16 %v29_v28  ;;  %v67_v35 = vunpack.c.h.s8.bf16 %v37_v33  ;;  %v58_v36 = vunpack.c.l.s8.bf16 %v33_v22  ;;  %v74_v37 = vunpack.c.l.s8.bf16 %v41_v23  ;;  %v32_v38 = vld [vmem:[%s738_s1 + $0x20] sm:$0xff]  ;;  %v47_v52 = vld [vmem:[%s738_s1 + $0x98] sm:$0xff]  ;;  %s565_s11 = smov [#allocation2]  }
  0x12   :  { %405 = vmatpush3.bf16.msra.mxu0 %v52_v29  ;;  %v40_v39 = vld [vmem:[%s738_s1 + $0x60] sm:$0xff]  ;;  %v50_v40 = vunpack.c.l.s8.bf16 %v29_v28  ;;  %v66_v41 = vunpack.c.l.s8.bf16 %v37_v33  ;;  %v57_v42 = vunpack.c.h.s8.bf16 %v32_v38  ;;  %v56_v48 = vunpack.c.l.s8.bf16 %v32_v38  ;;  %v46_v58 = vld [vmem:[%s738_s1 + $0x90] sm:$0xff]  ;;  %v45_v61 = vld [vmem:[%s738_s1 + $0x88] sm:$0xff]  ;;  %s361_s12 = sshll.u32 %s565_s11, 4  ;;  %s362_s12 = int_to_ptr.vmem [resolvable:$true] %s361_s12 }
  0x13   :  { %427 = vmatpush3.bf16.msra.mxu1 %v68_v30  ;;  %406 = vmatprep.subr.bf16.mxu0 %v59_v31  ;;  %v73_v43 = vunpack.c.h.s8.bf16 %v40_v39  ;;  %v28_v44 = vld [vmem:[%s738_s1] sm:$0xff]  ;;  %v72_v49 = vunpack.c.l.s8.bf16 %v40_v39  ;;  %v383_v53 = vcombine.low %v629_v18, %v629_v18  ;;  %v385_v54 = vcombine.low %v634_v19, %v634_v19  ;;  %v508_v3 = vld [vmem:[%s737_s0 + $0x10] ss:$0 sps:$4 sm:$0xff]   ;;  %v509_v4 = vld [vmem:[%s741_s4 + $0x38] sm:$0xff]   ;;  %s519_s13 = scalar_lea.vmem %s362_s12, 128  ;;  %p524_p1 = scmp.lt.s32.totalorder %s362_s12, %s362_s12 }
  0x14   :  { %428 = vmatprep.subr.bf16.mxu1 %v75_v32  ;;  %v36_v45 = vld [vmem:[%s738_s1 + $0x40] sm:$0xff]  ;;  %v49_v46 = vunpack.c.h.s8.bf16 %v28_v44  ;;  %v48_v50 = vunpack.c.l.s8.bf16 %v28_v44  ;;  %v87_v55 = vunpack.c.h.s8.bf16 %v47_v52  ;;  %v563_v56 = vmov 0.0   ;;  %v510_v5 = vld [vmem:[%s741_s4 + $0x30] sm:$0xff]   ;;  %v511_v6 = vld [vmem:[%s741_s4 + $0x28] sm:$0xff]   ;;  %p520_p0 = scmp.ne.s32.totalorder %s362_s12, %s519_s13  ;;  %p525_p2 = scmp.lt.s32.totalorder %s519_s13, %s519_s13 }
  0x15   :  { %v65_v47 = vunpack.c.h.s8.bf16 %v36_v45  ;;  %v64_v51 = vunpack.c.l.s8.bf16 %v36_v45  ;;  %v86_v57 = vunpack.c.l.s8.bf16 %v47_v52  ;;  %vm564_vm0 = vmmov 0   ;;  %v44_v0 = vld [vmem:[%s738_s1 + $0x80] sm:$0xff]  ;;  %v513_v29 = vld [vmem:[%s741_s4 + $0x18] sm:$0xff]   ;;  %v514_v30 = vld [vmem:[%s741_s4 + $0x10] sm:$0xff]  }
  0x16   :  { %407 = vmatpush3.bf16.msra.mxu0 %v51_v34  ;;  %v85_v59 = vunpack.c.h.s8.bf16 %v46_v58  ;;  %v84_v60 = vunpack.c.l.s8.bf16 %v46_v58  ;;  %v83_v62 = vunpack.c.h.s8.bf16 %v45_v61  ;;  %v82_v63 = vunpack.c.l.s8.bf16 %v45_v61  ;;  %v388_v19 = vld [vmem:[%s739_s2] ss:$0 sm:$0xff]  ;;  %v515_v31 = vld [vmem:[%s741_s4 + $0x8] sm:$0xff]   ;;  %p526_p3 = por %p525_p2, %p524_p1 }
  0x17   :  { %429 = vmatpush3.bf16.msra.mxu1 %v67_v35  ;;  %408 = vmatprep.subr.bf16.mxu0 %v58_v36  ;;  %v81_v1 = vunpack.c.h.s8.bf16 %v44_v0  ;;  %v80_v2 = vunpack.c.l.s8.bf16 %v44_v0  ;;  %v389_v22 = vld [vmem:[%s740_s3] ss:$0 sm:$0xff] }
  0x18   :  { %430 = vmatprep.subr.bf16.mxu1 %v74_v37  ;;  %v512_v28 = vld [vmem:[%s741_s4 + $0x20] sm:$0xff]   ;;  %p527_p4 = pnand %p526_p3, %p520_p0 }
  0x19   :  { %v516_v32 = vld [vmem:[%s741_s4] sm:$0xff]  }
  0x1a   :  { %409 = vmatpush3.bf16.msra.mxu0 %v50_v40 }
  0x1b   :  { %431 = vmatpush3.bf16.msra.mxu1 %v66_v41  ;;  %410 = vmatprep.subr.bf16.mxu0 %v57_v42 }
  0x1c   :  { %432 = vmatprep.subr.bf16.mxu1 %v73_v43 }
  0x1e   :  { %411 = vmatpush3.bf16.msra.mxu0 %v49_v46 }
  0x1f   :  { %433 = vmatpush3.bf16.msra.mxu1 %v65_v47  ;;  %412 = vmatprep.subr.bf16.mxu0 %v56_v48 }
  0x20   :  { %434 = vmatprep.subr.bf16.mxu1 %v72_v49 }
  0x22   :  { %413 = vmatpush3.bf16.msra.mxu0 %v48_v50 }
  0x23   :  { %435 = vmatpush3.bf16.msra.mxu1 %v64_v51  ;;  %460 = vmatprep.subr.bf16.mxu0 %v563_v56 }
  0x24   :  { %480 = vmatprep.subr.bf16.mxu1 %v563_v56 }
  0x25   :  { %139 = vmatmul.mubr.bf16.vlgmr.msra.gmra.mxu0 %v383_v53 }
  0x26   :  { %179 = vmatmul.mubr.bf16.vlgmr.msra.gmra.mxu1 %v385_v54  ;;  %461 = vmatpush3.bf16.msra.mxu0 %v87_v55 }
  0x27   :  { %476 = vmatprep.mubr.msk.bf16.mxu0 %vm564_vm0, %v563_v56  ;;  %462 = vmatprep.subr.bf16.mxu0 %v563_v56 }
  0x28   :  { %496 = vmatprep.mubr.msk.bf16.mxu1 %vm564_vm0, %v563_v56  ;;  %481 = vmatpush3.bf16.msra.mxu1 %v509_v4 }
  0x29   :  { %482 = vmatprep.subr.bf16.mxu1 %v563_v56 }
  0x2a   :  { %463 = vmatpush3.bf16.msra.mxu0 %v86_v57 }
  0x2b   :  { %464 = vmatprep.subr.bf16.mxu0 %v563_v56 }
  0x2c   :  { %483 = vmatpush3.bf16.msra.mxu1 %v510_v5 }
  0x2d   :  { %484 = vmatprep.subr.bf16.mxu1 %v563_v56 }
  0x2e   :  { %465 = vmatpush3.bf16.msra.mxu0 %v85_v59 }
  0x2f   :  { %466 = vmatprep.subr.bf16.mxu0 %v563_v56 }
  0x30   :  { %485 = vmatpush3.bf16.msra.mxu1 %v511_v6 }
  0x31   :  { %486 = vmatprep.subr.bf16.mxu1 %v563_v56 }
  0x32   :  { %467 = vmatpush3.bf16.msra.mxu0 %v84_v60 }
  0x33   :  { %468 = vmatprep.subr.bf16.mxu0 %v563_v56 }
  0x34   :  { %487 = vmatpush3.bf16.msra.mxu1 %v512_v28 }
  0x35   :  { %488 = vmatprep.subr.bf16.mxu1 %v563_v56 }
  0x36   :  { %469 = vmatpush3.bf16.msra.mxu0 %v83_v62 }
  0x37   :  { %470 = vmatprep.subr.bf16.mxu0 %v563_v56 }
  0x38   :  { %489 = vmatpush3.bf16.msra.mxu1 %v513_v29 }
  0x39   :  { %490 = vmatprep.subr.bf16.mxu1 %v563_v56 }
  0x3a   :  { %471 = vmatpush3.bf16.msra.mxu0 %v82_v63 }
  0x3b   :  { %472 = vmatprep.subr.bf16.mxu0 %v563_v56 }
  0x3c   :  { %491 = vmatpush3.bf16.msra.mxu1 %v514_v30 }
  0x3d   :  { %492 = vmatprep.subr.bf16.mxu1 %v563_v56 }
  0x3e   :  { %473 = vmatpush3.bf16.msra.mxu0 %v81_v1 }
  0x3f   :  { %474 = vmatprep.subr.bf16.mxu0 %v563_v56 }
  0x40   :  { %493 = vmatpush3.bf16.msra.mxu1 %v515_v31 }
  0x41   :  { %494 = vmatprep.subr.bf16.mxu1 %v563_v56 }
  0x42   :  { %475 = vmatpush3.bf16.msra.mxu0 %v80_v2 }
  0x44   :  { %495 = vmatpush3.bf16.msra.mxu1 %v516_v32 }
  0x45   :  { %477 = vmatmul.mubr.bf16.vlgmr.msra.gmra.mxu0 %v508_v3 }
  0xe5   :  { %v414_v7 = vpop.f32.mrf.mxu0 }
  0xe6   :  { %v436_v8 = vpop.f32.mrf.mxu1 }
  0xe7   :  { %v415_v9 = vpop.f32.mrf.mxu0 }
  0xe8   :  { %v437_v10 = vpop.f32.mrf.mxu1  ;;  %v416_v15 = vadd.f32 %v415_v9, %v414_v7 }
  0xe9   :  { %v417_v11 = vpop.f32.mrf.mxu0  ;;  %v438_v16 = vadd.f32 %v437_v10, %v436_v8 }
  0xea   :  { %v439_v12 = vpop.f32.mrf.mxu1 }
  0xeb   :  { %v418_v13 = vpop.f32.mrf.mxu0  ;;  %v181_v17 = vadd.f32 %v438_v16, %v416_v15 }
  0xec   :  { %v440_v14 = vpop.f32.mrf.mxu1 }
 0x105   :  { %v220_v18 = vpop.f32.mrf.mxu0 }
 0x106   :  { %v221_v20 = vadd.f32 %v220_v18, %v181_v17 }
 0x107   :  { %v478_v21 = vpop.f32.mrf.mxu0 }
 0x108   :  { %v233_v23 = vmul.f32 %v388_v19, %v221_v20 }
 0x109   :  { %v223_v24 = vpop.f32.mrf.mxu0 }
 0x10a   :  { %v241_v25 = vadd.f32 %v389_v22, %v233_v23 }
 0x10b   :  { %v479_v26 = vpop.f32.mrf.mxu0 }
 0x10c   :  { %v242_v27 = vmul.f32 %v241_v25, %v241_v25 }
 0x10e   :  { %243 = vadd.xlane.f32.xlu0 %v242_v27 }
 0x197   :  { %v244_v33 = vpop.xlane.xlu0 %243 }
 0x198   :  { %v245_v34 = vmax.f32 %v244_v33, 1e-24 }
 0x19a   :  { %517 = vrsqrt.f32 %v245_v34 }
 0x1a7   :  { %v518_v35 = vpop.eup %517 }
 0x1a8   :  { %v247_v36 = vmul.f32 %v518_v35, %v241_v25 }
 0x1aa   :  { %v249_v37 = vpack.c.bf16 %v247_v36, %v247_v36  ;;  %248 = vst [vmem:[#allocation2] sm:$0xff] %v247_v36 }
 0x1ac   :  { %497 = vmatmul.mubr.bf16.vlgmr.msra.gmra.mxu1 %v249_v37 }
 0x1ad   :  { %530 = shalt.err (!%p527_p4)
}
 0x1ae   :  { %364 = dma.vmem_to_hbm [thread:$0]  %s362_s12, 128, %s742_s5, [#allocation3]  }
 0x1af   :  { %s566_s15 = smov [#allocation4]  }
 0x1b0   :  { %s371_s16 = sshll.u32 %s566_s15, 4  ;;  %s372_s16 = int_to_ptr.vmem [resolvable:$true] %s371_s16 }
 0x1b1   :  { %s539_s17 = scalar_lea.vmem %s372_s16, 128  ;;  %p544_p6 = scmp.lt.s32.totalorder %s372_s16, %s372_s16 }
 0x1b2   :  { %p540_p5 = scmp.ne.s32.totalorder %s372_s16, %s539_s17  ;;  %p545_p7 = scmp.lt.s32.totalorder %s539_s17, %s539_s17 }
 0x1b4   :  { %p546_p8 = por %p545_p7, %p544_p6 }
 0x1b6   :  { %p547_p9 = pnand %p546_p8, %p540_p5 }
 0x26c   :  { %v348_v38 = vpop.f32.mrf.mxu1 }
 0x26d   :  { %354 = vst [vmem:[#allocation4] sm:$0xff] %v348_v38 }
 0x26e   :  { %v498_v39 = vpop.f32.mrf.mxu1 }
 0x26f   :  { %550 = shalt.err (!%p547_p9)
}
 0x270   :  { %374 = dma.vmem_to_hbm [thread:$0]  %s372_s16, 128, %s743_s6, [#allocation5]   ;;  %v351_v40 = vpop.f32.mrf.mxu1 }
 0x272   :  { %v499_v41 = vpop.f32.mrf.mxu1 }
 0x273   :  { %559 = dma.done.wait [#allocation3], 128  }
 0x274   :  { %560 = vsyncadd [#allocation3], 4294967168 }
 0x275   :  { %561 = dma.done.wait [#allocation5], 128  }
 0x276   :  { %562 = vsyncadd [#allocation5], 4294967168 }
 0x277   :  { %381 = vsyncpa [#allocation3], 1 }
 0x278   :  { %382 = vsyncpa [#allocation5], 1 }

</bundles_post_ra>
